<compile_context>
chip_gen: v5e
topology: v5e:2x2
jax: 0.10.0
libtpu: 0.0.40
codegen_flags: <defaults>
</compile_context>

<pallas_src>
import jax
import jax.numpy as jnp
from jax import lax
from jax.experimental import pallas as pl
from jax.experimental.pallas import tpu as pltpu

EMBED_SIZE = 256          # embed_size in the reference module
FEATURE_DIM = 2048        # inception_v3 pooled feature dim
BN_EPS = 1e-5             # nn.BatchNorm1d default eps


def _round_up(x, m):
    return ((x + m - 1) // m) * m


def _pick_batch_tile(B):
    """Largest MXU/VMEM-friendly tile that evenly divides B (stats need full tiles)."""
    for tb in (256, 128, 64, 32, 16, 8):
        if B % tb == 0:
            return tb
    return B  # tiny / odd batch: single tile (block == full dim is allowed)


def encoder_head(pooled, proj, weight, gamma, beta):
    """Fused (pooled @ proj) @ W  +  training-mode BatchNorm1d.

    pooled: (B, C) f32   stand-in backbone pooled activations
    proj:   (C, F) f32   stand-in backbone projection to 2048 features
    weight: (F, E) f32   nn.Linear(2048, embed) weight (stored transposed)
    gamma, beta: (E,)    BatchNorm1d affine parameters
    returns (B, E) f32
    """
    B, C = pooled.shape
    F, E = weight.shape

    # Zero-pad the tiny stand-in channel dim so the first matmul's K dim is
    # lane-aligned (exact: zero rows/cols contribute nothing).
    Cp = _round_up(C, 128)
    pooled_bf = jnp.pad(pooled, ((0, 0), (0, Cp - C))).astype(jnp.bfloat16)
    proj_bf = jnp.pad(proj, ((0, Cp - C), (0, 0))).astype(jnp.bfloat16)
    w_bf = weight.astype(jnp.bfloat16)                  # halves the weight DMA
    gb = jnp.stack([gamma, beta]).astype(jnp.float32)   # (2, E) packed affine

    TB = _pick_batch_tile(B)
    nB = B // TB
    inv_count = 1.0 / float(B)

    def kernel(pooled_ref, proj_ref, w_ref, gb_ref, out_ref, stats_ref, z_ref):
        p = pl.program_id(0)        # 0: batch-stats pass, 1: normalize pass
        j = pl.program_id(1)        # batch tile

        @pl.when(p == 0)
        def _stats_pass():
            # Fused stand-in-backbone projection + Linear(2048 -> E).
            # bf16 operands, f32 accumulation on the MXU.
            # NOTE: Linear bias omitted -- cancelled exactly by the
            # training-mode BatchNorm mean subtraction.
            feat = jnp.dot(pooled_ref[...], proj_ref[...],
                           preferred_element_type=jnp.float32)      # (TB, F) f32
            z = jnp.dot(feat.astype(jnp.bfloat16), w_ref[...],
                        preferred_element_type=jnp.float32)         # (TB, E) f32

            # Stash z in VMEM so pass 1 does not recompute the matmuls.
            row0 = pl.multiple_of(j * TB, TB)
            z_ref[pl.ds(row0, TB), :] = z

            @pl.when(j == 0)
            def _init():
                stats_ref[...] = jnp.zeros_like(stats_ref)

            stats_ref[0:1, :] = stats_ref[0:1, :] + jnp.sum(z, axis=0, keepdims=True)
            stats_ref[1:2, :] = stats_ref[1:2, :] + jnp.sum(z * z, axis=0, keepdims=True)

        @pl.when((p == 1) & (j == 0))
        def _finalize_stats():
            # Fold BN to a single per-feature scale/shift; computed once,
            # stored in-place over the raw sums (only consumers are below).
            mean = stats_ref[0:1, :] * inv_count                    # (1, E)
            var = stats_ref[1:2, :] * inv_count - mean * mean       # biased (torch)
            inv_std = lax.rsqrt(var + BN_EPS)                       # EUP
            scale = gb_ref[0:1, :] * inv_std                        # gamma / std
            shift = gb_ref[1:2, :] - mean * scale                   # beta - mean*scale
            stats_ref[0:1, :] = scale
            stats_ref[1:2, :] = shift

        @pl.when(p == 1)
        def _normalize():
            row0 = pl.multiple_of(j * TB, TB)
            z = z_ref[pl.ds(row0, TB), :]                           # (TB, E) f32
            out_ref[...] = z * stats_ref[0:1, :] + stats_ref[1:2, :]  # 1 mul + 1 add

    return pl.pallas_call(
        kernel,
        out_shape=jax.ShapeDtypeStruct((B, E), jnp.float32),
        grid=(2, nB),
        in_specs=[
            # pooled: tiled over batch in pass 0; pinned to the last-fetched
            # block in pass 1 (kernel never reads it there -> zero extra DMAs).
            pl.BlockSpec((TB, Cp), lambda p, j: ((1 - p) * j + p * (nB - 1), 0)),
            pl.BlockSpec((Cp, F), lambda p, j: (0, 0)),    # proj:   VMEM-resident
            pl.BlockSpec((F, E), lambda p, j: (0, 0)),     # weight: VMEM-resident
            pl.BlockSpec((2, E), lambda p, j: (0, 0)),     # packed gamma/beta
        ],
        # During the stats pass (p=0) the output block index stays at 0 so the
        # (never-written) output buffer is never flushed; pass 1 writes tile j.
        out_specs=pl.BlockSpec((TB, E), lambda p, j: (p * j, 0)),
        scratch_shapes=[
            pltpu.VMEM((2, E), jnp.float32),   # [sum; sumsq] -> [scale; shift]
            pltpu.VMEM((B, E), jnp.float32),   # z stash (avoids matmul recompute)
        ],
        compiler_params=pltpu.CompilerParams(
            # Both axes sequential: batch tiles share the stats/z scratch and
            # the normalize pass depends on all stats-pass iterations.
            dimension_semantics=("arbitrary", "arbitrary")),
    )(pooled_bf, proj_bf, w_bf, gb)


def encoder_cnn_forward(images, params):
    # Stand-in backbone, stage 1 (plain JAX glue): global average pool.
    pooled = jnp.mean(images, axis=(2, 3))               # (B, C)
    # Stage 2 (projection to 2048) + Linear + BatchNorm run inside the kernel.
    # params["linear_b"] is intentionally not passed: training-mode BN cancels it.
    return encoder_head(pooled, params["backbone_proj"], params["linear_w"],
                        params["bn_gamma"], params["bn_beta"])


def init_params(key, in_channels):
    k1, k2, k3 = jax.random.split(key, 3)
    # Deterministic, synthetic parameter init (shapes from the module __init__).
    backbone_proj = jax.random.normal(k1, (in_channels, FEATURE_DIM),
                                      dtype=jnp.float32) * 0.5
    # nn.Linear(2048, embed_size): weight stored transposed as (2048, embed).
    bound = 1.0 / jnp.sqrt(FEATURE_DIM)
    linear_w = jax.random.uniform(k2, (FEATURE_DIM, EMBED_SIZE),
                                  minval=-bound, maxval=bound, dtype=jnp.float32)
    linear_b = jax.random.uniform(k3, (EMBED_SIZE,),
                                  minval=-bound, maxval=bound, dtype=jnp.float32)
    bn_gamma = jnp.ones((EMBED_SIZE,), dtype=jnp.float32)
    bn_beta = jnp.zeros((EMBED_SIZE,), dtype=jnp.float32)
    return {
        "backbone_proj": backbone_proj,
        "linear_w": linear_w,
        "linear_b": linear_b,   # kept for module fidelity; cancelled by BN mean
        "bn_gamma": bn_gamma,
        "bn_beta": bn_beta,
    }


if __name__ == "__main__":
    key = jax.random.PRNGKey(0)
    k_img, k_par = jax.random.split(key)

    # Small example input consistent with the forward: NCHW images.
    B, C, H, W = 2, 3, 32, 32
    images = jax.random.normal(k_img, (B, C, H, W), dtype=jnp.float32)
    params = init_params(k_par, C)

    out = encoder_cnn_forward(images, params)
    out = jax.block_until_ready(out)

    # Plain-JAX reference with the same bf16-operand / f32-accumulate matmuls.
    # The Linear bias IS included here to demonstrate that dropping it in the
    # kernel is exact (training-mode BN subtracts the batch mean).
    pooled = jnp.mean(images, axis=(2, 3))
    feat = jnp.dot(pooled.astype(jnp.bfloat16),
                   params["backbone_proj"].astype(jnp.bfloat16),
                   preferred_element_type=jnp.float32)
    z = jnp.dot(feat.astype(jnp.bfloat16),
                params["linear_w"].astype(jnp.bfloat16),
                preferred_element_type=jnp.float32) + params["linear_b"]
    mean = jnp.mean(z, axis=0, keepdims=True)
    var = jnp.mean((z - mean) ** 2, axis=0, keepdims=True)   # biased, like torch
    ref = params["bn_gamma"] * (z - mean) / jnp.sqrt(var + BN_EPS) + params["bn_beta"]

    assert out.shape == (B, EMBED_SIZE)
    assert jnp.allclose(out, ref, atol=5e-3, rtol=5e-3), \
        float(jnp.max(jnp.abs(out - ref)))
    print("KERNEL_OK")
</pallas_src>

<mosaic_0001>
module attributes {stable_mosaic.version = 11 : i64} {
  func.func @kernel(%arg0: i32, %arg1: i32, %arg2: memref<2x128xbf16, #tpu.memory_space<vmem>>, %arg3: memref<128x2048xbf16, #tpu.memory_space<vmem>>, %arg4: memref<2048x256xbf16, #tpu.memory_space<vmem>>, %arg5: memref<2x256xf32, #tpu.memory_space<vmem>>, %arg6: memref<2x256xf32, #tpu.memory_space<vmem>>, %arg7: memref<2x256xf32, #tpu.memory_space<vmem>>, %arg8: memref<2x256xf32, #tpu.memory_space<vmem>>) attributes {dimension_semantics = [#tpu.dimension_semantics<arbitrary>, #tpu.dimension_semantics<arbitrary>], iteration_bounds = array<i64: 2, 1>, scalar_prefetch = 0 : i64, scratch_operands = 2 : i64, tpu.core_type = #tpu.core_type<tc>, window_params = [{transform_indices = @transform_0, window_bounds = array<i64: 2, 128>}, {pipeline_mode = #tpu.pipeline_mode<synchronous>, transform_indices = @transform_1, window_bounds = array<i64: 128, 2048>}, {pipeline_mode = #tpu.pipeline_mode<synchronous>, transform_indices = @transform_2, window_bounds = array<i64: 2048, 256>}, {pipeline_mode = #tpu.pipeline_mode<synchronous>, transform_indices = @transform_3, window_bounds = array<i64: 2, 256>}, {transform_indices = @transform_4, window_bounds = array<i64: 2, 256>}]} {
    %c0_i32 = arith.constant 0 : i32
    %0 = arith.cmpi eq, %arg0, %c0_i32 : i32
    %1 = arith.extui %0 : i1 to i32
    %c0_i32_0 = arith.constant 0 : i32
    %2 = arith.cmpi ne, %1, %c0_i32_0 : i32
    scf.if %2 {
      %c0 = arith.constant 0 : index
      %c0_5 = arith.constant 0 : index
      %11 = vector.load %arg2[%c0, %c0_5] : memref<2x128xbf16, #tpu.memory_space<vmem>>, vector<2x128xbf16>
      %c0_6 = arith.constant 0 : index
      %c0_7 = arith.constant 0 : index
      %12 = vector.load %arg3[%c0_6, %c0_7] : memref<128x2048xbf16, #tpu.memory_space<vmem>>, vector<128x2048xbf16>
      %cst = arith.constant dense<0.000000e+00> : vector<2x2048xf32>
      %13 = tpu.matmul %11, %12, %cst {dimension_numbers = #tpu.dot_dimension_numbers<[1], [0], [0], [1], [0, 0, 1, 1], [], []>} : vector<2x128xbf16>, vector<128x2048xbf16>, vector<2x2048xf32> -> vector<2x2048xf32>
      %14 = arith.truncf %13 : vector<2x2048xf32> to vector<2x2048xbf16>
      %c0_8 = arith.constant 0 : index
      %c0_9 = arith.constant 0 : index
      %15 = vector.load %arg4[%c0_8, %c0_9] : memref<2048x256xbf16, #tpu.memory_space<vmem>>, vector<2048x256xbf16>
      %cst_10 = arith.constant dense<0.000000e+00> : vector<2x256xf32>
      %16 = tpu.matmul %14, %15, %cst_10 {dimension_numbers = #tpu.dot_dimension_numbers<[1], [0], [0], [1], [0, 0, 1, 1], [], []>} : vector<2x2048xbf16>, vector<2048x256xbf16>, vector<2x256xf32> -> vector<2x256xf32>
      %c2_i32 = arith.constant 2 : i32
      %17 = arith.muli %arg1, %c2_i32 : i32
      %18 = tpu.assume_multiple %17, 2 : i32
      %19 = arith.index_cast %18 : i32 to index
      %c0_11 = arith.constant 0 : index
      %20 = vector.load %arg8[%19, %c0_11] : memref<2x256xf32, #tpu.memory_space<vmem>>, vector<2x256xf32>
      tpu.vector_store %arg8[%19, %c0_11], %16 {strides = array<i32>} : memref<2x256xf32, #tpu.memory_space<vmem>>, vector<2x256xf32>,
      %c0_i32_12 = arith.constant 0 : i32
      %21 = arith.cmpi eq, %arg1, %c0_i32_12 : i32
      %22 = arith.extui %21 : i1 to i32
      %c0_i32_13 = arith.constant 0 : i32
      %23 = arith.cmpi ne, %22, %c0_i32_13 : i32
      scf.if %23 {
        %cst_23 = arith.constant 0.000000e+00 : f32
        %35 = vector.broadcast %cst_23 : f32 to vector<2x256xf32>
        %c0_24 = arith.constant 0 : index
        %c0_25 = arith.constant 0 : index
        %36 = vector.load %arg7[%c0_24, %c0_25] : memref<2x256xf32, #tpu.memory_space<vmem>>, vector<2x256xf32>
        tpu.vector_store %arg7[%c0_24, %c0_25], %35 {strides = array<i32>} : memref<2x256xf32, #tpu.memory_space<vmem>>, vector<2x256xf32>,
      } else {
      }
      %c0_14 = arith.constant 0 : index
      %c0_15 = arith.constant 0 : index
      %24 = vector.load %arg7[%c0_14, %c0_15] : memref<2x256xf32, #tpu.memory_space<vmem>>, vector<1x256xf32>
      %cst_16 = arith.constant dense<0.000000e+00> : vector<256xf32>
      %25 = vector.multi_reduction <add>, %16, %cst_16 [0] : vector<2x256xf32> to vector<256xf32>
      %26 = vector.shape_cast %25 : vector<256xf32> to vector<1x256xf32>
      %27 = arith.addf %24, %26 : vector<1x256xf32>
      %c0_17 = arith.constant 0 : index
      %c0_18 = arith.constant 0 : index
      %28 = vector.load %arg7[%c0_17, %c0_18] : memref<2x256xf32, #tpu.memory_space<vmem>>, vector<1x256xf32>
      tpu.vector_store %arg7[%c0_17, %c0_18], %27 {strides = array<i32>} : memref<2x256xf32, #tpu.memory_space<vmem>>, vector<1x256xf32>,
      %c1 = arith.constant 1 : index
      %c0_19 = arith.constant 0 : index
      %29 = vector.load %arg7[%c1, %c0_19] : memref<2x256xf32, #tpu.memory_space<vmem>>, vector<1x256xf32>
      %30 = arith.mulf %16, %16 : vector<2x256xf32>
      %cst_20 = arith.constant dense<0.000000e+00> : vector<256xf32>
      %31 = vector.multi_reduction <add>, %30, %cst_20 [0] : vector<2x256xf32> to vector<256xf32>
      %32 = vector.shape_cast %31 : vector<256xf32> to vector<1x256xf32>
      %33 = arith.addf %29, %32 : vector<1x256xf32>
      %c1_21 = arith.constant 1 : index
      %c0_22 = arith.constant 0 : index
      %34 = vector.load %arg7[%c1_21, %c0_22] : memref<2x256xf32, #tpu.memory_space<vmem>>, vector<1x256xf32>
      tpu.vector_store %arg7[%c1_21, %c0_22], %33 {strides = array<i32>} : memref<2x256xf32, #tpu.memory_space<vmem>>, vector<1x256xf32>,
    } else {
    }
    %c1_i32 = arith.constant 1 : i32
    %3 = arith.cmpi eq, %arg0, %c1_i32 : i32
    %c0_i32_1 = arith.constant 0 : i32
    %4 = arith.cmpi eq, %arg1, %c0_i32_1 : i32
    %5 = arith.andi %3, %4 : i1
    %6 = arith.extui %5 : i1 to i32
    %c0_i32_2 = arith.constant 0 : i32
    %7 = arith.cmpi ne, %6, %c0_i32_2 : i32
    scf.if %7 {
      %c0 = arith.constant 0 : index
      %c0_5 = arith.constant 0 : index
      %11 = vector.load %arg7[%c0, %c0_5] : memref<2x256xf32, #tpu.memory_space<vmem>>, vector<1x256xf32>
      %cst = arith.constant 5.000000e-01 : f32
      %12 = vector.broadcast %cst : f32 to vector<1x256xf32>
      %13 = arith.mulf %11, %12 : vector<1x256xf32>
      %c1 = arith.constant 1 : index
      %c0_6 = arith.constant 0 : index
      %14 = vector.load %arg7[%c1, %c0_6] : memref<2x256xf32, #tpu.memory_space<vmem>>, vector<1x256xf32>
      %cst_7 = arith.constant 5.000000e-01 : f32
      %15 = vector.broadcast %cst_7 : f32 to vector<1x256xf32>
      %16 = arith.mulf %14, %15 : vector<1x256xf32>
      %17 = arith.mulf %13, %13 : vector<1x256xf32>
      %18 = arith.subf %16, %17 : vector<1x256xf32>
      %cst_8 = arith.constant 9.99999974E-6 : f32
      %19 = vector.broadcast %cst_8 : f32 to vector<1x256xf32>
      %20 = arith.addf %18, %19 : vector<1x256xf32>
      %21 = math.rsqrt %20 : vector<1x256xf32>
      %c0_9 = arith.constant 0 : index
      %c0_10 = arith.constant 0 : index
      %22 = vector.load %arg5[%c0_9, %c0_10] : memref<2x256xf32, #tpu.memory_space<vmem>>, vector<1x256xf32>
      %23 = arith.mulf %22, %21 : vector<1x256xf32>
      %c1_11 = arith.constant 1 : index
      %c0_12 = arith.constant 0 : index
      %24 = vector.load %arg5[%c1_11, %c0_12] : memref<2x256xf32, #tpu.memory_space<vmem>>, vector<1x256xf32>
      %25 = arith.mulf %13, %23 : vector<1x256xf32>
      %26 = arith.subf %24, %25 : vector<1x256xf32>
      %c0_13 = arith.constant 0 : index
      %c0_14 = arith.constant 0 : index
      %27 = vector.load %arg7[%c0_13, %c0_14] : memref<2x256xf32, #tpu.memory_space<vmem>>, vector<1x256xf32>
      tpu.vector_store %arg7[%c0_13, %c0_14], %23 {strides = array<i32>} : memref<2x256xf32, #tpu.memory_space<vmem>>, vector<1x256xf32>,
      %c1_15 = arith.constant 1 : index
      %c0_16 = arith.constant 0 : index
      %28 = vector.load %arg7[%c1_15, %c0_16] : memref<2x256xf32, #tpu.memory_space<vmem>>, vector<1x256xf32>
      tpu.vector_store %arg7[%c1_15, %c0_16], %26 {strides = array<i32>} : memref<2x256xf32, #tpu.memory_space<vmem>>, vector<1x256xf32>,
    } else {
    }
    %c1_i32_3 = arith.constant 1 : i32
    %8 = arith.cmpi eq, %arg0, %c1_i32_3 : i32
    %9 = arith.extui %8 : i1 to i32
    %c0_i32_4 = arith.constant 0 : i32
    %10 = arith.cmpi ne, %9, %c0_i32_4 : i32
    scf.if %10 {
      %c2_i32 = arith.constant 2 : i32
      %11 = arith.muli %arg1, %c2_i32 : i32
      %12 = tpu.assume_multiple %11, 2 : i32
      %13 = arith.index_cast %12 : i32 to index
      %c0 = arith.constant 0 : index
      %14 = vector.load %arg8[%13, %c0] : memref<2x256xf32, #tpu.memory_space<vmem>>, vector<2x256xf32>
      %c0_5 = arith.constant 0 : index
      %c0_6 = arith.constant 0 : index
      %15 = vector.load %arg7[%c0_5, %c0_6] : memref<2x256xf32, #tpu.memory_space<vmem>>, vector<1x256xf32>
      %16 = vector.broadcast %15 : vector<1x256xf32> to vector<2x256xf32>
      %17 = arith.mulf %14, %16 : vector<2x256xf32>
      %c1 = arith.constant 1 : index
      %c0_7 = arith.constant 0 : index
      %18 = vector.load %arg7[%c1, %c0_7] : memref<2x256xf32, #tpu.memory_space<vmem>>, vector<1x256xf32>
      %19 = vector.broadcast %18 : vector<1x256xf32> to vector<2x256xf32>
      %20 = arith.addf %17, %19 : vector<2x256xf32>
      %c0_8 = arith.constant 0 : index
      %c0_9 = arith.constant 0 : index
      %21 = vector.load %arg6[%c0_8, %c0_9] : memref<2x256xf32, #tpu.memory_space<vmem>>, vector<2x256xf32>
      tpu.vector_store %arg6[%c0_8, %c0_9], %20 {strides = array<i32>} : memref<2x256xf32, #tpu.memory_space<vmem>>, vector<2x256xf32>,
    } else {
    }
    return
  }
  func.func @transform_0(%arg0: i32, %arg1: i32) -> (i32, i32) {
    %c1_i32 = arith.constant 1 : i32
    %0 = arith.subi %c1_i32, %arg0 : i32
    %1 = arith.muli %0, %arg1 : i32
    %c0_i32 = arith.constant 0 : i32
    %2 = arith.muli %arg0, %c0_i32 : i32
    %3 = arith.addi %1, %2 : i32
    %c0_i32_0 = arith.constant 0 : i32
    %c0_i32_1 = arith.constant 0 : i32
    return %3, %c0_i32_0 : i32, i32
  }
  func.func @transform_1(%arg0: i32, %arg1: i32) -> (i32, i32) {
    %c0_i32 = arith.constant 0 : i32
    %c0_i32_0 = arith.constant 0 : i32
    %c0_i32_1 = arith.constant 0 : i32
    return %c0_i32, %c0_i32_0 : i32, i32
  }
  func.func @transform_2(%arg0: i32, %arg1: i32) -> (i32, i32) {
    %c0_i32 = arith.constant 0 : i32
    %c0_i32_0 = arith.constant 0 : i32
    %c0_i32_1 = arith.constant 0 : i32
    return %c0_i32, %c0_i32_0 : i32, i32
  }
  func.func @transform_3(%arg0: i32, %arg1: i32) -> (i32, i32) {
    %c0_i32 = arith.constant 0 : i32
    %c0_i32_0 = arith.constant 0 : i32
    %c0_i32_1 = arith.constant 0 : i32
    return %c0_i32, %c0_i32_0 : i32, i32
  }
  func.func @transform_4(%arg0: i32, %arg1: i32) -> (i32, i32) {
    %0 = arith.muli %arg0, %arg1 : i32
    %c0_i32 = arith.constant 0 : i32
    %c0_i32_0 = arith.constant 0 : i32
    return %0, %c0_i32 : i32, i32
  }
}

</mosaic_0001>

<bundles_post_ra>
// kernel: tpu_custom_call.1
= control target key start
LH: loop header
LB: loop body
LE: loop exit
PB: predicated region body
PF: predicated region fallthrough
CT: control target
= control target key end

     0   :  { %9 = vsyncpa [#allocation5], 0  ;;  %s5933_s0 = inlined_call_operand.hbm [shape: bf16[2,128], index: 0, kind: input, shape index: {}]   ;;  %s5934_s1 = inlined_call_operand.hbm [shape: bf16[128,2048], index: 1, kind: input, shape index: {}]   ;;  %s5935_s2 = inlined_call_operand.hbm [shape: bf16[2048,256], index: 2, kind: input, shape index: {}]   ;;  %s5936_s3 = inlined_call_operand.hbm [shape: f32[2,256], index: 3, kind: input, shape index: {}]   ;;  %s5937_s4 = inlined_call_operand.hbm [shape: f32[2,256], index: 4, kind: output, shape index: {}]  }
   0x1   :  { %11 = vsyncpa [#allocation5 + $0x1], 0 }
   0x2   :  { %12 = vsyncpa [#allocation8], 0 }
   0x3   :  { %13 = vsyncpa [#allocation11], 0 }
   0x4   :  { %14 = vsyncpa [#allocation6], 0 }
   0x5   :  { %16 = vsyncpa [#allocation6 + $0x1], 0  ;;  %s5741_s15 = smov 0   ;;  %s5743_s16 = smov 0  }
   0x6   :  { %s5745_s17 = smov 0  }
   0x7 LB: > { %s3491_s18 = sadd.s32 4294967295, %s5704_s17   ;;  %s3492_s19 = sadd.s32 4294967294, %s5704_s17   ;;  %s5704_s17 = sphi %s5745_s17, %s22_s17   ;;  %s5700_s16 = sphi %s5743_s16, %s5942_s16   ;;  %s5696_s15 = sphi %s5741_s15, %s5941_s15  }
   0x8   : > { %s34_s20 = sadd.s32 1, %s5700_s16  ;;  %p3493_p0 = scmp.ge.s32.totalorder %s5704_s17, 1 }
   0x9   : > { %p36_p1 = scmp.ge.s32.totalorder %s34_s20, 2  ;;  %p160_p2 = scmp.lt.s32.totalorder %s5704_s17, 3 }
   0xa   : > { %p5763_p3 = scmp.eq.s32.totalorder %s3491_s18, 0  ;;  %s171_s25 = sshll.u32 %s5934_s1, 4  ;;  %s172_s25 = int_to_ptr.hbm [resolvable:$true] %s171_s25 }
   0xb   : > { %s5944_s20 = smov (%p36_p1, %s34_s20), 0  ;;  %p5769_p4 = pnand %p3493_p0, %p160_p2 }
   0xc   : > { %s5706_s26 = smov [#allocation7]   ;;  %p3497_p7 = scmp.ge.s32.totalorder %s5704_s17, 2 }
   0xd   : > { %p5452_p5 = pneg %p5769_p4  ;;  %s173_s27 = sshll.u32 %s5706_s26, 4  ;;  %s174_s27 = int_to_ptr.vmem [resolvable:$true] %s173_s27 }
   0xe   : > { %s185_s5 = sshll.u32 %s5935_s2, 4  ;;  %s5707_s6 = smov 1024   ;;  %s186_s5 = int_to_ptr.hbm [resolvable:$true] %s185_s5 }
   0xf   : > { %p5780_p6 = pnand %p5763_p3, %p5452_p5  ;;  %s5708_s7 = smov 64  }
  0x10   : > { %s5709_s8 = smov [#allocation9]   ;;  %s5710_s10 = smov 128  }
  0x11   : > { %5455 = dma.hbm_to_vmem [thread:$0]  (!%p5780_p6), %s172_s25, 16384, %s174_s27, [#allocation8], %s5707_s6, %s5707_s6, %s5708_s7  }
  0x12   : > { %s187_s9 = sshll.u32 %s5709_s8, 4  ;;  %s5711_s11 = smov 8   ;;  %s188_s9 = int_to_ptr.vmem [resolvable:$true] %s187_s9 }
  0x13   : > { %5458 = dma.hbm_to_vmem [thread:$0]  (!%p5780_p6), %s186_s5, 32768, %s188_s9, [#allocation8], %s5710_s10, %s5710_s10, %s5711_s11  }
  0x14   : > { %s200_s14 = sshll.u32 %s5936_s3, 4  ;;  %s5712_s23 = smov [#allocation10]   ;;  %s201_s14 = int_to_ptr.hbm [resolvable:$true] %s200_s14 }
  0x15   : > { %s202_s24 = sshll.u32 %s5712_s23, 4  ;;  %p5473_p8 = scmp.lt.s32.totalorder %s5704_s17, 2  ;;  %s203_s24 = int_to_ptr.vmem [resolvable:$true] %s202_s24 }
  0x16   : > { %5461 = dma.hbm_to_vmem [thread:$0]  (!%p5780_p6), %s201_s14, 64, %s203_s24, [#allocation11]  }
  0x17   : > { %p5474_p9 = scmp.eq.s32.totalorder %s5704_s17, 0  ;;  %s223_s27 = sshll.u32 %s5933_s0, 4  ;;  %s224_s27 = int_to_ptr.hbm [resolvable:$true] %s223_s27 }
  0x18   : > { %s5713_s29 = smov [#allocation4]   ;;  %234 = sbr.rel (%p5769_p4) target bundleno = 646 (0x286), region = 36 }
  0x19   : > { %s225_s30 = sshll.u32 %s5713_s29, 4  ;;  %p5463_p10 = pnand %p5474_p9, %p5473_p8  ;;  %s226_s30 = int_to_ptr.vmem [resolvable:$true] %s225_s30 }
  0x1b   : > { %5465 = dma.hbm_to_vmem [thread:$0]  (!%p5463_p10), %s224_s27, 16, %s226_s30, [#allocation5]  }
  0x1d   : > { %5679 = dma.done.wait (%p5763_p3), [#allocation5], 16  }
  0x1e   : > { %5681 = vsyncadd (%p5763_p3), [#allocation5], 4294967280 }
  0x1f   : > { %5683 = dma.done.wait (%p5763_p3), [#allocation8], 49152  }
  0x20   : > { %5685 = vsyncadd (%p5763_p3), [#allocation8], 4294918144 }
  0x21   : > { %5687 = dma.done.wait (%p5763_p3), [#allocation11], 64  }
  0x22   : > { %5689 = vsyncadd (%p5763_p3), [#allocation11], 4294967232  ;;  %p3504_p11 = scmp.ne.s32.totalorder %s5696_s15, 0 }
  0x24   : > { %285 = sbr.rel (%p3504_p11) target bundleno = 586 (0x24a), region = 56 }
  0x29   : > { %v3955_v0 = vld [vmem:[#allocation7 + $0x380] sm:$0xf]  ;;  %v5159_v2 = vld [vmem:[#allocation7 + $0x384] sm:$0xf]  ;;  %v3963_v5 = vld [vmem:[#allocation7 + $0x388] sm:$0xf] }
  0x2a   : > { %v5167_v1 = vld [vmem:[#allocation7 + $0x3bc] sm:$0xf0]  ;;  %v3957_v4 = vld [vmem:[#allocation7 + $0x3c0] sm:$0xf0]  ;;  %v5168_v6 = vld [vmem:[#allocation7 + $0x3c4] sm:$0xf0] }
  0x2b   : > { %v3956_v3 = vor.u32 %v5167_v1, %v3955_v0  ;;  %v3960_v7 = vor.u32 %v5159_v2, %v3957_v4  ;;  %v3964_v8 = vor.u32 %v5168_v6, %v3963_v5  ;;  %v5160_v9 = vld [vmem:[#allocation7 + $0x38c] sm:$0xf]  ;;  %v3891_v11 = vld [vmem:[#allocation7 + $0x300] sm:$0xf]  ;;  %v5143_v14 = vld [vmem:[#allocation7 + $0x304] sm:$0xf] }
  0x2c   : > { %v3965_v10 = vld [vmem:[#allocation7 + $0x3c8] sm:$0xf0]  ;;  %v5151_v13 = vld [vmem:[#allocation7 + $0x33c] sm:$0xf0]  ;;  %v3893_v15 = vld [vmem:[#allocation7 + $0x340] sm:$0xf0] }
  0x2d   : > { %1055 = vmatpush.bf16.msra.mxu0 %v3956_v3  ;;  %v3968_v12 = vor.u32 %v5160_v9, %v3965_v10  ;;  %1068 = vmatpush.bf16.msra.mxu1 %v3960_v7  ;;  %v3892_v16 = vor.u32 %v5151_v13, %v3891_v11  ;;  %v3896_v17 = vor.u32 %v5143_v14, %v3893_v15  ;;  %v3899_v18 = vld [vmem:[#allocation7 + $0x308] sm:$0xf]  ;;  %v5144_v20 = vld [vmem:[#allocation7 + $0x30c] sm:$0xf]  ;;  %v3827_v23 = vld [vmem:[#allocation7 + $0x280] sm:$0xf] }
  0x2e   : > { %1081 = vmatpush.bf16.msra.mxu2 %v3964_v8  ;;  %v5152_v19 = vld [vmem:[#allocation7 + $0x344] sm:$0xf0]  ;;  %v3901_v22 = vld [vmem:[#allocation7 + $0x348] sm:$0xf0]  ;;  %v5135_v24 = vld [vmem:[#allocation7 + $0x2bc] sm:$0xf0] }
  0x2f   : > { %1094 = vmatpush.bf16.msra.mxu3 %v3968_v12  ;;  %v3900_v21 = vor.u32 %v5152_v19, %v3899_v18  ;;  %v3904_v25 = vor.u32 %v5144_v20, %v3901_v22  ;;  %v5127_v26 = vld [vmem:[#allocation7 + $0x284] sm:$0xf]  ;;  %v3835_v28 = vld [vmem:[#allocation7 + $0x288] sm:$0xf]  ;;  %v3828_v29 = vor.u32 %v5135_v24, %v3827_v23  ;;  %v5128_v31 = vld [vmem:[#allocation7 + $0x28c] sm:$0xf] }
  0x30   : > { %v3829_v27 = vld [vmem:[#allocation7 + $0x2c0] sm:$0xf0]  ;;  %v5136_v30 = vld [vmem:[#allocation7 + $0x2c4] sm:$0xf0]  ;;  %v3837_v32 = vld [vmem:[#allocation7 + $0x2c8] sm:$0xf0] }
  0x31   : > { %1056 = vmatpush.bf16.msra.mxu0 %v3892_v16  ;;  %1069 = vmatpush.bf16.msra.mxu1 %v3896_v17  ;;  %v3832_v33 = vor.u32 %v5127_v26, %v3829_v27  ;;  %v3836_v34 = vor.u32 %v5136_v30, %v3835_v28  ;;  %v3763_v35 = vld [vmem:[#allocation7 + $0x200] sm:$0xf]  ;;  %v5111_v37 = vld [vmem:[#allocation7 + $0x204] sm:$0xf]  ;;  %v3840_v38 = vor.u32 %v5128_v31, %v3837_v32  ;;  %v3771_v40 = vld [vmem:[#allocation7 + $0x208] sm:$0xf] }
  0x32   : > { %1082 = vmatpush.bf16.msra.mxu2 %v3900_v21  ;;  %v5119_v36 = vld [vmem:[#allocation7 + $0x23c] sm:$0xf0]  ;;  %v3765_v39 = vld [vmem:[#allocation7 + $0x240] sm:$0xf0]  ;;  %v5120_v41 = vld [vmem:[#allocation7 + $0x244] sm:$0xf0] }
  0x33   : > { %1095 = vmatpush.bf16.msra.mxu3 %v3904_v25  ;;  %v5112_v42 = vld [vmem:[#allocation7 + $0x20c] sm:$0xf]  ;;  %v3764_v44 = vor.u32 %v5119_v36, %v3763_v35  ;;  %v3768_v45 = vor.u32 %v5111_v37, %v3765_v39  ;;  %v3772_v46 = vor.u32 %v5120_v41, %v3771_v40  ;;  %v3699_v47 = vld [vmem:[#allocation7 + $0x180] sm:$0xf]  ;;  %v5095_v49 = vld [vmem:[#allocation7 + $0x184] sm:$0xf] }
  0x34   : > { %v3773_v43 = vld [vmem:[#allocation7 + $0x248] sm:$0xf0]  ;;  %v5103_v48 = vld [vmem:[#allocation7 + $0x1bc] sm:$0xf0]  ;;  %v3701_v51 = vld [vmem:[#allocation7 + $0x1c0] sm:$0xf0] }
  0x35   : > { %1057 = vmatpush.bf16.msra.mxu0 %v3828_v29  ;;  %1070 = vmatpush.bf16.msra.mxu1 %v3832_v33  ;;  %v3776_v50 = vor.u32 %v5112_v42, %v3773_v43  ;;  %v3707_v52 = vld [vmem:[#allocation7 + $0x188] sm:$0xf]  ;;  %v5096_v54 = vld [vmem:[#allocation7 + $0x18c] sm:$0xf]  ;;  %v3700_v56 = vor.u32 %v5103_v48, %v3699_v47  ;;  %v3704_v57 = vor.u32 %v5095_v49, %v3701_v51  ;;  %v3635_v59 = vld [vmem:[#allocation7 + $0x100] sm:$0xf] }
  0x36   : > { %1083 = vmatpush.bf16.msra.mxu2 %v3836_v34  ;;  %v5104_v53 = vld [vmem:[#allocation7 + $0x1c4] sm:$0xf0]  ;;  %v3709_v55 = vld [vmem:[#allocation7 + $0x1c8] sm:$0xf0]  ;;  %v5087_v60 = vld [vmem:[#allocation7 + $0x13c] sm:$0xf0] }
  0x37   : > { %1096 = vmatpush.bf16.msra.mxu3 %v3840_v38  ;;  %v3708_v58 = vor.u32 %v5104_v53, %v3707_v52  ;;  %v5079_v61 = vld [vmem:[#allocation7 + $0x104] sm:$0xf]  ;;  %v3712_v62 = vor.u32 %v5096_v54, %v3709_v55  ;;  %v3643_v0 = vld [vmem:[#allocation7 + $0x108] sm:$0xf]  ;;  %v5080_v2 = vld [vmem:[#allocation7 + $0x10c] sm:$0xf]  ;;  %v3636_v4 = vor.u32 %v5087_v60, %v3635_v59 }
  0x38   : > { %v3637_v63 = vld [vmem:[#allocation7 + $0x140] sm:$0xf0]  ;;  %v5088_v1 = vld [vmem:[#allocation7 + $0x144] sm:$0xf0]  ;;  %v3645_v3 = vld [vmem:[#allocation7 + $0x148] sm:$0xf0] }
  0x39   : > { %1058 = vmatpush.bf16.msra.mxu0 %v3764_v44  ;;  %1071 = vmatpush.bf16.msra.mxu1 %v3768_v45  ;;  %v3640_v5 = vor.u32 %v5079_v61, %v3637_v63  ;;  %v3644_v6 = vor.u32 %v5088_v1, %v3643_v0  ;;  %v3571_v7 = vld [vmem:[#allocation7 + $0x80] sm:$0xf]  ;;  %v5063_v9 = vld [vmem:[#allocation7 + $0x84] sm:$0xf]  ;;  %v3648_v10 = vor.u32 %v5080_v2, %v3645_v3  ;;  %v3579_v12 = vld [vmem:[#allocation7 + $0x88] sm:$0xf] }
  0x3a   : > { %1084 = vmatpush.bf16.msra.mxu2 %v3772_v46  ;;  %v5071_v8 = vld [vmem:[#allocation7 + $0xbc] sm:$0xf0]  ;;  %v3573_v11 = vld [vmem:[#allocation7 + $0xc0] sm:$0xf0]  ;;  %v5072_v13 = vld [vmem:[#allocation7 + $0xc4] sm:$0xf0] }
  0x3b   : > { %1097 = vmatpush.bf16.msra.mxu3 %v3776_v50  ;;  %v5064_v14 = vld [vmem:[#allocation7 + $0x8c] sm:$0xf]  ;;  %v3572_v16 = vor.u32 %v5071_v8, %v3571_v7  ;;  %v3507_v17 = vld [vmem:[#allocation7] sm:$0xf]  ;;  %v3576_v19 = vor.u32 %v5063_v9, %v3573_v11  ;;  %v3580_v20 = vor.u32 %v5072_v13, %v3579_v12  ;;  %v5047_v21 = vld [vmem:[#allocation7 + $0x4] sm:$0xf] }
  0x3c   : > { %v3581_v15 = vld [vmem:[#allocation7 + $0xc8] sm:$0xf0]  ;;  %v5055_v18 = vld [vmem:[#allocation7 + $0x3c] sm:$0xf0]  ;;  %v3509_v22 = vld [vmem:[#allocation7 + $0x40] sm:$0xf0] }
  0x3d   : > { %1059 = vmatpush.bf16.msra.mxu0 %v3700_v56  ;;  %1072 = vmatpush.bf16.msra.mxu1 %v3704_v57  ;;  %v3515_v23 = vld [vmem:[#allocation7 + $0x8] sm:$0xf]  ;;  %v3584_v24 = vor.u32 %v5064_v14, %v3581_v15  ;;  %v5048_v26 = vld [vmem:[#allocation7 + $0xc] sm:$0xf]  ;;  %v3971_v28 = vld [vmem:[#allocation7 + $0x390] sm:$0xf]  ;;  %v3508_v31 = vor.u32 %v5055_v18, %v3507_v17  ;;  %v3512_v35 = vor.u32 %v5047_v21, %v3509_v22 }
  0x3e   : > { %1085 = vmatpush.bf16.msra.mxu2 %v3708_v58  ;;  %v5056_v25 = vld [vmem:[#allocation7 + $0x44] sm:$0xf0]  ;;  %v3517_v27 = vld [vmem:[#allocation7 + $0x48] sm:$0xf0]  ;;  %v5169_v29 = vld [vmem:[#allocation7 + $0x3cc] sm:$0xf0] }
  0x3f   : > { %1098 = vmatpush.bf16.msra.mxu3 %v3712_v62  ;;  %v5161_v30 = vld [vmem:[#allocation7 + $0x394] sm:$0xf]  ;;  %v3979_v33 = vld [vmem:[#allocation7 + $0x398] sm:$0xf]  ;;  %v3516_v36 = vor.u32 %v5056_v25, %v3515_v23  ;;  %v5162_v37 = vld [vmem:[#allocation7 + $0x39c] sm:$0xf]  ;;  %v3520_v39 = vor.u32 %v5048_v26, %v3517_v27  ;;  %v3972_v40 = vor.u32 %v5169_v29, %v3971_v28 }
  0x40   : > { %v3973_v32 = vld [vmem:[#allocation7 + $0x3d0] sm:$0xf0]  ;;  %v5170_v34 = vld [vmem:[#allocation7 + $0x3d4] sm:$0xf0]  ;;  %v3981_v38 = vld [vmem:[#allocation7 + $0x3d8] sm:$0xf0] }
  0x41   : > { %1060 = vmatpush.bf16.msra.mxu0 %v3636_v4  ;;  %1073 = vmatpush.bf16.msra.mxu1 %v3640_v5  ;;  %v3976_v41 = vor.u32 %v5161_v30, %v3973_v32  ;;  %v3980_v42 = vor.u32 %v5170_v34, %v3979_v33  ;;  %v3907_v43 = vld [vmem:[#allocation7 + $0x310] sm:$0xf]  ;;  %v5145_v45 = vld [vmem:[#allocation7 + $0x314] sm:$0xf]  ;;  %v3984_v46 = vor.u32 %v5162_v37, %v3981_v38  ;;  %v3915_v48 = vld [vmem:[#allocation7 + $0x318] sm:$0xf] }
  0x42   : > { %1086 = vmatpush.bf16.msra.mxu2 %v3644_v6  ;;  %v5153_v44 = vld [vmem:[#allocation7 + $0x34c] sm:$0xf0]  ;;  %v3909_v47 = vld [vmem:[#allocation7 + $0x350] sm:$0xf0]  ;;  %v5154_v49 = vld [vmem:[#allocation7 + $0x354] sm:$0xf0] }
  0x43   : > { %1099 = vmatpush.bf16.msra.mxu3 %v3648_v10  ;;  %v5817_v50 = vld [vmem:[#allocation4] sm:$0x1]  ;;  %v3908_v53 = vor.u32 %v5153_v44, %v3907_v43  ;;  %v3912_v54 = vor.u32 %v5145_v45, %v3909_v47  ;;  %v3916_v55 = vor.u32 %v5154_v49, %v3915_v48  ;;  %v3843_v56 = vld [vmem:[#allocation7 + $0x290] sm:$0xf]  ;;  %v5129_v58 = vld [vmem:[#allocation7 + $0x294] sm:$0xf] }
  0x44   : > { %v5146_v51 = vld [vmem:[#allocation7 + $0x31c] sm:$0xf]  ;;  %v5137_v57 = vld [vmem:[#allocation7 + $0x2cc] sm:$0xf0]  ;;  %v3845_v60 = vld [vmem:[#allocation7 + $0x2d0] sm:$0xf0] }
  0x45   : > { %1061 = vmatpush.bf16.msra.mxu0 %v3572_v16  ;;  %1074 = vmatpush.bf16.msra.mxu1 %v3576_v19  ;;  %v3917_v52 = vld [vmem:[#allocation7 + $0x358] sm:$0xf0]  ;;  %v3851_v61 = vld [vmem:[#allocation7 + $0x298] sm:$0xf]  ;;  %v3844_v1 = vor.u32 %v5137_v57, %v3843_v56  ;;  %v3848_v2 = vor.u32 %v5129_v58, %v3845_v60  ;;  %v3779_v4 = vld [vmem:[#allocation7 + $0x210] sm:$0xf] }
  0x46   : > { %1087 = vmatpush.bf16.msra.mxu2 %v3580_v20  ;;  %v3920_v59 = vor.u32 %v5146_v51, %v3917_v52  ;;  %v5138_v62 = vld [vmem:[#allocation7 + $0x2d4] sm:$0xf0]  ;;  %v5130_v63 = vld [vmem:[#allocation7 + $0x29c] sm:$0xf]  ;;  %v5121_v5 = vld [vmem:[#allocation7 + $0x24c] sm:$0xf0] }
  0x47   : > { %1100 = vmatpush.bf16.msra.mxu3 %v3584_v24  ;;  %v3853_v0 = vld [vmem:[#allocation7 + $0x2d8] sm:$0xf0]  ;;  %v3852_v3 = vor.u32 %v5138_v62, %v3851_v61  ;;  %v5113_v6 = vld [vmem:[#allocation7 + $0x214] sm:$0xf]  ;;  %v3787_v9 = vld [vmem:[#allocation7 + $0x218] sm:$0xf]  ;;  %v3780_v13 = vor.u32 %v5121_v5, %v3779_v4 }
  0x48   : > { %v3856_v7 = vor.u32 %v5130_v63, %v3853_v0  ;;  %v3781_v8 = vld [vmem:[#allocation7 + $0x250] sm:$0xf0]  ;;  %v5122_v10 = vld [vmem:[#allocation7 + $0x254] sm:$0xf0]  ;;  %v5114_v11 = vld [vmem:[#allocation7 + $0x21c] sm:$0xf] }
  0x49   : > { %1062 = vmatpush.bf16.msra.mxu0 %v3508_v31  ;;  %1075 = vmatpush.bf16.msra.mxu1 %v3512_v35  ;;  %v3789_v12 = vld [vmem:[#allocation7 + $0x258] sm:$0xf0]  ;;  %v3784_v14 = vor.u32 %v5113_v6, %v3781_v8  ;;  %v3788_v15 = vor.u32 %v5122_v10, %v3787_v9  ;;  %v3715_v16 = vld [vmem:[#allocation7 + $0x190] sm:$0xf]  ;;  %v5097_v18 = vld [vmem:[#allocation7 + $0x194] sm:$0xf] }
  0x4a   : > { %1088 = vmatpush.bf16.msra.mxu2 %v3516_v36  ;;  %v5105_v17 = vld [vmem:[#allocation7 + $0x1cc] sm:$0xf0]  ;;  %v3792_v19 = vor.u32 %v5114_v11, %v3789_v12  ;;  %v3717_v20 = vld [vmem:[#allocation7 + $0x1d0] sm:$0xf0]  ;;  %v3723_v21 = vld [vmem:[#allocation7 + $0x198] sm:$0xf] }
  0x4b   : > { %1101 = vmatpush.bf16.msra.mxu3 %v3520_v39  ;;  %v5106_v22 = vld [vmem:[#allocation7 + $0x1d4] sm:$0xf0]  ;;  %v5098_v23 = vld [vmem:[#allocation7 + $0x19c] sm:$0xf]  ;;  %v3716_v25 = vor.u32 %v5105_v17, %v3715_v16  ;;  %v3720_v26 = vor.u32 %v5097_v18, %v3717_v20  ;;  %v3651_v28 = vld [vmem:[#allocation7 + $0x110] sm:$0xf] }
  0x4c   : > { %1063 = vmatmul.bf16.vlgmr.msra.gmra.mxu0 %v5817_v50  ;;  %1076 = vmatmul.bf16.vlgmr.msra.gmra.mxu1 %v5817_v50  ;;  %v3725_v24 = vld [vmem:[#allocation7 + $0x1d8] sm:$0xf0]  ;;  %v3724_v27 = vor.u32 %v5106_v22, %v3723_v21  ;;  %v5089_v29 = vld [vmem:[#allocation7 + $0x14c] sm:$0xf0]  ;;  %v5081_v30 = vld [vmem:[#allocation7 + $0x114] sm:$0xf] }
  0x4d   : > { %1107 = vmatpush.bf16.msrb.mxu0 %v3972_v40  ;;  %1120 = vmatpush.bf16.msrb.mxu1 %v3976_v41  ;;  %v3728_v31 = vor.u32 %v5098_v23, %v3725_v24  ;;  %v3653_v32 = vld [vmem:[#allocation7 + $0x150] sm:$0xf0]  ;;  %v3659_v33 = vld [vmem:[#allocation7 + $0x118] sm:$0xf]  ;;  %v5082_v35 = vld [vmem:[#allocation7 + $0x11c] sm:$0xf]  ;;  %v3652_v37 = vor.u32 %v5089_v29, %v3651_v28 }
  0x4e   : > { %1133 = vmatpush.bf16.msrb.mxu2 %v3980_v42  ;;  %1102 = vmatmul.bf16.vlgmr.msra.gmra.mxu3 %v5817_v50  ;;  %v5090_v34 = vld [vmem:[#allocation7 + $0x154] sm:$0xf0]  ;;  %v3661_v36 = vld [vmem:[#allocation7 + $0x158] sm:$0xf0]  ;;  %v3656_v38 = vor.u32 %v5081_v30, %v3653_v32  ;;  %v3587_v40 = vld [vmem:[#allocation7 + $0x90] sm:$0xf] }
  0x4f   : > { %1146 = vmatpush.bf16.msrb.mxu3 %v3984_v46  ;;  %1089 = vmatmul.bf16.vlgmr.msra.gmra.mxu2 %v5817_v50  ;;  %v3660_v39 = vor.u32 %v5090_v34, %v3659_v33  ;;  %v5073_v41 = vld [vmem:[#allocation7 + $0xcc] sm:$0xf0]  ;;  %v5065_v42 = vld [vmem:[#allocation7 + $0x94] sm:$0xf]  ;;  %v3664_v43 = vor.u32 %v5082_v35, %v3661_v36  ;;  %v3595_v45 = vld [vmem:[#allocation7 + $0x98] sm:$0xf] }
  0x50   : > { %v3589_v44 = vld [vmem:[#allocation7 + $0xd0] sm:$0xf0]  ;;  %v5074_v46 = vld [vmem:[#allocation7 + $0xd4] sm:$0xf0]  ;;  %v5066_v47 = vld [vmem:[#allocation7 + $0x9c] sm:$0xf]  ;;  %v3588_v49 = vor.u32 %v5073_v41, %v3587_v40 }
  0x51   : > { %1108 = vmatpush.bf16.msrb.mxu0 %v3908_v53  ;;  %1121 = vmatpush.bf16.msrb.mxu1 %v3912_v54  ;;  %v3597_v48 = vld [vmem:[#allocation7 + $0xd8] sm:$0xf0]  ;;  %v3523_v51 = vld [vmem:[#allocation7 + $0x10] sm:$0xf]  ;;  %v3592_v53 = vor.u32 %v5065_v42, %v3589_v44  ;;  %v3596_v54 = vor.u32 %v5074_v46, %v3595_v45  ;;  %v3525_v56 = vld [vmem:[#allocation7 + $0x50] sm:$0xf0] }
  0x52   : > { %1134 = vmatpush.bf16.msrb.mxu2 %v3916_v55  ;;  %v5057_v52 = vld [vmem:[#allocation7 + $0x4c] sm:$0xf0]  ;;  %v5049_v55 = vld [vmem:[#allocation7 + $0x14] sm:$0xf]  ;;  %v3531_v57 = vld [vmem:[#allocation7 + $0x18] sm:$0xf]  ;;  %v3600_v58 = vor.u32 %v5066_v47, %v3597_v48 }
  0x53   : > { %1147 = vmatpush.bf16.msrb.mxu3 %v3920_v59  ;;  %v5058_v59 = vld [vmem:[#allocation7 + $0x54] sm:$0xf0]  ;;  %v5050_v60 = vld [vmem:[#allocation7 + $0x1c] sm:$0xf]  ;;  %v3987_v62 = vld [vmem:[#allocation7 + $0x3a0] sm:$0xf]  ;;  %v3528_v5 = vor.u32 %v5049_v55, %v3525_v56 }
  0x54   : > { %v3533_v61 = vld [vmem:[#allocation7 + $0x58] sm:$0xf0]  ;;  %v5171_v63 = vld [vmem:[#allocation7 + $0x3dc] sm:$0xf0]  ;;  %v5163_v0 = vld [vmem:[#allocation7 + $0x3a4] sm:$0xf]  ;;  %v3532_v6 = vor.u32 %v5058_v59, %v3531_v57 }
  0x55   : > { %1109 = vmatpush.bf16.msrb.mxu0 %v3844_v1  ;;  %1122 = vmatpush.bf16.msrb.mxu1 %v3848_v2  ;;  %v3524_v1 = vor.u32 %v5057_v52, %v3523_v51  ;;  %v3989_v2 = vld [vmem:[#allocation7 + $0x3e0] sm:$0xf0]  ;;  %v5172_v4 = vld [vmem:[#allocation7 + $0x3e4] sm:$0xf0]  ;;  %v3997_v8 = vld [vmem:[#allocation7 + $0x3e8] sm:$0xf0]  ;;  %v3536_v9 = vor.u32 %v5050_v60, %v3533_v61  ;;  %v3988_v10 = vor.u32 %v5171_v63, %v3987_v62 }
  0x56   : > { %1135 = vmatpush.bf16.msrb.mxu2 %v3852_v3  ;;  %v3995_v3 = vld [vmem:[#allocation7 + $0x3a8] sm:$0xf]  ;;  %v3992_v11 = vor.u32 %v5163_v0, %v3989_v2  ;;  %v3925_v17 = vld [vmem:[#allocation7 + $0x360] sm:$0xf0]  ;;  %v5148_v20 = vld [vmem:[#allocation7 + $0x32c] sm:$0xf] }
  0x57   : > { %1148 = vmatpush.bf16.msrb.mxu3 %v3856_v7  ;;  %v5164_v7 = vld [vmem:[#allocation7 + $0x3ac] sm:$0xf]  ;;  %v3996_v12 = vor.u32 %v5172_v4, %v3995_v3  ;;  %v3931_v18 = vld [vmem:[#allocation7 + $0x328] sm:$0xf]  ;;  %v3861_v29 = vld [vmem:[#allocation7 + $0x2e0] sm:$0xf0] }
  0x58   : > { %v4000_v16 = vor.u32 %v5164_v7, %v3997_v8  ;;  %v3933_v21 = vld [vmem:[#allocation7 + $0x368] sm:$0xf0]  ;;  %v3867_v30 = vld [vmem:[#allocation7 + $0x2a8] sm:$0xf]  ;;  %v3797_v41 = vld [vmem:[#allocation7 + $0x260] sm:$0xf0] }
  0x59   : > { %1110 = vmatpush.bf16.msrb.mxu0 %v3780_v13  ;;  %1123 = vmatpush.bf16.msrb.mxu1 %v3784_v14  ;;  %v3923_v13 = vld [vmem:[#allocation7 + $0x320] sm:$0xf]  ;;  %v3936_v28 = vor.u32 %v5148_v20, %v3933_v21  ;;  %v5132_v32 = vld [vmem:[#allocation7 + $0x2ac] sm:$0xf]  ;;  %v3803_v42 = vld [vmem:[#allocation7 + $0x228] sm:$0xf] }
  0x5a   : > { %1136 = vmatpush.bf16.msrb.mxu2 %v3788_v15  ;;  %v5155_v14 = vld [vmem:[#allocation7 + $0x35c] sm:$0xf0]  ;;  %v5147_v15 = vld [vmem:[#allocation7 + $0x324] sm:$0xf]  ;;  %v3869_v33 = vld [vmem:[#allocation7 + $0x2e8] sm:$0xf0] }
  0x5b   : > { %1149 = vmatpush.bf16.msrb.mxu3 %v3792_v19  ;;  %v5156_v19 = vld [vmem:[#allocation7 + $0x364] sm:$0xf0]  ;;  %v3924_v22 = vor.u32 %v5155_v14, %v3923_v13  ;;  %v3928_v23 = vor.u32 %v5147_v15, %v3925_v17  ;;  %v3872_v40 = vor.u32 %v5132_v32, %v3869_v33  ;;  %v5116_v44 = vld [vmem:[#allocation7 + $0x22c] sm:$0xf]  ;;  %v5107_v51 = vld [vmem:[#allocation7 + $0x1dc] sm:$0xf0] }
  0x5c   : > { %v3932_v24 = vor.u32 %v5156_v19, %v3931_v18  ;;  %v3805_v45 = vld [vmem:[#allocation7 + $0x268] sm:$0xf0]  ;;  %v5099_v52 = vld [vmem:[#allocation7 + $0x1a4] sm:$0xf]  ;;  %v3739_v55 = vld [vmem:[#allocation7 + $0x1a8] sm:$0xf] }
  0x5d   : > { %1111 = vmatpush.bf16.msrb.mxu0 %v3716_v25  ;;  %1124 = vmatpush.bf16.msrb.mxu1 %v3720_v26  ;;  %v3859_v25 = vld [vmem:[#allocation7 + $0x2a0] sm:$0xf]  ;;  %v5108_v56 = vld [vmem:[#allocation7 + $0x1e4] sm:$0xf0]  ;;  %v5100_v57 = vld [vmem:[#allocation7 + $0x1ac] sm:$0xf] }
  0x5e   : > { %1137 = vmatpush.bf16.msrb.mxu2 %v3724_v27  ;;  %v5139_v26 = vld [vmem:[#allocation7 + $0x2dc] sm:$0xf0]  ;;  %v5131_v27 = vld [vmem:[#allocation7 + $0x2a4] sm:$0xf]  ;;  %v3740_v61 = vor.u32 %v5108_v56, %v3739_v55  ;;  %v3675_v3 = vld [vmem:[#allocation7 + $0x128] sm:$0xf] }
  0x5f   : > { %1150 = vmatpush.bf16.msrb.mxu3 %v3728_v31  ;;  %v5140_v31 = vld [vmem:[#allocation7 + $0x2e4] sm:$0xf0]  ;;  %v3860_v34 = vor.u32 %v5139_v26, %v3859_v25  ;;  %v3864_v35 = vor.u32 %v5131_v27, %v3861_v29  ;;  %v3667_v62 = vld [vmem:[#allocation7 + $0x120] sm:$0xf]  ;;  %v5083_v0 = vld [vmem:[#allocation7 + $0x124] sm:$0xf] }
  0x60   : > { %v3868_v36 = vor.u32 %v5140_v31, %v3867_v30  ;;  %v5091_v63 = vld [vmem:[#allocation7 + $0x15c] sm:$0xf0]  ;;  %v3669_v2 = vld [vmem:[#allocation7 + $0x160] sm:$0xf0]  ;;  %v5092_v4 = vld [vmem:[#allocation7 + $0x164] sm:$0xf0] }
  0x61   : > { %1112 = vmatpush.bf16.msrb.mxu0 %v3652_v37  ;;  %1125 = vmatpush.bf16.msrb.mxu1 %v3656_v38  ;;  %v3795_v37 = vld [vmem:[#allocation7 + $0x220] sm:$0xf]  ;;  %v3668_v7 = vor.u32 %v5091_v63, %v3667_v62  ;;  %v3672_v8 = vor.u32 %v5083_v0, %v3669_v2  ;;  %v3605_v14 = vld [vmem:[#allocation7 + $0xe0] sm:$0xf0]  ;;  %v3611_v15 = vld [vmem:[#allocation7 + $0xa8] sm:$0xf] }
  0x62   : > { %1138 = vmatpush.bf16.msrb.mxu2 %v3660_v39  ;;  %v5123_v38 = vld [vmem:[#allocation7 + $0x25c] sm:$0xf0]  ;;  %v5115_v39 = vld [vmem:[#allocation7 + $0x224] sm:$0xf]  ;;  %v5068_v17 = vld [vmem:[#allocation7 + $0xac] sm:$0xf] }
  0x63   : > { %1151 = vmatpush.bf16.msrb.mxu3 %v3664_v43  ;;  %v5124_v43 = vld [vmem:[#allocation7 + $0x264] sm:$0xf0]  ;;  %v3796_v46 = vor.u32 %v5123_v38, %v3795_v37  ;;  %v3800_v47 = vor.u32 %v5115_v39, %v3797_v41  ;;  %v3613_v18 = vld [vmem:[#allocation7 + $0xe8] sm:$0xf0]  ;;  %v3539_v20 = vld [vmem:[#allocation7 + $0x20] sm:$0xf] }
  0x64   : > { %v3804_v48 = vor.u32 %v5124_v43, %v3803_v42  ;;  %v5059_v21 = vld [vmem:[#allocation7 + $0x5c] sm:$0xf0]  ;;  %v3541_v25 = vld [vmem:[#allocation7 + $0x60] sm:$0xf0]  ;;  %v3547_v26 = vld [vmem:[#allocation7 + $0x28] sm:$0xf]  ;;  %v3616_v27 = vor.u32 %v5068_v17, %v3613_v18 }
  0x65   : > { %1113 = vmatpush.bf16.msrb.mxu0 %v3588_v49  ;;  %1126 = vmatpush.bf16.msrb.mxu1 %v3592_v53  ;;  %v3731_v49 = vld [vmem:[#allocation7 + $0x1a0] sm:$0xf]  ;;  %v3808_v53 = vor.u32 %v5116_v44, %v3805_v45  ;;  %v5052_v29 = vld [vmem:[#allocation7 + $0x2c] sm:$0xf]  ;;  %v4003_v31 = vld [vmem:[#allocation7 + $0x3b0] sm:$0xf] }
  0x66   : > { %1139 = vmatpush.bf16.msrb.mxu2 %v3596_v54  ;;  %v3733_v54 = vld [vmem:[#allocation7 + $0x1e0] sm:$0xf0]  ;;  %v3732_v59 = vor.u32 %v5107_v51, %v3731_v49  ;;  %v3549_v30 = vld [vmem:[#allocation7 + $0x68] sm:$0xf0]  ;;  %v5173_v32 = vld [vmem:[#allocation7 + $0x3ec] sm:$0xf0] }
  0x67   : > { %1152 = vmatpush.bf16.msrb.mxu3 %v3600_v58  ;;  %v3741_v58 = vld [vmem:[#allocation7 + $0x1e8] sm:$0xf0]  ;;  %v3736_v60 = vor.u32 %v5099_v52, %v3733_v54  ;;  %v5165_v33 = vld [vmem:[#allocation7 + $0x3b4] sm:$0xf]  ;;  %v5174_v37 = vld [vmem:[#allocation7 + $0x3f4] sm:$0xf0]  ;;  %v3552_v42 = vor.u32 %v5052_v29, %v3549_v30  ;;  %v4004_v43 = vor.u32 %v5173_v32, %v4003_v31 }
  0x68   : > { %v4013_v41 = vld [vmem:[#allocation7 + $0x3f8] sm:$0xf0]  ;;  %v3941_v51 = vld [vmem:[#allocation7 + $0x370] sm:$0xf0]  ;;  %v3947_v52 = vld [vmem:[#allocation7 + $0x338] sm:$0xf] }
  0x69   : > { %1114 = vmatpush.bf16.msrb.mxu0 %v3524_v1  ;;  %1127 = vmatpush.bf16.msrb.mxu1 %v3528_v5  ;;  %v3744_v1 = vor.u32 %v5100_v57, %v3741_v58  ;;  %v5084_v5 = vld [vmem:[#allocation7 + $0x12c] sm:$0xf]  ;;  %v5150_v54 = vld [vmem:[#allocation7 + $0x33c] sm:$0xf]  ;;  %v3877_v63 = vld [vmem:[#allocation7 + $0x2f0] sm:$0xf0] }
  0x6a   : > { %1140 = vmatpush.bf16.msrb.mxu2 %v3532_v6  ;;  %v3677_v6 = vld [vmem:[#allocation7 + $0x168] sm:$0xf0]  ;;  %v3949_v55 = vld [vmem:[#allocation7 + $0x378] sm:$0xf0]  ;;  %v3883_v0 = vld [vmem:[#allocation7 + $0x2b8] sm:$0xf] }
  0x6b   : > { %1153 = vmatpush.bf16.msrb.mxu3 %v3536_v9  ;;  %v3676_v9 = vor.u32 %v5092_v4, %v3675_v3  ;;  %v3680_v13 = vor.u32 %v5084_v5, %v3677_v6  ;;  %v3952_v62 = vor.u32 %v5150_v54, %v3949_v55  ;;  %v5134_v2 = vld [vmem:[#allocation7 + $0x2bc] sm:$0xf]  ;;  %v3683_v31 = vld [vmem:[#allocation7 + $0x130] sm:$0xf]  ;;  %vm3235_vm0 = vcmask 1041408  }
  0x6c   : > { %1115 = vmatmul.bf16.vlgmr.msrb.gmra.mxu0 %v5817_v50  ;;  %1128 = vmatmul.bf16.vlgmr.msrb.gmra.mxu1 %v5817_v50  ;;  %v3885_v3 = vld [vmem:[#allocation7 + $0x2f8] sm:$0xf0]  ;;  %v5093_v32 = vld [vmem:[#allocation7 + $0x16c] sm:$0xf0]  ;;  %vm3267_vm1 = vcmask 1040384  }
  0x6d   : > { %1159 = vmatpush.bf16.msra.mxu0 %v3988_v10  ;;  %1172 = vmatpush.bf16.msra.mxu1 %v3992_v11  ;;  %v3603_v10 = vld [vmem:[#allocation7 + $0xa0] sm:$0xf]  ;;  %v3555_v54 = vld [vmem:[#allocation7 + $0x30] sm:$0xf] }
  0x6e   : > { %1185 = vmatpush.bf16.msra.mxu2 %v3996_v12  ;;  %1154 = vmatmul.bf16.vlgmr.msrb.gmra.mxu3 %v5817_v50  ;;  %v5075_v11 = vld [vmem:[#allocation7 + $0xdc] sm:$0xf0]  ;;  %v5067_v12 = vld [vmem:[#allocation7 + $0xa4] sm:$0xf]  ;;  %v5061_v55 = vld [vmem:[#allocation7 + $0x6c] sm:$0xf0] }
  0x6f   : > { %1198 = vmatpush.bf16.msra.mxu3 %v4000_v16  ;;  %1141 = vmatmul.bf16.vlgmr.msrb.gmra.mxu2 %v5817_v50  ;;  %v5076_v16 = vld [vmem:[#allocation7 + $0xe4] sm:$0xf0]  ;;  %v3604_v19 = vor.u32 %v5075_v11, %v3603_v10  ;;  %v3888_v10 = vor.u32 %v5134_v2, %v3885_v3  ;;  %v3813_v11 = vld [vmem:[#allocation7 + $0x270] sm:$0xf0]  ;;  %v5190_v2 = vld [vmem:[#allocation9 + $0x74] sm:$0xf0] }
  0x70   : > { %v4139_v3 = vld [vmem:[#allocation9 + $0xf0] sm:$0xf] }
  0x71   : > { %1160 = vmatpush.bf16.msra.mxu0 %v3924_v22  ;;  %1173 = vmatpush.bf16.msra.mxu1 %v3928_v23  ;;  %v3608_v22 = vor.u32 %v5067_v12, %v3605_v14  ;;  %v3612_v23 = vor.u32 %v5076_v16, %v3611_v15  ;;  %v3819_v12 = vld [vmem:[#allocation7 + $0x238] sm:$0xf]  ;;  %v5118_v14 = vld [vmem:[#allocation7 + $0x23c] sm:$0xf] }
  0x72   : > { %1186 = vmatpush.bf16.msra.mxu2 %v3932_v24  ;;  %v5051_v24 = vld [vmem:[#allocation7 + $0x24] sm:$0xf]  ;;  %v3821_v15 = vld [vmem:[#allocation7 + $0x278] sm:$0xf0] }
  0x73   : > { %1199 = vmatpush.bf16.msra.mxu3 %v3936_v28  ;;  %v5060_v28 = vld [vmem:[#allocation7 + $0x64] sm:$0xf0]  ;;  %v3544_v38 = vor.u32 %v5051_v24, %v3541_v25  ;;  %v3755_v24 = vld [vmem:[#allocation7 + $0x1b8] sm:$0xf] }
  0x74   : > { %v3548_v39 = vor.u32 %v5060_v28, %v3547_v26  ;;  %v5110_v25 = vld [vmem:[#allocation7 + $0x1f4] sm:$0xf0]  ;;  %v5102_v26 = vld [vmem:[#allocation7 + $0x1bc] sm:$0xf] }
  0x75   : > { %1161 = vmatpush.bf16.msra.mxu0 %v3860_v34  ;;  %1174 = vmatpush.bf16.msra.mxu1 %v3864_v35  ;;  %v3540_v34 = vor.u32 %v5059_v21, %v3539_v20  ;;  %v4005_v35 = vld [vmem:[#allocation7 + $0x3f0] sm:$0xf0]  ;;  %v5109_v20 = vld [vmem:[#allocation7 + $0x1ec] sm:$0xf0]  ;;  %v3756_v30 = vor.u32 %v5110_v25, %v3755_v24  ;;  %v5236_v24 = vld [vmem:[#allocation9 + $0x1e4] sm:$0xf0] }
  0x76   : > { %1187 = vmatpush.bf16.msra.mxu2 %v3868_v36  ;;  %v4011_v36 = vld [vmem:[#allocation7 + $0x3b8] sm:$0xf]  ;;  %v4008_v44 = vor.u32 %v5165_v33, %v4005_v35  ;;  %v5101_v21 = vld [vmem:[#allocation7 + $0x1b4] sm:$0xf] }
  0x77   : > { %1200 = vmatpush.bf16.msra.mxu3 %v3872_v40  ;;  %v5166_v40 = vld [vmem:[#allocation7 + $0x3bc] sm:$0xf]  ;;  %v4012_v45 = vor.u32 %v5174_v37, %v4011_v36  ;;  %v5085_v33 = vld [vmem:[#allocation7 + $0x134] sm:$0xf]  ;;  %v3691_v36 = vld [vmem:[#allocation7 + $0x138] sm:$0xf] }
  0x78   : > { %v4016_v49 = vor.u32 %v5166_v40, %v4013_v41  ;;  %v3685_v35 = vld [vmem:[#allocation7 + $0x170] sm:$0xf0]  ;;  %v5094_v37 = vld [vmem:[#allocation7 + $0x174] sm:$0xf0]  ;;  %v3684_v40 = vor.u32 %v5093_v32, %v3683_v31 }
  0x79   : > { %1162 = vmatpush.bf16.msra.mxu0 %v3796_v46  ;;  %1175 = vmatpush.bf16.msra.mxu1 %v3800_v47  ;;  %v3939_v46 = vld [vmem:[#allocation7 + $0x330] sm:$0xf]  ;;  %v3688_v41 = vor.u32 %v5085_v33, %v3685_v35  ;;  %v5202_v32 = vld [vmem:[#allocation9 + $0xd4] sm:$0xf0] }
  0x7a   : > { %1188 = vmatpush.bf16.msra.mxu2 %v3804_v48  ;;  %v5157_v47 = vld [vmem:[#allocation7 + $0x36c] sm:$0xf0]  ;;  %v5149_v48 = vld [vmem:[#allocation7 + $0x334] sm:$0xf] }
  0x7b   : > { %1201 = vmatpush.bf16.msra.mxu3 %v3808_v53  ;;  %v5158_v53 = vld [vmem:[#allocation7 + $0x374] sm:$0xf0]  ;;  %v3940_v56 = vor.u32 %v5157_v47, %v3939_v46  ;;  %v3944_v57 = vor.u32 %v5149_v48, %v3941_v51  ;;  %v3621_v47 = vld [vmem:[#allocation7 + $0xf0] sm:$0xf0]  ;;  %v5070_v51 = vld [vmem:[#allocation7 + $0xbc] sm:$0xf] }
  0x7c   : > { %v3948_v58 = vor.u32 %v5158_v53, %v3947_v52  ;;  %v3627_v48 = vld [vmem:[#allocation7 + $0xb8] sm:$0xf]  ;;  %v3629_v52 = vld [vmem:[#allocation7 + $0xf8] sm:$0xf0]  ;;  %v4187_v33 = vld [vmem:[#allocation9 + $0x150] sm:$0xf] }
  0x7d   : > { %1163 = vmatpush.bf16.msra.mxu0 %v3732_v59  ;;  %1176 = vmatpush.bf16.msra.mxu1 %v3736_v60  ;;  %v3875_v59 = vld [vmem:[#allocation7 + $0x2b0] sm:$0xf] }
  0x7e   : > { %1189 = vmatpush.bf16.msra.mxu2 %v3740_v61  ;;  %v5141_v60 = vld [vmem:[#allocation7 + $0x2ec] sm:$0xf0]  ;;  %v5133_v61 = vld [vmem:[#allocation7 + $0x2b4] sm:$0xf] }
  0x7f   : > { %1202 = vmatpush.bf16.msra.mxu3 %v3744_v1  ;;  %v5142_v1 = vld [vmem:[#allocation7 + $0x2f4] sm:$0xf0]  ;;  %v3876_v4 = vor.u32 %v5141_v60, %v3875_v59  ;;  %v3880_v5 = vor.u32 %v5133_v61, %v3877_v63  ;;  %v3557_v59 = vld [vmem:[#allocation7 + $0x70] sm:$0xf0]  ;;  %v3632_v61 = vor.u32 %v5070_v51, %v3629_v52  ;;  %v5054_v63 = vld [vmem:[#allocation7 + $0x3c] sm:$0xf] }
  0x80   : > { %v3884_v6 = vor.u32 %v5142_v1, %v3883_v0  ;;  %v3563_v60 = vld [vmem:[#allocation7 + $0x38] sm:$0xf]  ;;  %v3565_v0 = vld [vmem:[#allocation7 + $0x78] sm:$0xf0]  ;;  %v4075_v1 = vld [vmem:[#allocation9 + $0x70] sm:$0xf] }
  0x81   : > { %1164 = vmatpush.bf16.msra.mxu0 %v3668_v7  ;;  %1177 = vmatpush.bf16.msra.mxu1 %v3672_v8  ;;  %v3811_v7 = vld [vmem:[#allocation7 + $0x230] sm:$0xf] }
  0x82   : > { %1190 = vmatpush.bf16.msra.mxu2 %v3676_v9  ;;  %v5125_v8 = vld [vmem:[#allocation7 + $0x26c] sm:$0xf0]  ;;  %v5117_v9 = vld [vmem:[#allocation7 + $0x234] sm:$0xf] }
  0x83   : > { %1203 = vmatpush.bf16.msra.mxu3 %v3680_v13  ;;  %v5126_v13 = vld [vmem:[#allocation7 + $0x274] sm:$0xf0]  ;;  %v3812_v16 = vor.u32 %v5125_v8, %v3811_v7  ;;  %v3816_v17 = vor.u32 %v5117_v9, %v3813_v11  ;;  %v4251_v35 = vld [vmem:[#allocation9 + $0x1d0] sm:$0xf] }
  0x84   : > { %v3820_v18 = vor.u32 %v5126_v13, %v3819_v12  ;;  %v5222_v7 = vld [vmem:[#allocation9 + $0x174] sm:$0xf0]  ;;  %v3568_v12 = vor.u32 %v5054_v63, %v3565_v0  ;;  %v4076_v13 = vor.u32 %v5190_v2, %v4075_v1  ;;  %v4043_v52 = vld [vmem:[#allocation9 + $0x30] sm:$0xf]  ;;  %v4035_v0 = vld [vmem:[#allocation9 + $0x20] sm:$0xf] }
  0x85   : > { %1165 = vmatpush.bf16.msra.mxu0 %v3604_v19  ;;  %1178 = vmatpush.bf16.msra.mxu1 %v3608_v22  ;;  %v3747_v19 = vld [vmem:[#allocation7 + $0x1b0] sm:$0xf]  ;;  %v3824_v22 = vor.u32 %v5118_v14, %v3821_v15  ;;  %v5238_v11 = vld [vmem:[#allocation9 + $0x1f4] sm:$0xf0]  ;;  %v5180_v1 = vld [vmem:[#allocation9 + $0x24] sm:$0xf0] }
  0x86   : > { %1191 = vmatpush.bf16.msra.mxu2 %v3612_v23  ;;  %v3749_v23 = vld [vmem:[#allocation7 + $0x1f0] sm:$0xf0]  ;;  %v3748_v28 = vor.u32 %v5109_v20, %v3747_v19  ;;  %v5204_v20 = vld [vmem:[#allocation9 + $0xe4] sm:$0xf0]  ;;  %v4099_v2 = vld [vmem:[#allocation9 + $0xa0] sm:$0xf] }
  0x87   : > { %1204 = vmatpush.bf16.msra.mxu3 %v3616_v27  ;;  %v3757_v27 = vld [vmem:[#allocation7 + $0x1f8] sm:$0xf0]  ;;  %v3752_v29 = vor.u32 %v5101_v21, %v3749_v23  ;;  %v4195_v21 = vld [vmem:[#allocation9 + $0x160] sm:$0xf] }
  0x88   : > { %v4259_v23 = vld [vmem:[#allocation9 + $0x1e0] sm:$0xf] }
  0x89   : > { %1166 = vmatpush.bf16.msra.mxu0 %v3540_v34  ;;  %1179 = vmatpush.bf16.msra.mxu1 %v3544_v38  ;;  %v3760_v34 = vor.u32 %v5102_v26, %v3757_v27  ;;  %v5086_v38 = vld [vmem:[#allocation7 + $0x13c] sm:$0xf]  ;;  %v4260_v31 = vor.u32 %v5236_v24, %v4259_v23  ;;  %v5176_v23 = vld [vmem:[#allocation9 + $0x4] sm:$0xf0] }
  0x8a   : > { %1192 = vmatpush.bf16.msra.mxu2 %v3548_v39  ;;  %v3693_v39 = vld [vmem:[#allocation7 + $0x178] sm:$0xf0] }
  0x8b   : > { %1205 = vmatpush.bf16.msra.mxu3 %v3552_v42  ;;  %v3692_v42 = vor.u32 %v5094_v37, %v3691_v36  ;;  %v3696_v46 = vor.u32 %v5086_v38, %v3693_v39  ;;  %v5234_v36 = vld [vmem:[#allocation9 + $0x1d4] sm:$0xf0] }
  0x8c   : > { %1167 = vmatmul.bf16.vlgmr.msra.gmra.mxu0 %v5817_v50  ;;  %1180 = vmatmul.bf16.vlgmr.msra.gmra.mxu1 %v5817_v50 }
  0x8d   : > { %1211 = vmatpush.bf16.msrb.mxu0 %v4004_v43  ;;  %1224 = vmatpush.bf16.msrb.mxu1 %v4008_v44  ;;  %v3619_v43 = vld [vmem:[#allocation7 + $0xb0] sm:$0xf] }
  0x8e   : > { %1237 = vmatpush.bf16.msrb.mxu2 %v4012_v45  ;;  %1206 = vmatmul.bf16.vlgmr.msra.gmra.mxu3 %v5817_v50  ;;  %v5077_v44 = vld [vmem:[#allocation7 + $0xec] sm:$0xf0]  ;;  %v5069_v45 = vld [vmem:[#allocation7 + $0xb4] sm:$0xf] }
  0x8f   : > { %1250 = vmatpush.bf16.msrb.mxu3 %v4016_v49  ;;  %1193 = vmatmul.bf16.vlgmr.msra.gmra.mxu2 %v5817_v50  ;;  %v5078_v49 = vld [vmem:[#allocation7 + $0xf4] sm:$0xf0]  ;;  %v3620_v53 = vor.u32 %v5077_v44, %v3619_v43  ;;  %v4252_v43 = vor.u32 %v5234_v36, %v4251_v35  ;;  %v5200_v44 = vld [vmem:[#allocation9 + $0xc4] sm:$0xf0]  ;;  %v4395_v35 = vld [vmem:[#allocation9 + $0x2f0] sm:$0xf] }
  0x91   : > { %1212 = vmatpush.bf16.msrb.mxu0 %v3940_v56  ;;  %1225 = vmatpush.bf16.msrb.mxu1 %v3944_v57  ;;  %v3624_v56 = vor.u32 %v5069_v45, %v3621_v47  ;;  %v3628_v57 = vor.u32 %v5078_v49, %v3627_v48  ;;  %v4179_v45 = vld [vmem:[#allocation9 + $0x140] sm:$0xf]  ;;  %v5232_v48 = vld [vmem:[#allocation9 + $0x1c4] sm:$0xf0] }
  0x92   : > { %1238 = vmatpush.bf16.msrb.mxu2 %v3948_v58  ;;  %v5053_v58 = vld [vmem:[#allocation7 + $0x34] sm:$0xf]  ;;  %v4243_v47 = vld [vmem:[#allocation9 + $0x1c0] sm:$0xf] }
  0x93   : > { %1251 = vmatpush.bf16.msrb.mxu3 %v3952_v62  ;;  %v5062_v62 = vld [vmem:[#allocation7 + $0x74] sm:$0xf0]  ;;  %v3560_v8 = vor.u32 %v5053_v58, %v3557_v59  ;;  %v4235_v59 = vld [vmem:[#allocation9 + $0x1b0] sm:$0xf] }
  0x94   : > { %v3564_v9 = vor.u32 %v5062_v62, %v3563_v60  ;;  %v5214_v58 = vld [vmem:[#allocation9 + $0x134] sm:$0xf0] }
  0x95   : > { %1213 = vmatpush.bf16.msrb.mxu0 %v3876_v4  ;;  %1226 = vmatpush.bf16.msrb.mxu1 %v3880_v5  ;;  %v3556_v4 = vor.u32 %v5061_v55, %v3555_v54  ;;  %v5206_v5 = vld [vmem:[#allocation9 + $0xf4] sm:$0xf0]  ;;  %v4107_v54 = vld [vmem:[#allocation9 + $0xb0] sm:$0xf]  ;;  %v4244_v55 = vor.u32 %v5232_v48, %v4243_v47  ;;  %v4323_v48 = vld [vmem:[#allocation9 + $0x260] sm:$0xf] }
  0x96   : > { %1239 = vmatpush.bf16.msrb.mxu2 %v3884_v6  ;;  %v4203_v6 = vld [vmem:[#allocation9 + $0x170] sm:$0xf]  ;;  %v4140_v14 = vor.u32 %v5206_v5, %v4139_v3  ;;  %v5230_v60 = vld [vmem:[#allocation9 + $0x1b4] sm:$0xf0]  ;;  %v4163_v5 = vld [vmem:[#allocation9 + $0x120] sm:$0xf] }
  0x97   : > { %1252 = vmatpush.bf16.msrb.mxu3 %v3888_v10  ;;  %v4267_v10 = vld [vmem:[#allocation9 + $0x1f0] sm:$0xf]  ;;  %v4204_v15 = vor.u32 %v5222_v7, %v4203_v6  ;;  %v4236_v3 = vor.u32 %v5230_v60, %v4235_v59  ;;  %v5212_v6 = vld [vmem:[#allocation9 + $0x124] sm:$0xf0]  ;;  %v4227_v7 = vld [vmem:[#allocation9 + $0x1a0] sm:$0xf] }
  0x98   : > { %v4268_v19 = vor.u32 %v5238_v11, %v4267_v10  ;;  %v4164_v11 = vor.u32 %v5212_v6, %v4163_v5  ;;  %v4315_v60 = vld [vmem:[#allocation9 + $0x250] sm:$0xf] }
  0x99   : > { %1214 = vmatpush.bf16.msrb.mxu0 %v3812_v16  ;;  %1227 = vmatpush.bf16.msrb.mxu1 %v3816_v17  ;;  %v4067_v16 = vld [vmem:[#allocation9 + $0x60] sm:$0xf]  ;;  %v5188_v17 = vld [vmem:[#allocation9 + $0x64] sm:$0xf0] }
  0x9a   : > { %1240 = vmatpush.bf16.msrb.mxu2 %v3820_v18  ;;  %v4131_v18 = vld [vmem:[#allocation9 + $0xe0] sm:$0xf]  ;;  %v4068_v25 = vor.u32 %v5188_v17, %v4067_v16  ;;  %v5194_v16 = vld [vmem:[#allocation9 + $0x94] sm:$0xf0]  ;;  %v4155_v17 = vld [vmem:[#allocation9 + $0x110] sm:$0xf] }
  0x9b   : > { %1253 = vmatpush.bf16.msrb.mxu3 %v3824_v22  ;;  %v5220_v22 = vld [vmem:[#allocation9 + $0x164] sm:$0xf0]  ;;  %v4132_v26 = vor.u32 %v5204_v20, %v4131_v18  ;;  %v5210_v18 = vld [vmem:[#allocation9 + $0x114] sm:$0xf0] }
  0x9c   : > { %v4196_v27 = vor.u32 %v5220_v22, %v4195_v21  ;;  %v5226_v20 = vld [vmem:[#allocation9 + $0x194] sm:$0xf0]  ;;  %v4019_v22 = vld [vmem:[#allocation9] sm:$0xf] }
  0x9d   : > { %1215 = vmatpush.bf16.msrb.mxu0 %v3748_v28  ;;  %1228 = vmatpush.bf16.msrb.mxu1 %v3752_v29  ;;  %v4059_v28 = vld [vmem:[#allocation9 + $0x50] sm:$0xf]  ;;  %v5186_v29 = vld [vmem:[#allocation9 + $0x54] sm:$0xf0]  ;;  %v4020_v36 = vor.u32 %v5176_v23, %v4019_v22 }
  0x9e   : > { %1241 = vmatpush.bf16.msrb.mxu2 %v3756_v30  ;;  %v4123_v30 = vld [vmem:[#allocation9 + $0xd0] sm:$0xf]  ;;  %v4060_v37 = vor.u32 %v5186_v29, %v4059_v28  ;;  %v4147_v28 = vld [vmem:[#allocation9 + $0x100] sm:$0xf]  ;;  %v5246_v22 = vld [vmem:[#allocation9 + $0x234] sm:$0xf0] }
  0x9f   : > { %1254 = vmatpush.bf16.msrb.mxu3 %v3760_v34  ;;  %v5218_v34 = vld [vmem:[#allocation9 + $0x154] sm:$0xf0]  ;;  %v4124_v38 = vor.u32 %v5202_v32, %v4123_v30  ;;  %v5208_v30 = vld [vmem:[#allocation9 + $0x104] sm:$0xf0]  ;;  %v4363_v23 = vld [vmem:[#allocation9 + $0x2b0] sm:$0xf] }
  0xa0   : > { %v4188_v39 = vor.u32 %v5218_v34, %v4187_v33  ;;  %v5224_v32 = vld [vmem:[#allocation9 + $0x184] sm:$0xf0]  ;;  %v4331_v33 = vld [vmem:[#allocation9 + $0x270] sm:$0xf]  ;;  %v5254_v34 = vld [vmem:[#allocation9 + $0x274] sm:$0xf0] }
  0xa1   : > { %1216 = vmatpush.bf16.msrb.mxu0 %v3684_v40  ;;  %1229 = vmatpush.bf16.msrb.mxu1 %v3688_v41  ;;  %v4051_v40 = vld [vmem:[#allocation9 + $0x40] sm:$0xf]  ;;  %v5184_v41 = vld [vmem:[#allocation9 + $0x44] sm:$0xf0] }
  0xa2   : > { %1242 = vmatpush.bf16.msrb.mxu2 %v3692_v42  ;;  %v4115_v42 = vld [vmem:[#allocation9 + $0xc0] sm:$0xf]  ;;  %v4052_v49 = vor.u32 %v5184_v41, %v4051_v40  ;;  %v4148_v41 = vor.u32 %v5208_v30, %v4147_v28  ;;  %v4427_v28 = vld [vmem:[#allocation9 + $0x330] sm:$0xf] }
  0xa3   : > { %1255 = vmatpush.bf16.msrb.mxu3 %v3696_v46  ;;  %v5216_v46 = vld [vmem:[#allocation9 + $0x144] sm:$0xf0] }
  0xa4   : > { %v4180_v51 = vor.u32 %v5216_v46, %v4179_v45  ;;  %v4332_v45 = vor.u32 %v5254_v34, %v4331_v33 }
  0xa5   : > { %1217 = vmatpush.bf16.msrb.mxu0 %v3620_v53  ;;  %1230 = vmatpush.bf16.msrb.mxu1 %v3624_v56  ;;  %v5182_v53 = vld [vmem:[#allocation9 + $0x34] sm:$0xf0] }
  0xa6   : > { %1243 = vmatpush.bf16.msrb.mxu2 %v3628_v57  ;;  %v5198_v56 = vld [vmem:[#allocation9 + $0xb4] sm:$0xf0]  ;;  %v4171_v57 = vld [vmem:[#allocation9 + $0x130] sm:$0xf] }
  0xa7   : > { %1256 = vmatpush.bf16.msrb.mxu3 %v3632_v61  ;;  %v4044_v61 = vor.u32 %v5182_v53, %v4043_v52  ;;  %v4108_v62 = vor.u32 %v5198_v56, %v4107_v54  ;;  %v4172_v63 = vor.u32 %v5214_v58, %v4171_v57  ;;  %v5268_v52 = vld [vmem:[#allocation9 + $0x2e4] sm:$0xf0]  ;;  %v4451_v53 = vld [vmem:[#allocation9 + $0x360] sm:$0xf] }
  0xa8   : > { %v5284_v54 = vld [vmem:[#allocation9 + $0x364] sm:$0xf0] }
  0xa9   : > { %1218 = vmatpush.bf16.msrb.mxu0 %v3556_v4  ;;  %1231 = vmatpush.bf16.msrb.mxu1 %v3560_v8  ;;  %v5196_v4 = vld [vmem:[#allocation9 + $0xa4] sm:$0xf0]  ;;  %v4452_v59 = vor.u32 %v5284_v54, %v4451_v53  ;;  %v4283_v53 = vld [vmem:[#allocation9 + $0x210] sm:$0xf]  ;;  %v5242_v54 = vld [vmem:[#allocation9 + $0x214] sm:$0xf0] }
  0xaa   : > { %1244 = vmatpush.bf16.msrb.mxu2 %v3564_v9  ;;  %v5228_v8 = vld [vmem:[#allocation9 + $0x1a4] sm:$0xf0]  ;;  %v4036_v9 = vor.u32 %v5180_v1, %v4035_v0  ;;  %v4100_v10 = vor.u32 %v5196_v4, %v4099_v2  ;;  %v5266_v0 = vld [vmem:[#allocation9 + $0x2d4] sm:$0xf0]  ;;  %v4443_v1 = vld [vmem:[#allocation9 + $0x350] sm:$0xf] }
  0xab   : > { %1257 = vmatpush.bf16.msrb.mxu3 %v3568_v12  ;;  %v4027_v12 = vld [vmem:[#allocation9 + $0x10] sm:$0xf]  ;;  %v5300_v56 = vld [vmem:[#allocation9 + $0x3e4] sm:$0xf0]  ;;  %v5282_v2 = vld [vmem:[#allocation9 + $0x354] sm:$0xf0] }
  0xac   : > { %1219 = vmatmul.bf16.vlgmr.msrb.gmra.mxu0 %v5817_v50  ;;  %1232 = vmatmul.bf16.vlgmr.msrb.gmra.mxu1 %v5817_v50  ;;  %v5298_v4 = vld [vmem:[#allocation9 + $0x3d4] sm:$0xf0] }
  0xad   : > { %2815 = vmatpush.bf16.msra.mxu0 %v4076_v13  ;;  %2828 = vmatpush.bf16.msra.mxu1 %v4140_v14  ;;  %v5178_v13 = vld [vmem:[#allocation9 + $0x14] sm:$0xf0]  ;;  %v4091_v14 = vld [vmem:[#allocation9 + $0x90] sm:$0xf] }
  0xae   : > { %2841 = vmatpush.bf16.msra.mxu2 %v4204_v15  ;;  %1258 = vmatmul.bf16.vlgmr.msrb.gmra.mxu3 %v5817_v50  ;;  %v4228_v15 = vor.u32 %v5228_v8, %v4227_v7  ;;  %v4028_v21 = vor.u32 %v5178_v13, %v4027_v12  ;;  %v4092_v24 = vor.u32 %v5194_v16, %v4091_v14  ;;  %v4307_v8 = vld [vmem:[#allocation9 + $0x240] sm:$0xf]  ;;  %v5264_v12 = vld [vmem:[#allocation9 + $0x2c4] sm:$0xf0] }
  0xaf   : > { %2854 = vmatpush.bf16.msra.mxu3 %v4268_v19  ;;  %1245 = vmatmul.bf16.vlgmr.msrb.gmra.mxu2 %v5817_v50  ;;  %v4116_v50 = vor.u32 %v5200_v44, %v4115_v42  ;;  %v4219_v19 = vld [vmem:[#allocation9 + $0x190] sm:$0xf]  ;;  %v4444_v7 = vor.u32 %v5282_v2, %v4443_v1  ;;  %v4435_v13 = vld [vmem:[#allocation9 + $0x340] sm:$0xf]  ;;  %v5280_v14 = vld [vmem:[#allocation9 + $0x344] sm:$0xf0] }
  0xb0   : > { %v4220_v29 = vor.u32 %v5226_v20, %v4219_v19  ;;  %v4523_v42 = vld [vmem:[#allocation9 + $0x3f0] sm:$0xf]  ;;  %v5296_v16 = vld [vmem:[#allocation9 + $0x3c4] sm:$0xf0]  ;;  %v4436_v20 = vor.u32 %v5280_v14, %v4435_v13  ;;  %v5318_v14 = vld [vmem:[#allocation9 + $0x474] sm:$0xf0] }
  0xb1   : > { %2816 = vmatpush.bf16.msra.mxu0 %v4068_v25  ;;  %2829 = vmatpush.bf16.msra.mxu1 %v4132_v26  ;;  %v4156_v25 = vor.u32 %v5210_v18, %v4155_v17  ;;  %v4083_v26 = vld [vmem:[#allocation9 + $0x80] sm:$0xf]  ;;  %v5240_v1 = vld [vmem:[#allocation9 + $0x204] sm:$0xf0]  ;;  %v4587_v13 = vld [vmem:[#allocation9 + $0x470] sm:$0xf] }
  0xb2   : > { %2842 = vmatpush.bf16.msra.mxu2 %v4196_v27  ;;  %v5192_v27 = vld [vmem:[#allocation9 + $0x84] sm:$0xf0] }
  0xb3   : > { %2855 = vmatpush.bf16.msra.mxu3 %v4260_v31  ;;  %v4211_v31 = vld [vmem:[#allocation9 + $0x180] sm:$0xf]  ;;  %v4084_v40 = vor.u32 %v5192_v27, %v4083_v26  ;;  %v5262_v27 = vld [vmem:[#allocation9 + $0x2b4] sm:$0xf0] }
  0xb4   : > { %v4212_v44 = vor.u32 %v5224_v32, %v4211_v31  ;;  %v4491_v31 = vld [vmem:[#allocation9 + $0x3b0] sm:$0xf]  ;;  %v5294_v32 = vld [vmem:[#allocation9 + $0x3b4] sm:$0xf0]  ;;  %v4364_v34 = vor.u32 %v5262_v27, %v4363_v23 }
  0xb5   : > { %2817 = vmatpush.bf16.msra.mxu0 %v4060_v37  ;;  %2830 = vmatpush.bf16.msra.mxu1 %v4124_v38  ;;  %v5270_v37 = vld [vmem:[#allocation9 + $0x2f4] sm:$0xf0]  ;;  %v4459_v38 = vld [vmem:[#allocation9 + $0x370] sm:$0xf] }
  0xb6   : > { %2843 = vmatpush.bf16.msra.mxu2 %v4188_v39  ;;  %v5286_v39 = vld [vmem:[#allocation9 + $0x374] sm:$0xf0]  ;;  %v4396_v46 = vor.u32 %v5270_v37, %v4395_v35  ;;  %v4291_v37 = vld [vmem:[#allocation9 + $0x220] sm:$0xf] }
  0xb7   : > { %2856 = vmatpush.bf16.msra.mxu3 %v4252_v43  ;;  %v5302_v43 = vld [vmem:[#allocation9 + $0x3f4] sm:$0xf0]  ;;  %v4460_v47 = vor.u32 %v5286_v39, %v4459_v38  ;;  %v5244_v38 = vld [vmem:[#allocation9 + $0x224] sm:$0xf0]  ;;  %v4355_v39 = vld [vmem:[#allocation9 + $0x2a0] sm:$0xf] }
  0xb8   : > { %v5366_v23 = vld [vmem:[#allocation9 + $0x5f4] sm:$0xf0] }
  0xb9   : > { %2818 = vmatpush.bf16.msra.mxu0 %v4052_v49  ;;  %2831 = vmatpush.bf16.msra.mxu1 %v4116_v50  ;;  %v5252_v49 = vld [vmem:[#allocation9 + $0x264] sm:$0xf0]  ;;  %v4387_v50 = vld [vmem:[#allocation9 + $0x2e0] sm:$0xf] }
  0xba   : > { %2844 = vmatpush.bf16.msra.mxu2 %v4180_v51  ;;  %v4524_v51 = vor.u32 %v5302_v43, %v4523_v42  ;;  %v4324_v57 = vor.u32 %v5252_v49, %v4323_v48  ;;  %v4388_v58 = vor.u32 %v5268_v52, %v4387_v50  ;;  %v5260_v43 = vld [vmem:[#allocation9 + $0x2a4] sm:$0xf0]  ;;  %v4292_v49 = vor.u32 %v5244_v38, %v4291_v37  ;;  %v4771_v37 = vld [vmem:[#allocation9 + $0x5e0] sm:$0xf] }
  0xbb   : > { %2857 = vmatpush.bf16.msra.mxu3 %v4244_v55  ;;  %v4515_v55 = vld [vmem:[#allocation9 + $0x3e0] sm:$0xf]  ;;  %v5292_v48 = vld [vmem:[#allocation9 + $0x3a4] sm:$0xf0] }
  0xbc   : > { %v5364_v38 = vld [vmem:[#allocation9 + $0x5e4] sm:$0xf0] }
  0xbd   : > { %2819 = vmatpush.bf16.msra.mxu0 %v4044_v61  ;;  %2832 = vmatpush.bf16.msra.mxu1 %v4108_v62  ;;  %v5250_v61 = vld [vmem:[#allocation9 + $0x254] sm:$0xf0]  ;;  %v4379_v62 = vld [vmem:[#allocation9 + $0x2d0] sm:$0xf] }
  0xbe   : > { %2845 = vmatpush.bf16.msra.mxu2 %v4172_v63  ;;  %v4516_v63 = vor.u32 %v5300_v56, %v4515_v55  ;;  %v4316_v5 = vor.u32 %v5250_v61, %v4315_v60  ;;  %v4380_v6 = vor.u32 %v5266_v0, %v4379_v62  ;;  %v4347_v55 = vld [vmem:[#allocation9 + $0x290] sm:$0xf]  ;;  %v5274_v60 = vld [vmem:[#allocation9 + $0x314] sm:$0xf0]  ;;  %v4275_v0 = vld [vmem:[#allocation9 + $0x200] sm:$0xf] }
  0xbf   : > { %2858 = vmatpush.bf16.msra.mxu3 %v4236_v3  ;;  %v4507_v3 = vld [vmem:[#allocation9 + $0x3d0] sm:$0xf]  ;;  %v5290_v62 = vld [vmem:[#allocation9 + $0x394] sm:$0xf0] }
  0xc0   : > { %v4475_v61 = vld [vmem:[#allocation9 + $0x390] sm:$0xf] }
  0xc1   : > { %2820 = vmatpush.bf16.msra.mxu0 %v4036_v9  ;;  %2833 = vmatpush.bf16.msra.mxu1 %v4100_v10  ;;  %v5248_v9 = vld [vmem:[#allocation9 + $0x244] sm:$0xf0]  ;;  %v4371_v10 = vld [vmem:[#allocation9 + $0x2c0] sm:$0xf] }
  0xc2   : > { %2846 = vmatpush.bf16.msra.mxu2 %v4164_v11  ;;  %v4508_v11 = vor.u32 %v5298_v4, %v4507_v3  ;;  %v4308_v17 = vor.u32 %v5248_v9, %v4307_v8  ;;  %v4372_v19 = vor.u32 %v5264_v12, %v4371_v10  ;;  %v4476_v8 = vor.u32 %v5290_v62, %v4475_v61  ;;  %v5272_v10 = vld [vmem:[#allocation9 + $0x304] sm:$0xf0]  ;;  %v4691_v61 = vld [vmem:[#allocation9 + $0x540] sm:$0xf] }
  0xc3   : > { %2859 = vmatpush.bf16.msra.mxu3 %v4228_v15  ;;  %v4499_v15 = vld [vmem:[#allocation9 + $0x3c0] sm:$0xf]  ;;  %v5288_v12 = vld [vmem:[#allocation9 + $0x384] sm:$0xf0] }
  0xc4   : > { %v4500_v26 = vor.u32 %v5296_v16, %v4499_v15  ;;  %v4651_v15 = vld [vmem:[#allocation9 + $0x4f0] sm:$0xf]  ;;  %v4276_v16 = vor.u32 %v5240_v1, %v4275_v0  ;;  %v5344_v62 = vld [vmem:[#allocation9 + $0x544] sm:$0xf0]  ;;  %v4755_v0 = vld [vmem:[#allocation9 + $0x5c0] sm:$0xf] }
  0xc5   : > { %2821 = vmatpush.bf16.msra.mxu0 %v4028_v21  ;;  %2834 = vmatpush.bf16.msra.mxu1 %v4092_v24  ;;  %v4299_v21 = vld [vmem:[#allocation9 + $0x230] sm:$0xf]  ;;  %v5360_v1 = vld [vmem:[#allocation9 + $0x5c4] sm:$0xf0] }
  0xc6   : > { %2847 = vmatpush.bf16.msra.mxu2 %v4156_v25  ;;  %v4300_v33 = vor.u32 %v5246_v22, %v4299_v21  ;;  %v4779_v22 = vld [vmem:[#allocation9 + $0x5f0] sm:$0xf] }
  0xc7   : > { %2860 = vmatpush.bf16.msra.mxu3 %v4220_v29  ;;  %v5278_v29 = vld [vmem:[#allocation9 + $0x334] sm:$0xf0] }
  0xc8   : > { %v4428_v35 = vor.u32 %v5278_v29, %v4427_v28  ;;  %v4579_v29 = vld [vmem:[#allocation9 + $0x460] sm:$0xf] }
  0xc9   : > { %2822 = vmatpush.bf16.msra.mxu0 %v4020_v36  ;;  %2835 = vmatpush.bf16.msra.mxu1 %v4084_v40  ;;  %v1064_v18 = vpop.f32.mrf.mxu0  ;;  %v1077_v25 = vpop.f32.mrf.mxu1  ;;  %v4492_v40 = vor.u32 %v5294_v32, %v4491_v31  ;;  %v5316_v31 = vld [vmem:[#allocation9 + $0x464] sm:$0xf0]  ;;  %v4643_v32 = vld [vmem:[#allocation9 + $0x4e0] sm:$0xf] }
  0xca   : > { %2848 = vmatpush.bf16.msra.mxu2 %v4148_v41  ;;  %v5835_v24 = vpack.c.bf16 %v1064_v18, %v1064_v18  ;;  %v5837_v30 = vpack.c.bf16 %v1077_v25, %v1077_v25  ;;  %v4715_v18 = vld [vmem:[#allocation9 + $0x570] sm:$0xf] }
  0xcb   : > { %2861 = vmatpush.bf16.msra.mxu3 %v4212_v44  ;;  %v4419_v44 = vld [vmem:[#allocation9 + $0x320] sm:$0xf] }
  0xcc   : > { %2823 = vmatmul.bf16.vlgmr.msra.gmra.mxu0 %v5835_v24  ;;  %2836 = vmatmul.bf16.vlgmr.msra.gmra.mxu1 %v5837_v30 }
  0xcd   : > { %2867 = vmatpush.bf16.msrb.mxu0 %v4332_v45  ;;  %2880 = vmatpush.bf16.msrb.mxu1 %v4396_v46  ;;  %v5276_v45 = vld [vmem:[#allocation9 + $0x324] sm:$0xf0] }
  0xce   : > { %2893 = vmatpush.bf16.msrb.mxu2 %v4460_v47  ;;  %v4483_v47 = vld [vmem:[#allocation9 + $0x3a0] sm:$0xf]  ;;  %v4420_v52 = vor.u32 %v5276_v45, %v4419_v44  ;;  %v5314_v44 = vld [vmem:[#allocation9 + $0x454] sm:$0xf0]  ;;  %v4635_v45 = vld [vmem:[#allocation9 + $0x4d0] sm:$0xf] }
  0xcf   : > { %2906 = vmatpush.bf16.msrb.mxu3 %v4524_v51  ;;  %v4356_v51 = vor.u32 %v5260_v43, %v4355_v39  ;;  %v4580_v39 = vor.u32 %v5316_v31, %v4579_v29  ;;  %v4571_v43 = vld [vmem:[#allocation9 + $0x450] sm:$0xf] }
  0xd1   : > { %2868 = vmatpush.bf16.msrb.mxu0 %v4324_v57  ;;  %2881 = vmatpush.bf16.msrb.mxu1 %v4388_v58  ;;  %v1103_v42 = vpop.f32.mrf.mxu3  ;;  %v1066_v50 = vpop.f32.mrf.mxu0  ;;  %v4484_v57 = vor.u32 %v5292_v48, %v4483_v47  ;;  %v5258_v58 = vld [vmem:[#allocation9 + $0x294] sm:$0xf0]  ;;  %v4772_v47 = vor.u32 %v5364_v38, %v4771_v37 }
  0xd2   : > { %2894 = vmatpush.bf16.msrb.mxu2 %v4452_v59  ;;  %v1090_v36 = vpop.f32.mrf.mxu2  ;;  %v5843_v46 = vpack.c.bf16 %v1103_v42, %v1103_v42  ;;  %v1079_v56 = vpop.f32.mrf.mxu1  ;;  %v4411_v59 = vld [vmem:[#allocation9 + $0x310] sm:$0xf]  ;;  %v4348_v2 = vor.u32 %v5258_v58, %v4347_v55  ;;  %v5330_v48 = vld [vmem:[#allocation9 + $0x4d4] sm:$0xf0]  ;;  %v4627_v58 = vld [vmem:[#allocation9 + $0x4c0] sm:$0xf] }
  0xd3   : > { %2907 = vmatpush.bf16.msrb.mxu3 %v4516_v63  ;;  %v5841_v41 = vpack.c.bf16 %v1090_v36, %v1090_v36  ;;  %v4284_v63 = vor.u32 %v5242_v54, %v4283_v53  ;;  %v4412_v3 = vor.u32 %v5274_v60, %v4411_v59  ;;  %v5348_v36 = vld [vmem:[#allocation9 + $0x564] sm:$0xf0]  ;;  %v5346_v50 = vld [vmem:[#allocation9 + $0x554] sm:$0xf0]  ;;  %v4572_v53 = vor.u32 %v5314_v44, %v4571_v43  ;;  %v4563_v56 = vld [vmem:[#allocation9 + $0x440] sm:$0xf] }
  0xd4   : > { %2862 = vmatmul.bf16.vlgmr.msra.gmra.mxu3 %v5843_v46  ;;  %v4636_v54 = vor.u32 %v5330_v48, %v4635_v45  ;;  %v5328_v60 = vld [vmem:[#allocation9 + $0x4c4] sm:$0xf0]  ;;  %v4603_v43 = vld [vmem:[#allocation9 + $0x490] sm:$0xf]  ;;  %v5322_v45 = vld [vmem:[#allocation9 + $0x494] sm:$0xf0] }
  0xd5   : > { %2869 = vmatpush.bf16.msrb.mxu0 %v4316_v5  ;;  %2882 = vmatpush.bf16.msrb.mxu1 %v4380_v6  ;;  %v4339_v5 = vld [vmem:[#allocation9 + $0x280] sm:$0xf]  ;;  %v5256_v6 = vld [vmem:[#allocation9 + $0x284] sm:$0xf0]  ;;  %v5338_v48 = vld [vmem:[#allocation9 + $0x514] sm:$0xf0] }
  0xd6   : > { %2895 = vmatpush.bf16.msrb.mxu2 %v4444_v7  ;;  %v4403_v7 = vld [vmem:[#allocation9 + $0x300] sm:$0xf] }
  0xd7   : > { %2908 = vmatpush.bf16.msrb.mxu3 %v4508_v11  ;;  %2849 = vmatmul.bf16.vlgmr.msra.gmra.mxu2 %v5841_v41  ;;  %v4467_v11 = vld [vmem:[#allocation9 + $0x380] sm:$0xf]  ;;  %v4404_v21 = vor.u32 %v5272_v10, %v4403_v7  ;;  %v4619_v10 = vld [vmem:[#allocation9 + $0x4b0] sm:$0xf] }
  0xd8   : > { %v4468_v25 = vor.u32 %v5288_v12, %v4467_v11  ;;  %v4756_v11 = vor.u32 %v5360_v1, %v4755_v0  ;;  %v5326_v12 = vld [vmem:[#allocation9 + $0x4b4] sm:$0xf0]  ;;  %v4843_v1 = vld [vmem:[#allocation9 + $0x670] sm:$0xf] }
  0xd9   : > { %2870 = vmatpush.bf16.msrb.mxu0 %v4308_v17  ;;  %2883 = vmatpush.bf16.msrb.mxu1 %v4372_v19  ;;  %v1105_v9 = vpop.f32.mrf.mxu3  ;;  %v5334_v17 = vld [vmem:[#allocation9 + $0x4f4] sm:$0xf0] }
  0xda   : > { %2896 = vmatpush.bf16.msrb.mxu2 %v4436_v20  ;;  %v1092_v4 = vpop.f32.mrf.mxu2  ;;  %v5350_v19 = vld [vmem:[#allocation9 + $0x574] sm:$0xf0]  ;;  %v4340_v20 = vor.u32 %v5256_v6, %v4339_v5  ;;  %v4652_v27 = vor.u32 %v5334_v17, %v4651_v15  ;;  %v4628_v5 = vor.u32 %v5328_v60, %v4627_v58  ;;  %v4692_v6 = vor.u32 %v5344_v62, %v4691_v61  ;;  %v4747_v15 = vld [vmem:[#allocation9 + $0x5b0] sm:$0xf]  ;;  %v4659_v58 = vld [vmem:[#allocation9 + $0x500] sm:$0xf] }
  0xdb   : > { %2909 = vmatpush.bf16.msrb.mxu3 %v4500_v26  ;;  %v4588_v26 = vor.u32 %v5318_v14, %v4587_v13  ;;  %v4716_v28 = vor.u32 %v5350_v19, %v4715_v18  ;;  %v5310_v9 = vld [vmem:[#allocation9 + $0x434] sm:$0xf0]  ;;  %v4683_v13 = vld [vmem:[#allocation9 + $0x530] sm:$0xf]  ;;  %v4620_v18 = vor.u32 %v5326_v12, %v4619_v10  ;;  %v5336_v61 = vld [vmem:[#allocation9 + $0x504] sm:$0xf0] }
  0xdc   : > { %v5342_v14 = vld [vmem:[#allocation9 + $0x534] sm:$0xf0]  ;;  %v4723_v62 = vld [vmem:[#allocation9 + $0x580] sm:$0xf]  ;;  %v5035_v12 = vld [vmem:[#allocation9 + $0x7f0] sm:$0xf] }
  0xdd   : > { %2871 = vmatpush.bf16.msrb.mxu0 %v4300_v33  ;;  %2884 = vmatpush.bf16.msrb.mxu1 %v4364_v34  ;;  %v4780_v33 = vor.u32 %v5366_v23, %v4779_v22  ;;  %v5332_v34 = vld [vmem:[#allocation9 + $0x4e4] sm:$0xf0]  ;;  %v4684_v19 = vor.u32 %v5342_v14, %v4683_v13  ;;  %v4611_v22 = vld [vmem:[#allocation9 + $0x4a0] sm:$0xf]  ;;  %v5430_v13 = vld [vmem:[#allocation9 + $0x7f4] sm:$0xf0] }
  0xde   : > { %2897 = vmatpush.bf16.msrb.mxu2 %v4428_v35  ;;  %v4707_v35 = vld [vmem:[#allocation9 + $0x560] sm:$0xf] }
  0xdf   : > { %2910 = vmatpush.bf16.msrb.mxu3 %v4492_v40  ;;  %v4644_v40 = vor.u32 %v5332_v34, %v4643_v32  ;;  %v4708_v42 = vor.u32 %v5348_v36, %v4707_v35  ;;  %v4739_v32 = vld [vmem:[#allocation9 + $0x5a0] sm:$0xf] }
  0xe1   : > { %2872 = vmatpush.bf16.msrb.mxu0 %v4292_v49  ;;  %2885 = vmatpush.bf16.msrb.mxu1 %v4356_v51  ;;  %v4699_v49 = vld [vmem:[#allocation9 + $0x550] sm:$0xf] }
  0xe2   : > { %2898 = vmatpush.bf16.msrb.mxu2 %v4420_v52  ;;  %v4763_v51 = vld [vmem:[#allocation9 + $0x5d0] sm:$0xf]  ;;  %v5362_v52 = vld [vmem:[#allocation9 + $0x5d4] sm:$0xf0]  ;;  %v4700_v55 = vor.u32 %v5346_v50, %v4699_v49 }
  0xe3   : > { %2911 = vmatpush.bf16.msrb.mxu3 %v4484_v57  ;;  %v5312_v57 = vld [vmem:[#allocation9 + $0x444] sm:$0xf0]  ;;  %v4764_v59 = vor.u32 %v5362_v52, %v4763_v51  ;;  %v4731_v49 = vld [vmem:[#allocation9 + $0x590] sm:$0xf]  ;;  %v5354_v50 = vld [vmem:[#allocation9 + $0x594] sm:$0xf0] }
  0xe4   : > { %v4531_v52 = vld [vmem:[#allocation9 + $0x400] sm:$0xf] }
  0xe5   : > { %2873 = vmatpush.bf16.msrb.mxu0 %v4284_v63  ;;  %2886 = vmatpush.bf16.msrb.mxu1 %v4348_v2 }
  0xe6   : > { %2899 = vmatpush.bf16.msrb.mxu2 %v4412_v3  ;;  %v4564_v3 = vor.u32 %v5312_v57, %v4563_v56  ;;  %v4595_v56 = vld [vmem:[#allocation9 + $0x480] sm:$0xf]  ;;  %v5320_v57 = vld [vmem:[#allocation9 + $0x484] sm:$0xf0] }
  0xe7   : > { %2912 = vmatpush.bf16.msrb.mxu3 %v4476_v8  ;;  %v4555_v8 = vld [vmem:[#allocation9 + $0x430] sm:$0xf]  ;;  %v4596_v10 = vor.u32 %v5320_v57, %v4595_v56  ;;  %v5011_v56 = vld [vmem:[#allocation9 + $0x7c0] sm:$0xf]  ;;  %v5424_v57 = vld [vmem:[#allocation9 + $0x7c4] sm:$0xf0] }
  0xe8   : > { %v4556_v17 = vor.u32 %v5310_v9, %v4555_v8  ;;  %v4971_v8 = vld [vmem:[#allocation9 + $0x770] sm:$0xf]  ;;  %v5414_v9 = vld [vmem:[#allocation9 + $0x774] sm:$0xf0] }
  0xe9   : > { %2874 = vmatpush.bf16.msrb.mxu0 %v4276_v16  ;;  %2887 = vmatpush.bf16.msrb.mxu1 %v4340_v20  ;;  %v1116_v63 = vpop.f32.mrf.mxu0  ;;  %v1129_v4 = vpop.f32.mrf.mxu1  ;;  %v5358_v16 = vld [vmem:[#allocation9 + $0x5b4] sm:$0xf0]  ;;  %v4547_v20 = vld [vmem:[#allocation9 + $0x420] sm:$0xf] }
  0xea   : > { %2900 = vmatpush.bf16.msrb.mxu2 %v4404_v21  ;;  %v5847_v2 = vpack.c.bf16 %v1116_v63, %v1116_v63  ;;  %v5849_v7 = vpack.c.bf16 %v1129_v4, %v1129_v4  ;;  %v5308_v21 = vld [vmem:[#allocation9 + $0x424] sm:$0xf0]  ;;  %v4748_v23 = vor.u32 %v5358_v16, %v4747_v15  ;;  %v4907_v4 = vld [vmem:[#allocation9 + $0x6f0] sm:$0xf] }
  0xeb   : > { %2913 = vmatpush.bf16.msrb.mxu3 %v4468_v25  ;;  %v4548_v36 = vor.u32 %v5308_v21, %v4547_v20  ;;  %v5352_v63 = vld [vmem:[#allocation9 + $0x584] sm:$0xf0]  ;;  %v4899_v20 = vld [vmem:[#allocation9 + $0x6e0] sm:$0xf]  ;;  %v5036_v21 = vor.u32 %v5430_v13, %v5035_v12 }
  0xec   : > { %2875 = vmatmul.bf16.vlgmr.msrb.gmra.mxu0 %v5847_v2  ;;  %2888 = vmatmul.bf16.vlgmr.msrb.gmra.mxu1 %v5849_v7  ;;  %v4724_v14 = vor.u32 %v5352_v63, %v4723_v62 }
  0xed   : > { %2919 = vmatpush.bf16.msra.mxu0 %v4588_v26  ;;  %2932 = vmatpush.bf16.msra.mxu1 %v4652_v27  ;;  %v5324_v26 = vld [vmem:[#allocation9 + $0x4a4] sm:$0xf0]  ;;  %v4675_v27 = vld [vmem:[#allocation9 + $0x520] sm:$0xf] }
  0xee   : > { %2945 = vmatpush.bf16.msra.mxu2 %v4716_v28  ;;  %v5340_v28 = vld [vmem:[#allocation9 + $0x524] sm:$0xf0]  ;;  %v4612_v38 = vor.u32 %v5324_v26, %v4611_v22  ;;  %v5027_v26 = vld [vmem:[#allocation9 + $0x7e0] sm:$0xf] }
  0xef   : > { %2958 = vmatpush.bf16.msra.mxu3 %v4780_v33  ;;  %v5356_v33 = vld [vmem:[#allocation9 + $0x5a4] sm:$0xf0] }
  0xf0   : > { %v4740_v44 = vor.u32 %v5356_v33, %v4739_v32  ;;  %v5396_v22 = vld [vmem:[#allocation9 + $0x6e4] sm:$0xf0]  ;;  %v4827_v33 = vld [vmem:[#allocation9 + $0x650] sm:$0xf] }
  0xf1   : > { %2920 = vmatpush.bf16.msra.mxu0 %v4580_v39  ;;  %2933 = vmatpush.bf16.msra.mxu1 %v4644_v40  ;;  %v1155_v31 = vpop.f32.mrf.mxu3  ;;  %v1118_v34 = vpop.f32.mrf.mxu0  ;;  %v4676_v39 = vor.u32 %v5340_v28, %v4675_v27  ;;  %v4539_v40 = vld [vmem:[#allocation9 + $0x410] sm:$0xf]  ;;  %v5428_v27 = vld [vmem:[#allocation9 + $0x7e4] sm:$0xf0] }
  0xf2   : > { %2946 = vmatpush.bf16.msra.mxu2 %v4708_v42  ;;  %v1142_v25 = vpop.f32.mrf.mxu2  ;;  %v5855_v35 = vpack.c.bf16 %v1155_v31, %v1155_v31  ;;  %v1131_v37 = vpop.f32.mrf.mxu1  ;;  %v5306_v42 = vld [vmem:[#allocation9 + $0x414] sm:$0xf0]  ;;  %v4900_v31 = vor.u32 %v5396_v22, %v4899_v20  ;;  %v4931_v20 = vld [vmem:[#allocation9 + $0x720] sm:$0xf] }
  0xf3   : > { %2959 = vmatpush.bf16.msra.mxu3 %v4772_v47  ;;  %v5853_v29 = vpack.c.bf16 %v1142_v25, %v1142_v25  ;;  %v4667_v47 = vld [vmem:[#allocation9 + $0x510] sm:$0xf]  ;;  %v4540_v51 = vor.u32 %v5306_v42, %v4539_v40  ;;  %v5412_v25 = vld [vmem:[#allocation9 + $0x764] sm:$0xf0]  ;;  %v5378_v34 = vld [vmem:[#allocation9 + $0x654] sm:$0xf0]  ;;  %v5028_v37 = vor.u32 %v5428_v27, %v5027_v26 }
  0xf4   : > { %2914 = vmatmul.bf16.vlgmr.msrb.gmra.mxu3 %v5855_v35  ;;  %v5410_v40 = vld [vmem:[#allocation9 + $0x754] sm:$0xf0]  ;;  %v5019_v42 = vld [vmem:[#allocation9 + $0x7d0] sm:$0xf]  ;;  %v5420_v26 = vld [vmem:[#allocation9 + $0x7a4] sm:$0xf0] }
  0xf5   : > { %2921 = vmatpush.bf16.msra.mxu0 %v4572_v53  ;;  %2934 = vmatpush.bf16.msra.mxu1 %v4636_v54  ;;  %v5304_v53 = vld [vmem:[#allocation9 + $0x404] sm:$0xf0]  ;;  %v4604_v54 = vor.u32 %v5322_v45, %v4603_v43  ;;  %v5426_v43 = vld [vmem:[#allocation9 + $0x7d4] sm:$0xf0] }
  0xf6   : > { %2947 = vmatpush.bf16.msra.mxu2 %v4700_v55  ;;  %v4668_v55 = vor.u32 %v5338_v48, %v4667_v47  ;;  %v4819_v48 = vld [vmem:[#allocation9 + $0x640] sm:$0xf] }
  0xf7   : > { %2960 = vmatpush.bf16.msra.mxu3 %v4764_v59  ;;  %2901 = vmatmul.bf16.vlgmr.msrb.gmra.mxu2 %v5853_v29  ;;  %v4732_v59 = vor.u32 %v5354_v50, %v4731_v49  ;;  %v5376_v49 = vld [vmem:[#allocation9 + $0x644] sm:$0xf0]  ;;  %v4883_v50 = vld [vmem:[#allocation9 + $0x6c0] sm:$0xf] }
  0xf9   : > { %2922 = vmatpush.bf16.msra.mxu0 %v4564_v3  ;;  %2935 = vmatpush.bf16.msra.mxu1 %v4628_v5  ;;  %v1157_v0 = vpop.f32.mrf.mxu3  ;;  %v5382_v3 = vld [vmem:[#allocation9 + $0x674] sm:$0xf0]  ;;  %v4532_v5 = vor.u32 %v5304_v53, %v4531_v52  ;;  %v5392_v52 = vld [vmem:[#allocation9 + $0x6c4] sm:$0xf0]  ;;  %v4947_v53 = vld [vmem:[#allocation9 + $0x740] sm:$0xf] }
  0xfa   : > { %2948 = vmatpush.bf16.msra.mxu2 %v4692_v6  ;;  %v1144_v60 = vpop.f32.mrf.mxu2  ;;  %v5398_v6 = vld [vmem:[#allocation9 + $0x6f4] sm:$0xf0]  ;;  %v4844_v15 = vor.u32 %v5382_v3, %v4843_v1  ;;  %v4811_v0 = vld [vmem:[#allocation9 + $0x630] sm:$0xf] }
  0xfb   : > { %2961 = vmatpush.bf16.msra.mxu3 %v4756_v11  ;;  %v4660_v11 = vor.u32 %v5336_v61, %v4659_v58  ;;  %v4908_v16 = vor.u32 %v5398_v6, %v4907_v4  ;;  %v4884_v61 = vor.u32 %v5392_v52, %v4883_v50  ;;  %v5374_v1 = vld [vmem:[#allocation9 + $0x634] sm:$0xf0]  ;;  %v4875_v3 = vld [vmem:[#allocation9 + $0x6b0] sm:$0xf]  ;;  %v5012_v4 = vor.u32 %v5424_v57, %v5011_v56  ;;  %v4851_v52 = vld [vmem:[#allocation9 + $0x680] sm:$0xf] }
  0xfc   : > { %v4939_v6 = vld [vmem:[#allocation9 + $0x730] sm:$0xf]  ;;  %v5400_v57 = vld [vmem:[#allocation9 + $0x704] sm:$0xf0] }
  0xfd   : > { %2923 = vmatpush.bf16.msra.mxu0 %v4556_v17  ;;  %2936 = vmatpush.bf16.msra.mxu1 %v4620_v18  ;;  %v4972_v17 = vor.u32 %v5414_v9, %v4971_v8  ;;  %v4835_v18 = vld [vmem:[#allocation9 + $0x660] sm:$0xf]  ;;  %v5406_v8 = vld [vmem:[#allocation9 + $0x734] sm:$0xf0]  ;;  %v5003_v9 = vld [vmem:[#allocation9 + $0x7b0] sm:$0xf] }
  0xfe   : > { %2949 = vmatpush.bf16.msra.mxu2 %v4684_v19  ;;  %v5380_v19 = vld [vmem:[#allocation9 + $0x664] sm:$0xf0]  ;;  %v4940_v13 = vor.u32 %v5406_v8, %v4939_v6  ;;  %v4205_v6 = vld [vmem:[#allocation9 + $0x178] sm:$0xf0] }
  0xff   : > { %2962 = vmatpush.bf16.msra.mxu3 %v4748_v23  ;;  %v4963_v23 = vld [vmem:[#allocation9 + $0x760] sm:$0xf]  ;;  %v4836_v28 = vor.u32 %v5380_v19, %v4835_v18  ;;  %v5388_v19 = vld [vmem:[#allocation9 + $0x6a4] sm:$0xf0] }
 0x100   : > { %v4964_v32 = vor.u32 %v5412_v25, %v4963_v23  ;;  %v4995_v25 = vld [vmem:[#allocation9 + $0x7a0] sm:$0xf] }
 0x101   : > { %2924 = vmatpush.bf16.msra.mxu0 %v4548_v36  ;;  %2937 = vmatpush.bf16.msra.mxu1 %v4612_v38  ;;  %v4891_v36 = vld [vmem:[#allocation9 + $0x6d0] sm:$0xf]  ;;  %v5394_v38 = vld [vmem:[#allocation9 + $0x6d4] sm:$0xf0] }
 0x102   : > { %2950 = vmatpush.bf16.msra.mxu2 %v4676_v39  ;;  %v4955_v39 = vld [vmem:[#allocation9 + $0x750] sm:$0xf]  ;;  %v4892_v45 = vor.u32 %v5394_v38, %v4891_v36 }
 0x103   : > { %2963 = vmatpush.bf16.msra.mxu3 %v4740_v44  ;;  %v4828_v44 = vor.u32 %v5378_v34, %v4827_v33  ;;  %v4956_v47 = vor.u32 %v5410_v40, %v4955_v39  ;;  %v4795_v36 = vld [vmem:[#allocation9 + $0x610] sm:$0xf]  ;;  %v4996_v39 = vor.u32 %v5420_v26, %v4995_v25  ;;  %v5386_v40 = vld [vmem:[#allocation9 + $0x694] sm:$0xf0]  ;;  %v5235_v25 = vld [vmem:[#allocation9 + $0x1e4] sm:$0xf] }
 0x104   : > { %v4859_v38 = vld [vmem:[#allocation9 + $0x690] sm:$0xf]  ;;  %v4261_v26 = vld [vmem:[#allocation9 + $0x1e8] sm:$0xf0] }
 0x105   : > { %2925 = vmatpush.bf16.msra.mxu0 %v4540_v51  ;;  %2938 = vmatpush.bf16.msra.mxu1 %v4604_v54  ;;  %v5020_v51 = vor.u32 %v5426_v43, %v5019_v42  ;;  %v5408_v54 = vld [vmem:[#allocation9 + $0x744] sm:$0xf0]  ;;  %v4923_v42 = vld [vmem:[#allocation9 + $0x710] sm:$0xf]  ;;  %v5402_v43 = vld [vmem:[#allocation9 + $0x714] sm:$0xf0]  ;;  %v4860_v50 = vor.u32 %v5386_v40, %v4859_v38 }
 0x106   : > { %2951 = vmatpush.bf16.msra.mxu2 %v4668_v55  ;;  %v4948_v62 = vor.u32 %v5408_v54, %v4947_v53  ;;  %v5384_v53 = vld [vmem:[#allocation9 + $0x684] sm:$0xf0]  ;;  %v4915_v54 = vld [vmem:[#allocation9 + $0x700] sm:$0xf]  ;;  %v4125_v38 = vld [vmem:[#allocation9 + $0xd8] sm:$0xf0] }
 0x107   : > { %2964 = vmatpush.bf16.msra.mxu3 %v4732_v59  ;;  %v4820_v59 = vor.u32 %v5376_v49, %v4819_v48  ;;  %v4787_v48 = vld [vmem:[#allocation9 + $0x600] sm:$0xf]  ;;  %v5368_v49 = vld [vmem:[#allocation9 + $0x604] sm:$0xf0]  ;;  %v4852_v8 = vor.u32 %v5384_v53, %v4851_v52  ;;  %v4189_v40 = vld [vmem:[#allocation9 + $0x158] sm:$0xf0] }
 0x108   : > { %v4117_v52 = vld [vmem:[#allocation9 + $0xc8] sm:$0xf0]  ;;  %v5215_v53 = vld [vmem:[#allocation9 + $0x144] sm:$0xf] }
 0x109   : > { %2926 = vmatpush.bf16.msra.mxu0 %v4532_v5  ;;  %2939 = vmatpush.bf16.msra.mxu1 %v4596_v10  ;;  %v1168_v55 = vpop.f32.mrf.mxu0  ;;  %v1181_v60 = vpop.f32.mrf.mxu1  ;;  %v5390_v5 = vld [vmem:[#allocation9 + $0x6b4] sm:$0xf0] }
 0x10a   : > { %2952 = vmatpush.bf16.msra.mxu2 %v4660_v11  ;;  %v5859_v58 = vpack.c.bf16 %v1168_v55, %v1168_v55  ;;  %v5861_v63 = vpack.c.bf16 %v1181_v60, %v1181_v60  ;;  %v5422_v10 = vld [vmem:[#allocation9 + $0x7b4] sm:$0xf0]  ;;  %v4812_v11 = vor.u32 %v5374_v1, %v4811_v0  ;;  %v4876_v12 = vor.u32 %v5390_v5, %v4875_v3  ;;  %v5416_v60 = vld [vmem:[#allocation9 + $0x784] sm:$0xf0]  ;;  %v4077_v0 = vld [vmem:[#allocation9 + $0x78] sm:$0xf0] }
 0x10b   : > { %2965 = vmatpush.bf16.msra.mxu3 %v4724_v14  ;;  %v4803_v14 = vld [vmem:[#allocation9 + $0x620] sm:$0xf]  ;;  %v5205_v1 = vld [vmem:[#allocation9 + $0xf4] sm:$0xf]  ;;  %v4788_v3 = vor.u32 %v5368_v49, %v4787_v48  ;;  %v5183_v48 = vld [vmem:[#allocation9 + $0x44] sm:$0xf] }
 0x10c   : > { %2927 = vmatmul.bf16.vlgmr.msra.gmra.mxu0 %v5859_v58  ;;  %2940 = vmatmul.bf16.vlgmr.msra.gmra.mxu1 %v5861_v63  ;;  %v5221_v5 = vld [vmem:[#allocation9 + $0x174] sm:$0xf]  ;;  %v4053_v49 = vld [vmem:[#allocation9 + $0x48] sm:$0xf0] }
 0x10d   : > { %2971 = vmatpush.bf16.msrb.mxu0 %v4844_v15  ;;  %2984 = vmatpush.bf16.msrb.mxu1 %v4908_v16  ;;  %v5372_v15 = vld [vmem:[#allocation9 + $0x624] sm:$0xf0]  ;;  %v4867_v16 = vld [vmem:[#allocation9 + $0x6a0] sm:$0xf] }
 0x10e   : > { %2997 = vmatpush.bf16.msrb.mxu2 %v4972_v17  ;;  %v5004_v17 = vor.u32 %v5422_v10, %v5003_v9  ;;  %v4868_v33 = vor.u32 %v5388_v19, %v4867_v16  ;;  %v4916_v9 = vor.u32 %v5400_v57, %v4915_v54  ;;  %v5237_v10 = vld [vmem:[#allocation9 + $0x1f4] sm:$0xf]  ;;  %v5187_v16 = vld [vmem:[#allocation9 + $0x64] sm:$0xf]  ;;  %v4181_v54 = vld [vmem:[#allocation9 + $0x148] sm:$0xf0] }
 0x10f   : > { %3010 = vmatpush.bf16.msrb.mxu3 %v5036_v21  ;;  %v5404_v21 = vld [vmem:[#allocation9 + $0x724] sm:$0xf0]  ;;  %v4245_v57 = vld [vmem:[#allocation9 + $0x1c8] sm:$0xf0] }
 0x110   : > { %v4932_v34 = vor.u32 %v5404_v21, %v4931_v20  ;;  %v4133_v20 = vld [vmem:[#allocation9 + $0xe8] sm:$0xf0]  ;;  %v5219_v21 = vld [vmem:[#allocation9 + $0x164] sm:$0xf] }
 0x111   : > { %2972 = vmatpush.bf16.msrb.mxu0 %v4836_v28  ;;  %2985 = vmatpush.bf16.msrb.mxu1 %v4900_v31  ;;  %v1207_v23 = vpop.f32.mrf.mxu3  ;;  %v1170_v27 = vpop.f32.mrf.mxu0  ;;  %v4804_v31 = vor.u32 %v5372_v15, %v4803_v14  ;;  %v4208_v15 = vor.u32 %v5221_v5, %v4205_v6 }
 0x112   : > { %2998 = vmatpush.bf16.msrb.mxu2 %v4964_v32  ;;  %v1194_v18 = vpop.f32.mrf.mxu2  ;;  %v5867_v28 = vpack.c.bf16 %v1207_v23, %v1207_v23  ;;  %v1183_v32 = vpop.f32.mrf.mxu1  ;;  %v4197_v23 = vld [vmem:[#allocation9 + $0x168] sm:$0xf0] }
 0x113   : > { %3011 = vmatpush.bf16.msrb.mxu3 %v5028_v37  ;;  %v5865_v22 = vpack.c.bf16 %v1194_v18, %v1194_v18  ;;  %v5370_v37 = vld [vmem:[#allocation9 + $0x614] sm:$0xf0]  ;;  %v5203_v18 = vld [vmem:[#allocation9 + $0xe4] sm:$0xf]  ;;  %v4200_v32 = vor.u32 %v5219_v21, %v4197_v23  ;;  %v4101_v23 = vld [vmem:[#allocation9 + $0xa8] sm:$0xf0] }
 0x114   : > { %2966 = vmatmul.bf16.vlgmr.msra.gmra.mxu3 %v5867_v28 }
 0x115   : > { %2973 = vmatpush.bf16.msrb.mxu0 %v4828_v44  ;;  %2986 = vmatpush.bf16.msrb.mxu1 %v4892_v45  ;;  %v4987_v44 = vld [vmem:[#allocation9 + $0x790] sm:$0xf]  ;;  %v5418_v45 = vld [vmem:[#allocation9 + $0x794] sm:$0xf0] }
 0x116   : > { %2999 = vmatpush.bf16.msrb.mxu2 %v4956_v47  ;;  %v4796_v47 = vor.u32 %v5370_v37, %v4795_v36  ;;  %v4988_v55 = vor.u32 %v5418_v45, %v4987_v44  ;;  %v5201_v36 = vld [vmem:[#allocation9 + $0xd4] sm:$0xf]  ;;  %v4264_v37 = vor.u32 %v5235_v25, %v4261_v26  ;;  %v5211_v25 = vld [vmem:[#allocation9 + $0x124] sm:$0xf]  ;;  %v4165_v26 = vld [vmem:[#allocation9 + $0x128] sm:$0xf0] }
 0x117   : > { %3012 = vmatpush.bf16.msrb.mxu3 %v5020_v51  ;;  %2953 = vmatmul.bf16.vlgmr.msra.gmra.mxu2 %v5865_v22  ;;  %v4924_v51 = vor.u32 %v5402_v43, %v4923_v42  ;;  %v5233_v42 = vld [vmem:[#allocation9 + $0x1d4] sm:$0xf]  ;;  %v4253_v43 = vld [vmem:[#allocation9 + $0x1d8] sm:$0xf0]  ;;  %v4128_v45 = vor.u32 %v5201_v36, %v4125_v38  ;;  %v4168_v38 = vor.u32 %v5211_v25, %v4165_v26  ;;  %v4325_v25 = vld [vmem:[#allocation9 + $0x268] sm:$0xf0] }
 0x118   : > { %v5267_v26 = vld [vmem:[#allocation9 + $0x2e4] sm:$0xf] }
 0x119   : > { %2974 = vmatpush.bf16.msrb.mxu0 %v4820_v59  ;;  %2987 = vmatpush.bf16.msrb.mxu1 %v4884_v61  ;;  %v4979_v59 = vld [vmem:[#allocation9 + $0x780] sm:$0xf]  ;;  %v1209_v61 = vpop.f32.mrf.mxu3 }
 0x11a   : > { %3000 = vmatpush.bf16.msrb.mxu2 %v4948_v62  ;;  %v1196_v56 = vpop.f32.mrf.mxu2  ;;  %v5189_v62 = vld [vmem:[#allocation9 + $0x74] sm:$0xf] }
 0x11b   : > { %3013 = vmatpush.bf16.msrb.mxu3 %v5012_v4  ;;  %v4141_v4 = vld [vmem:[#allocation9 + $0xf8] sm:$0xf0]  ;;  %v5231_v56 = vld [vmem:[#allocation9 + $0x1c4] sm:$0xf] }
 0x11c   : > { %v4144_v14 = vor.u32 %v5205_v1, %v4141_v4  ;;  %v5181_v1 = vld [vmem:[#allocation9 + $0x34] sm:$0xf]  ;;  %v4248_v6 = vor.u32 %v5231_v56, %v4245_v57  ;;  %v5191_v56 = vld [vmem:[#allocation9 + $0x84] sm:$0xf]  ;;  %v4085_v57 = vld [vmem:[#allocation9 + $0x88] sm:$0xf0] }
 0x11d   : > { %2975 = vmatpush.bf16.msrb.mxu0 %v4812_v11  ;;  %2988 = vmatpush.bf16.msrb.mxu1 %v4876_v12  ;;  %v4269_v11 = vld [vmem:[#allocation9 + $0x1f8] sm:$0xf0]  ;;  %v4980_v12 = vor.u32 %v5416_v60, %v4979_v59  ;;  %v4056_v60 = vor.u32 %v5183_v48, %v4053_v49  ;;  %v5197_v4 = vld [vmem:[#allocation9 + $0xb4] sm:$0xf] }
 0x11e   : > { %3001 = vmatpush.bf16.msrb.mxu2 %v4940_v13  ;;  %v4080_v13 = vor.u32 %v5189_v62, %v4077_v0  ;;  %v4272_v19 = vor.u32 %v5237_v10, %v4269_v11  ;;  %v4184_v0 = vor.u32 %v5215_v53, %v4181_v54  ;;  %v4173_v10 = vld [vmem:[#allocation9 + $0x138] sm:$0xf0]  ;;  %v5229_v11 = vld [vmem:[#allocation9 + $0x1b4] sm:$0xf]  ;;  %v4021_v53 = vld [vmem:[#allocation9 + $0x8] sm:$0xf0] }
 0x11f   : > { %3014 = vmatpush.bf16.msrb.mxu3 %v5004_v17  ;;  %v4069_v17 = vld [vmem:[#allocation9 + $0x68] sm:$0xf0]  ;;  %v4157_v48 = vld [vmem:[#allocation9 + $0x118] sm:$0xf0]  ;;  %v5225_v49 = vld [vmem:[#allocation9 + $0x194] sm:$0xf] }
 0x120   : > { %v4072_v27 = vor.u32 %v5187_v16, %v4069_v17  ;;  %v5179_v16 = vld [vmem:[#allocation9 + $0x24] sm:$0xf]  ;;  %v4037_v17 = vld [vmem:[#allocation9 + $0x28] sm:$0xf0] }
 0x121   : > { %2976 = vmatpush.bf16.msrb.mxu0 %v4804_v31  ;;  %2989 = vmatpush.bf16.msrb.mxu1 %v4868_v33  ;;  %v4136_v31 = vor.u32 %v5203_v18, %v4133_v20  ;;  %v5185_v33 = vld [vmem:[#allocation9 + $0x54] sm:$0xf]  ;;  %v5195_v18 = vld [vmem:[#allocation9 + $0xa4] sm:$0xf]  ;;  %v4040_v36 = vor.u32 %v5179_v16, %v4037_v17  ;;  %v4525_v17 = vld [vmem:[#allocation9 + $0x3f8] sm:$0xf0] }
 0x122   : > { %3002 = vmatpush.bf16.msrb.mxu2 %v4932_v34  ;;  %v4061_v34 = vld [vmem:[#allocation9 + $0x58] sm:$0xf0]  ;;  %v5301_v16 = vld [vmem:[#allocation9 + $0x3f4] sm:$0xf] }
 0x123   : > { %3015 = vmatpush.bf16.msrb.mxu3 %v4996_v39  ;;  %v5217_v39 = vld [vmem:[#allocation9 + $0x154] sm:$0xf]  ;;  %v4064_v44 = vor.u32 %v5185_v33, %v4061_v34  ;;  %v4229_v33 = vld [vmem:[#allocation9 + $0x1a8] sm:$0xf0] }
 0x125   : > { %2977 = vmatpush.bf16.msrb.mxu0 %v4796_v47  ;;  %2990 = vmatpush.bf16.msrb.mxu1 %v4860_v50  ;;  %v4192_v47 = vor.u32 %v5217_v39, %v4189_v40  ;;  %v5199_v50 = vld [vmem:[#allocation9 + $0xc4] sm:$0xf]  ;;  %v5177_v39 = vld [vmem:[#allocation9 + $0x14] sm:$0xf]  ;;  %v4029_v40 = vld [vmem:[#allocation9 + $0x18] sm:$0xf0] }
 0x126   : > { %3003 = vmatpush.bf16.msrb.mxu2 %v4924_v51  ;;  %v4256_v51 = vor.u32 %v5233_v42, %v4253_v43  ;;  %v4120_v62 = vor.u32 %v5199_v50, %v4117_v52  ;;  %v5193_v42 = vld [vmem:[#allocation9 + $0x94] sm:$0xf]  ;;  %v4221_v50 = vld [vmem:[#allocation9 + $0x198] sm:$0xf0]  ;;  %v5175_v52 = vld [vmem:[#allocation9 + $0x4] sm:$0xf] }
 0x127   : > { %3016 = vmatpush.bf16.msrb.mxu3 %v4988_v55 }
 0x129   : > { %2978 = vmatpush.bf16.msrb.mxu0 %v4788_v3  ;;  %2991 = vmatpush.bf16.msrb.mxu1 %v4852_v8  ;;  %v1220_v55 = vpop.f32.mrf.mxu0  ;;  %v1233_v61 = vpop.f32.mrf.mxu1  ;;  %v4045_v3 = vld [vmem:[#allocation9 + $0x38] sm:$0xf0] }
 0x12a   : > { %3004 = vmatpush.bf16.msrb.mxu2 %v4916_v9  ;;  %v5871_v59 = vpack.c.bf16 %v1220_v55, %v1220_v55  ;;  %v5873_v5 = vpack.c.bf16 %v1233_v61, %v1233_v61  ;;  %v4109_v8 = vld [vmem:[#allocation9 + $0xb8] sm:$0xf0]  ;;  %v5213_v9 = vld [vmem:[#allocation9 + $0x134] sm:$0xf]  ;;  %v4224_v61 = vor.u32 %v5225_v49, %v4221_v50 }
 0x12b   : > { %3017 = vmatpush.bf16.msrb.mxu3 %v4980_v12  ;;  %v4237_v12 = vld [vmem:[#allocation9 + $0x1b8] sm:$0xf0]  ;;  %v5281_v49 = vld [vmem:[#allocation9 + $0x354] sm:$0xf] }
 0x12c   : > { %2979 = vmatmul.bf16.vlgmr.msrb.gmra.mxu0 %v5871_v59  ;;  %2992 = vmatmul.bf16.vlgmr.msrb.gmra.mxu1 %v5873_v5  ;;  %v4445_v50 = vld [vmem:[#allocation9 + $0x358] sm:$0xf0] }
 0x12d   : > { %3023 = vmatpush.bf16.msra.mxu0 %v4080_v13  ;;  %3036 = vmatpush.bf16.msra.mxu1 %v4144_v14  ;;  %v4048_v13 = vor.u32 %v5181_v1, %v4045_v3  ;;  %v4112_v14 = vor.u32 %v5197_v4, %v4109_v8  ;;  %v4149_v1 = vld [vmem:[#allocation9 + $0x108] sm:$0xf0]  ;;  %v5223_v3 = vld [vmem:[#allocation9 + $0x184] sm:$0xf]  ;;  %v4333_v8 = vld [vmem:[#allocation9 + $0x278] sm:$0xf0] }
 0x12e   : > { %3049 = vmatpush.bf16.msra.mxu2 %v4208_v15  ;;  %v4176_v15 = vor.u32 %v5213_v9, %v4173_v10  ;;  %v4213_v4 = vld [vmem:[#allocation9 + $0x188] sm:$0xf0]  ;;  %v5269_v9 = vld [vmem:[#allocation9 + $0x2f4] sm:$0xf]  ;;  %v4024_v10 = vor.u32 %v5175_v52, %v4021_v53  ;;  %v4509_v52 = vld [vmem:[#allocation9 + $0x3d8] sm:$0xf0] }
 0x12f   : > { %3062 = vmatpush.bf16.msra.mxu3 %v4272_v19  ;;  %v4240_v19 = vor.u32 %v5229_v11, %v4237_v12  ;;  %v4397_v11 = vld [vmem:[#allocation9 + $0x2f8] sm:$0xf0]  ;;  %v5285_v12 = vld [vmem:[#allocation9 + $0x374] sm:$0xf] }
 0x131   : > { %3024 = vmatpush.bf16.msra.mxu0 %v4072_v27  ;;  %3037 = vmatpush.bf16.msra.mxu1 %v4136_v31  ;;  %v1259_v21 = vpop.f32.mrf.mxu3  ;;  %v1222_v34 = vpop.f32.mrf.mxu0 }
 0x132   : > { %3050 = vmatpush.bf16.msra.mxu2 %v4200_v32  ;;  %v1246_v20 = vpop.f32.mrf.mxu2  ;;  %v5879_v31 = vpack.c.bf16 %v1259_v21, %v1259_v21  ;;  %v5227_v32 = vld [vmem:[#allocation9 + $0x1a4] sm:$0xf]  ;;  %v1235_v43 = vpop.f32.mrf.mxu1 }
 0x133   : > { %3063 = vmatpush.bf16.msra.mxu3 %v4264_v37  ;;  %v5877_v27 = vpack.c.bf16 %v1246_v20, %v1246_v20  ;;  %v4104_v37 = vor.u32 %v5195_v18, %v4101_v23  ;;  %v4216_v18 = vor.u32 %v5223_v3, %v4213_v4  ;;  %v4400_v20 = vor.u32 %v5269_v9, %v4397_v11  ;;  %v5251_v23 = vld [vmem:[#allocation9 + $0x264] sm:$0xf]  ;;  %v5249_v43 = vld [vmem:[#allocation9 + $0x254] sm:$0xf]  ;;  %v4365_v11 = vld [vmem:[#allocation9 + $0x2b8] sm:$0xf0] }
 0x134   : > { %3018 = vmatmul.bf16.vlgmr.msrb.gmra.mxu3 %v5879_v31  ;;  %v5283_v34 = vld [vmem:[#allocation9 + $0x364] sm:$0xf]  ;;  %v5261_v9 = vld [vmem:[#allocation9 + $0x2b4] sm:$0xf] }
 0x135   : > { %3025 = vmatpush.bf16.msra.mxu0 %v4064_v44  ;;  %3038 = vmatpush.bf16.msra.mxu1 %v4128_v45  ;;  %v4232_v44 = vor.u32 %v5227_v32, %v4229_v33  ;;  %v4093_v45 = vld [vmem:[#allocation9 + $0x98] sm:$0xf0]  ;;  %v4528_v32 = vor.u32 %v5301_v16, %v4525_v17  ;;  %v4389_v33 = vld [vmem:[#allocation9 + $0x2e8] sm:$0xf0]  ;;  %v4368_v16 = vor.u32 %v5261_v9, %v4365_v11 }
 0x136   : > { %3051 = vmatpush.bf16.msra.mxu2 %v4192_v47  ;;  %v5209_v47 = vld [vmem:[#allocation9 + $0x114] sm:$0xf]  ;;  %v4096_v54 = vor.u32 %v5193_v42, %v4093_v45  ;;  %v4717_v9 = vld [vmem:[#allocation9 + $0x578] sm:$0xf0] }
 0x137   : > { %3064 = vmatpush.bf16.msra.mxu3 %v4256_v51  ;;  %3005 = vmatmul.bf16.vlgmr.msrb.gmra.mxu2 %v5877_v27  ;;  %v4032_v51 = vor.u32 %v5177_v39, %v4029_v40  ;;  %v4160_v55 = vor.u32 %v5209_v47, %v4157_v48  ;;  %v4328_v39 = vor.u32 %v5251_v23, %v4325_v25  ;;  %v5265_v45 = vld [vmem:[#allocation9 + $0x2d4] sm:$0xf]  ;;  %v4381_v48 = vld [vmem:[#allocation9 + $0x2d8] sm:$0xf0]  ;;  %v4357_v23 = vld [vmem:[#allocation9 + $0x2a8] sm:$0xf0] }
 0x138   : > { %v4392_v40 = vor.u32 %v5267_v26, %v4389_v33  ;;  %v5275_v25 = vld [vmem:[#allocation9 + $0x324] sm:$0xf]  ;;  %v4421_v26 = vld [vmem:[#allocation9 + $0x328] sm:$0xf0] }
 0x139   : > { %3026 = vmatpush.bf16.msra.mxu0 %v4056_v60  ;;  %3039 = vmatpush.bf16.msra.mxu1 %v4120_v62  ;;  %v5207_v60 = vld [vmem:[#allocation9 + $0x104] sm:$0xf]  ;;  %v4485_v33 = vld [vmem:[#allocation9 + $0x3a8] sm:$0xf0] }
 0x13a   : > { %3052 = vmatpush.bf16.msra.mxu2 %v4184_v0  ;;  %v1248_v62 = vpop.f32.mrf.mxu2  ;;  %v1261_v0 = vpop.f32.mrf.mxu3 }
 0x13b   : > { %3065 = vmatpush.bf16.msra.mxu3 %v4248_v6  ;;  %v5253_v6 = vld [vmem:[#allocation9 + $0x274] sm:$0xf]  ;;  %v5279_v62 = vld [vmem:[#allocation9 + $0x344] sm:$0xf]  ;;  %v4437_v0 = vld [vmem:[#allocation9 + $0x348] sm:$0xf0] }
 0x13c   : > { %v4440_v4 = vor.u32 %v5279_v62, %v4437_v0  ;;  %v4405_v62 = vld [vmem:[#allocation9 + $0x308] sm:$0xf0]  ;;  %v5287_v0 = vld [vmem:[#allocation9 + $0x384] sm:$0xf] }
 0x13d   : > { %3027 = vmatpush.bf16.msra.mxu0 %v4048_v13  ;;  %3040 = vmatpush.bf16.msra.mxu1 %v4112_v14  ;;  %v4461_v13 = vld [vmem:[#allocation9 + $0x378] sm:$0xf0]  ;;  %v4088_v14 = vor.u32 %v5191_v56, %v4085_v57  ;;  %v5247_v56 = vld [vmem:[#allocation9 + $0x244] sm:$0xf]  ;;  %v4309_v57 = vld [vmem:[#allocation9 + $0x248] sm:$0xf0] }
 0x13e   : > { %3053 = vmatpush.bf16.msra.mxu2 %v4176_v15  ;;  %v4152_v15 = vor.u32 %v5207_v60, %v4149_v1  ;;  %v4464_v21 = vor.u32 %v5285_v12, %v4461_v13  ;;  %v5263_v60 = vld [vmem:[#allocation9 + $0x2c4] sm:$0xf]  ;;  %v4501_v1 = vld [vmem:[#allocation9 + $0x3c8] sm:$0xf0]  ;;  %v4312_v3 = vor.u32 %v5247_v56, %v4309_v57  ;;  %v5277_v12 = vld [vmem:[#allocation9 + $0x334] sm:$0xf] }
 0x13f   : > { %3066 = vmatpush.bf16.msra.mxu3 %v4240_v19  ;;  %v4336_v19 = vor.u32 %v5253_v6, %v4333_v8  ;;  %v5245_v6 = vld [vmem:[#allocation9 + $0x234] sm:$0xf]  ;;  %v4301_v8 = vld [vmem:[#allocation9 + $0x238] sm:$0xf0]  ;;  %v5255_v57 = vld [vmem:[#allocation9 + $0x284] sm:$0xf] }
 0x140   : > { %v4429_v13 = vld [vmem:[#allocation9 + $0x338] sm:$0xf0] }
 0x141   : > { %3028 = vmatpush.bf16.msra.mxu0 %v4040_v36  ;;  %3041 = vmatpush.bf16.msra.mxu1 %v4104_v37  ;;  %v4453_v36 = vld [vmem:[#allocation9 + $0x368] sm:$0xf0]  ;;  %v5299_v37 = vld [vmem:[#allocation9 + $0x3e4] sm:$0xf]  ;;  %v4432_v17 = vor.u32 %v5277_v12, %v4429_v13  ;;  %v5365_v13 = vld [vmem:[#allocation9 + $0x5f4] sm:$0xf] }
 0x142   : > { %3054 = vmatpush.bf16.msra.mxu2 %v4168_v38  ;;  %v4517_v38 = vld [vmem:[#allocation9 + $0x3e8] sm:$0xf0]  ;;  %v4456_v42 = vor.u32 %v5283_v34, %v4453_v36 }
 0x143   : > { %3067 = vmatpush.bf16.msra.mxu3 %v4232_v44  ;;  %v4317_v44 = vld [vmem:[#allocation9 + $0x258] sm:$0xf0]  ;;  %v4520_v47 = vor.u32 %v5299_v37, %v4517_v38  ;;  %v4424_v38 = vor.u32 %v5275_v25, %v4421_v26  ;;  %v4645_v26 = vld [vmem:[#allocation9 + $0x4e8] sm:$0xf0] }
 0x144   : > { %v4320_v53 = vor.u32 %v5249_v43, %v4317_v44 }
 0x145   : > { %3029 = vmatpush.bf16.msra.mxu0 %v4032_v51  ;;  %3042 = vmatpush.bf16.msra.mxu1 %v4096_v54  ;;  %v5297_v51 = vld [vmem:[#allocation9 + $0x3d4] sm:$0xf]  ;;  %v4384_v54 = vor.u32 %v5265_v45, %v4381_v48  ;;  %v4349_v45 = vld [vmem:[#allocation9 + $0x298] sm:$0xf0] }
 0x146   : > { %3055 = vmatpush.bf16.msra.mxu2 %v4160_v55  ;;  %v4448_v55 = vor.u32 %v5281_v49, %v4445_v50  ;;  %v4413_v48 = vld [vmem:[#allocation9 + $0x318] sm:$0xf0]  ;;  %v5289_v50 = vld [vmem:[#allocation9 + $0x394] sm:$0xf] }
 0x147   : > { %3068 = vmatpush.bf16.msra.mxu3 %v4224_v61  ;;  %v4373_v61 = vld [vmem:[#allocation9 + $0x2c8] sm:$0xf0] }
 0x149   : > { %3030 = vmatpush.bf16.msra.mxu0 %v4024_v10  ;;  %3043 = vmatpush.bf16.msra.mxu1 %v4088_v14  ;;  %v5293_v14 = vld [vmem:[#allocation9 + $0x3b4] sm:$0xf]  ;;  %v2824_v36 = vpop.f32.mrf.mxu0  ;;  %v2837_v43 = vpop.f32.mrf.mxu1 }
 0x14a   : > { %3056 = vmatpush.bf16.msra.mxu2 %v4152_v15  ;;  %v4493_v15 = vld [vmem:[#allocation9 + $0x3b8] sm:$0xf0]  ;;  %v2838_v49 = vadd.f32 %v2837_v43, %v2824_v36  ;;  %v5363_v36 = vld [vmem:[#allocation9 + $0x5e4] sm:$0xf]  ;;  %v5313_v43 = vld [vmem:[#allocation9 + $0x454] sm:$0xf] }
 0x14b   : > { %3069 = vmatpush.bf16.msra.mxu3 %v4216_v18  ;;  %v5243_v18 = vld [vmem:[#allocation9 + $0x224] sm:$0xf] }
 0x14c   : > { %3031 = vmatmul.bf16.vlgmr.msra.gmra.mxu0 %v5835_v24  ;;  %3044 = vmatmul.bf16.vlgmr.msra.gmra.mxu1 %v5837_v30  ;;  %v4512_v24 = vor.u32 %v5297_v51, %v4509_v52  ;;  %v5295_v30 = vld [vmem:[#allocation9 + $0x3c4] sm:$0xf]  ;;  %v4477_v51 = vld [vmem:[#allocation9 + $0x398] sm:$0xf0] }
 0x14d   : > { %3075 = vmatpush.bf16.msrb.mxu0 %v4336_v19  ;;  %3088 = vmatpush.bf16.msrb.mxu1 %v4400_v20  ;;  %v4504_v10 = vor.u32 %v5295_v30, %v4501_v1  ;;  %v4293_v19 = vld [vmem:[#allocation9 + $0x228] sm:$0xf0]  ;;  %v5259_v20 = vld [vmem:[#allocation9 + $0x2a4] sm:$0xf]  ;;  %v5317_v1 = vld [vmem:[#allocation9 + $0x474] sm:$0xf] }
 0x14e   : > { %3101 = vmatpush.bf16.msrb.mxu2 %v4464_v21  ;;  %3070 = vmatmul.bf16.vlgmr.msra.gmra.mxu3 %v5843_v46  ;;  %v4304_v46 = vor.u32 %v5245_v6, %v4301_v8  ;;  %v4496_v21 = vor.u32 %v5293_v14, %v4493_v15  ;;  %v4296_v34 = vor.u32 %v5243_v18, %v4293_v19  ;;  %v4469_v30 = vld [vmem:[#allocation9 + $0x388] sm:$0xf0]  ;;  %v4653_v6 = vld [vmem:[#allocation9 + $0x4f8] sm:$0xf0]  ;;  %v5349_v8 = vld [vmem:[#allocation9 + $0x574] sm:$0xf] }
 0x14f   : > { %3114 = vmatpush.bf16.msrb.mxu3 %v4528_v32  ;;  %3057 = vmatmul.bf16.vlgmr.msra.gmra.mxu2 %v5841_v41  ;;  %v4376_v41 = vor.u32 %v5263_v60, %v4373_v61  ;;  %v5291_v32 = vld [vmem:[#allocation9 + $0x3a4] sm:$0xf]  ;;  %v4360_v37 = vor.u32 %v5259_v20, %v4357_v23  ;;  %v4341_v60 = vld [vmem:[#allocation9 + $0x288] sm:$0xf0]  ;;  %v4480_v61 = vor.u32 %v5289_v50, %v4477_v51  ;;  %v4781_v14 = vld [vmem:[#allocation9 + $0x5f8] sm:$0xf0] }
 0x150   : > { %v4488_v44 = vor.u32 %v5291_v32, %v4485_v33  ;;  %v4344_v11 = vor.u32 %v5255_v57, %v4341_v60  ;;  %v4720_v18 = vor.u32 %v5349_v8, %v4717_v9  ;;  %v5315_v19 = vld [vmem:[#allocation9 + $0x464] sm:$0xf]  ;;  %v4581_v20 = vld [vmem:[#allocation9 + $0x468] sm:$0xf0]  ;;  %v4784_v25 = vor.u32 %v5365_v13, %v4781_v14  ;;  %v5345_v50 = vld [vmem:[#allocation9 + $0x554] sm:$0xf] }
 0x151   : > { %3076 = vmatpush.bf16.msrb.mxu0 %v4328_v39  ;;  %3089 = vmatpush.bf16.msrb.mxu1 %v4392_v40  ;;  %v5241_v39 = vld [vmem:[#allocation9 + $0x214] sm:$0xf]  ;;  %v4285_v40 = vld [vmem:[#allocation9 + $0x218] sm:$0xf0]  ;;  %v2839_v15 = vpop.f32.mrf.mxu1  ;;  %v5347_v32 = vld [vmem:[#allocation9 + $0x564] sm:$0xf] }
 0x152   : > { %3102 = vmatpush.bf16.msrb.mxu2 %v4456_v42  ;;  %v5257_v42 = vld [vmem:[#allocation9 + $0x294] sm:$0xf]  ;;  %v4288_v52 = vor.u32 %v5241_v39, %v4285_v40  ;;  %v4709_v33 = vld [vmem:[#allocation9 + $0x568] sm:$0xf0]  ;;  %v4701_v51 = vld [vmem:[#allocation9 + $0x558] sm:$0xf0] }
 0x153   : > { %3115 = vmatpush.bf16.msrb.mxu3 %v4520_v47  ;;  %v5273_v47 = vld [vmem:[#allocation9 + $0x314] sm:$0xf]  ;;  %v5311_v57 = vld [vmem:[#allocation9 + $0x444] sm:$0xf]  ;;  %v4749_v14 = vld [vmem:[#allocation9 + $0x5b8] sm:$0xf0] }
 0x154   : > { %v4416_v56 = vor.u32 %v5273_v47, %v4413_v48  ;;  %v5327_v60 = vld [vmem:[#allocation9 + $0x4c4] sm:$0xf]  ;;  %v5325_v8 = vld [vmem:[#allocation9 + $0x4b4] sm:$0xf] }
 0x155   : > { %3077 = vmatpush.bf16.msrb.mxu0 %v4320_v53  ;;  %3090 = vmatpush.bf16.msrb.mxu1 %v4384_v54  ;;  %v5239_v53 = vld [vmem:[#allocation9 + $0x204] sm:$0xf]  ;;  %v4277_v54 = vld [vmem:[#allocation9 + $0x208] sm:$0xf0]  ;;  %v5357_v13 = vld [vmem:[#allocation9 + $0x5b4] sm:$0xf] }
 0x156   : > { %3103 = vmatpush.bf16.msrb.mxu2 %v4448_v55  ;;  %v4352_v55 = vor.u32 %v5257_v42, %v4349_v45  ;;  %v4712_v42 = vor.u32 %v5347_v32, %v4709_v33  ;;  %v5329_v45 = vld [vmem:[#allocation9 + $0x4d4] sm:$0xf]  ;;  %v4741_v32 = vld [vmem:[#allocation9 + $0x5a8] sm:$0xf0] }
 0x157   : > { %3116 = vmatpush.bf16.msrb.mxu3 %v4512_v24  ;;  %v5271_v24 = vld [vmem:[#allocation9 + $0x304] sm:$0xf]  ;;  %v2863_v39 = vpop.f32.mrf.mxu3 }
 0x158   : > { %v4408_v12 = vor.u32 %v5271_v24, %v4405_v62  ;;  %v4629_v62 = vld [vmem:[#allocation9 + $0x4c8] sm:$0xf0] }
 0x159   : > { %3078 = vmatpush.bf16.msrb.mxu0 %v4312_v3  ;;  %3091 = vmatpush.bf16.msrb.mxu1 %v4376_v41  ;;  %v4589_v3 = vld [vmem:[#allocation9 + $0x478] sm:$0xf0]  ;;  %v5333_v41 = vld [vmem:[#allocation9 + $0x4f4] sm:$0xf] }
 0x15a   : > { %3104 = vmatpush.bf16.msrb.mxu2 %v4440_v4  ;;  %v4280_v4 = vor.u32 %v5239_v53, %v4277_v54  ;;  %v2850_v23 = vpop.f32.mrf.mxu2  ;;  %v4765_v53 = vld [vmem:[#allocation9 + $0x5d8] sm:$0xf0] }
 0x15b   : > { %3117 = vmatpush.bf16.msrb.mxu3 %v4504_v10  ;;  %v2826_v10 = vpop.f32.mrf.mxu0 }
 0x15c   : > { %v4621_v10 = vld [vmem:[#allocation9 + $0x4b8] sm:$0xf0] }
 0x15d   : > { %3079 = vmatpush.bf16.msrb.mxu0 %v4304_v46  ;;  %3092 = vmatpush.bf16.msrb.mxu1 %v4368_v16  ;;  %v4472_v46 = vor.u32 %v5287_v0, %v4469_v30  ;;  %v4592_v16 = vor.u32 %v5317_v1, %v4589_v3  ;;  %v4693_v0 = vld [vmem:[#allocation9 + $0x548] sm:$0xf0]  ;;  %v4632_v3 = vor.u32 %v5327_v60, %v4629_v62  ;;  %v5335_v60 = vld [vmem:[#allocation9 + $0x504] sm:$0xf] }
 0x15e   : > { %3105 = vmatpush.bf16.msrb.mxu2 %v4432_v17  ;;  %v4656_v17 = vor.u32 %v5333_v41, %v4653_v6  ;;  %v4757_v30 = vld [vmem:[#allocation9 + $0x5c8] sm:$0xf0]  ;;  %v4557_v6 = vld [vmem:[#allocation9 + $0x438] sm:$0xf0]  ;;  %v5351_v62 = vld [vmem:[#allocation9 + $0x584] sm:$0xf] }
 0x15f   : > { %3118 = vmatpush.bf16.msrb.mxu3 %v4496_v21  ;;  %v5331_v21 = vld [vmem:[#allocation9 + $0x4e4] sm:$0xf] }
 0x160   : > { %v4648_v40 = vor.u32 %v5331_v21, %v4645_v26  ;;  %v4613_v21 = vld [vmem:[#allocation9 + $0x4a8] sm:$0xf0]  ;;  %v5355_v26 = vld [vmem:[#allocation9 + $0x5a4] sm:$0xf] }
 0x161   : > { %3080 = vmatpush.bf16.msrb.mxu0 %v4296_v34  ;;  %3093 = vmatpush.bf16.msrb.mxu1 %v4360_v37  ;;  %v2851_v34 = vadd.f32 %v2850_v23, %v2838_v49  ;;  %v4773_v37 = vld [vmem:[#allocation9 + $0x5e8] sm:$0xf0]  ;;  %v4637_v49 = vld [vmem:[#allocation9 + $0x4d8] sm:$0xf0]  ;;  %v5339_v23 = vld [vmem:[#allocation9 + $0x524] sm:$0xf] }
 0x162   : > { %3106 = vmatpush.bf16.msrb.mxu2 %v4424_v38  ;;  %v4584_v38 = vor.u32 %v5315_v19, %v4581_v20  ;;  %v4776_v48 = vor.u32 %v5363_v36, %v4773_v37  ;;  %v2852_v24 = vpop.f32.mrf.mxu2  ;;  %v5323_v19 = vld [vmem:[#allocation9 + $0x4a4] sm:$0xf]  ;;  %v4752_v20 = vor.u32 %v5357_v13, %v4749_v14 }
 0x163   : > { %3119 = vmatpush.bf16.msrb.mxu3 %v4488_v44  ;;  %v4573_v44 = vld [vmem:[#allocation9 + $0x458] sm:$0xf0]  ;;  %v5887_v47 = vadd.f32 %v2863_v39, %v2851_v34 }
 0x164   : > { %v4576_v54 = vor.u32 %v5313_v43, %v4573_v44  ;;  %v5321_v43 = vld [vmem:[#allocation9 + $0x494] sm:$0xf]  ;;  %v4744_v44 = vor.u32 %v5355_v26, %v4741_v32 }
 0x165   : > { %3081 = vmatpush.bf16.msrb.mxu0 %v4288_v52  ;;  %3094 = vmatpush.bf16.msrb.mxu1 %v4352_v55  ;;  %v5361_v52 = vld [vmem:[#allocation9 + $0x5d4] sm:$0xf]  ;;  %v4640_v55 = vor.u32 %v5329_v45, %v4637_v49  ;;  %v4605_v45 = vld [vmem:[#allocation9 + $0x498] sm:$0xf0] }
 0x166   : > { %3107 = vmatpush.bf16.msrb.mxu2 %v4416_v56  ;;  %v4704_v56 = vor.u32 %v5345_v50, %v4701_v51  ;;  %v4669_v49 = vld [vmem:[#allocation9 + $0x518] sm:$0xf0]  ;;  %v5353_v51 = vld [vmem:[#allocation9 + $0x594] sm:$0xf] }
 0x167   : > { %3120 = vmatpush.bf16.msrb.mxu3 %v4480_v61  ;;  %v4768_v61 = vor.u32 %v5361_v52, %v4765_v53  ;;  %v4733_v52 = vld [vmem:[#allocation9 + $0x598] sm:$0xf0] }
 0x168   : > { %v4736_v24 = vor.u32 %v5353_v51, %v4733_v52 }
 0x169   : > { %3082 = vmatpush.bf16.msrb.mxu0 %v4280_v4  ;;  %3095 = vmatpush.bf16.msrb.mxu1 %v4344_v11  ;;  %v5309_v4 = vld [vmem:[#allocation9 + $0x434] sm:$0xf]  ;;  %v2876_v33 = vpop.f32.mrf.mxu0  ;;  %v2889_v37 = vpop.f32.mrf.mxu1 }
 0x16a   : > { %3108 = vmatpush.bf16.msrb.mxu2 %v4408_v12  ;;  %v5341_v11 = vld [vmem:[#allocation9 + $0x534] sm:$0xf]  ;;  %v4685_v12 = vld [vmem:[#allocation9 + $0x538] sm:$0xf0]  ;;  %v4560_v15 = vor.u32 %v5309_v4, %v4557_v6  ;;  %v2877_v36 = vadd.f32 %v2876_v33, %v5887_v47  ;;  %v4533_v47 = vld [vmem:[#allocation9 + $0x408] sm:$0xf0] }
 0x16b   : > { %3121 = vmatpush.bf16.msrb.mxu3 %v4472_v46  ;;  %v4624_v46 = vor.u32 %v5325_v8, %v4621_v10  ;;  %v4973_v4 = vld [vmem:[#allocation9 + $0x778] sm:$0xf0]  ;;  %v5429_v10 = vld [vmem:[#allocation9 + $0x7f4] sm:$0xf] }
 0x16c   : > { %3083 = vmatmul.bf16.vlgmr.msrb.gmra.mxu0 %v5847_v2  ;;  %3096 = vmatmul.bf16.vlgmr.msrb.gmra.mxu1 %v5849_v7  ;;  %v4565_v2 = vld [vmem:[#allocation9 + $0x448] sm:$0xf0]  ;;  %v5343_v7 = vld [vmem:[#allocation9 + $0x544] sm:$0xf]  ;;  %v2890_v50 = vadd.f32 %v2889_v37, %v2877_v36 }
 0x16d   : > { %3127 = vmatpush.bf16.msra.mxu0 %v4592_v16  ;;  %3140 = vmatpush.bf16.msra.mxu1 %v4656_v17  ;;  %v4568_v1 = vor.u32 %v5311_v57, %v4565_v2  ;;  %v4696_v41 = vor.u32 %v5343_v7, %v4693_v0  ;;  %v4688_v16 = vor.u32 %v5341_v11, %v4685_v12  ;;  %v5307_v17 = vld [vmem:[#allocation9 + $0x424] sm:$0xf]  ;;  %v4597_v2 = vld [vmem:[#allocation9 + $0x488] sm:$0xf0]  ;;  %v5381_v0 = vld [vmem:[#allocation9 + $0x674] sm:$0xf] }
 0x16e   : > { %3153 = vmatpush.bf16.msra.mxu2 %v4720_v18  ;;  %3122 = vmatmul.bf16.vlgmr.msrb.gmra.mxu3 %v5855_v35  ;;  %v2865_v35 = vpop.f32.mrf.mxu3  ;;  %v4549_v18 = vld [vmem:[#allocation9 + $0x428] sm:$0xf0]  ;;  %v5319_v57 = vld [vmem:[#allocation9 + $0x484] sm:$0xf]  ;;  %v5037_v11 = vld [vmem:[#allocation9 + $0x7f8] sm:$0xf0] }
 0x16f   : > { %3166 = vmatpush.bf16.msra.mxu3 %v4784_v25  ;;  %3109 = vmatmul.bf16.vlgmr.msrb.gmra.mxu2 %v5853_v29  ;;  %v5359_v29 = vld [vmem:[#allocation9 + $0x5c4] sm:$0xf]  ;;  %v4677_v25 = vld [vmem:[#allocation9 + $0x528] sm:$0xf0]  ;;  %v4552_v34 = vor.u32 %v5307_v17, %v4549_v18  ;;  %v4600_v8 = vor.u32 %v5319_v57, %v4597_v2  ;;  %v5040_v18 = vor.u32 %v5429_v10, %v5037_v11 }
 0x170   : > { %v4760_v9 = vor.u32 %v5359_v29, %v4757_v30  ;;  %v4680_v39 = vor.u32 %v5339_v23, %v4677_v25  ;;  %v4725_v7 = vld [vmem:[#allocation9 + $0x588] sm:$0xf0]  ;;  %v4845_v29 = vld [vmem:[#allocation9 + $0x678] sm:$0xf0]  ;;  %v5397_v30 = vld [vmem:[#allocation9 + $0x6f4] sm:$0xf] }
 0x171   : > { %3128 = vmatpush.bf16.msra.mxu0 %v4584_v38  ;;  %3141 = vmatpush.bf16.msra.mxu1 %v4648_v40  ;;  %v4616_v38 = vor.u32 %v5323_v19, %v4613_v21  ;;  %v5305_v40 = vld [vmem:[#allocation9 + $0x414] sm:$0xf]  ;;  %v2891_v6 = vpop.f32.mrf.mxu1  ;;  %v4728_v12 = vor.u32 %v5351_v62, %v4725_v7  ;;  %v4848_v13 = vor.u32 %v5381_v0, %v4845_v29  ;;  %v5395_v17 = vld [vmem:[#allocation9 + $0x6e4] sm:$0xf]  ;;  %v4901_v19 = vld [vmem:[#allocation9 + $0x6e8] sm:$0xf0] }
 0x172   : > { %3154 = vmatpush.bf16.msra.mxu2 %v4712_v42  ;;  %v4541_v42 = vld [vmem:[#allocation9 + $0x418] sm:$0xf0]  ;;  %v4965_v21 = vld [vmem:[#allocation9 + $0x768] sm:$0xf0]  ;;  %v5427_v23 = vld [vmem:[#allocation9 + $0x7e4] sm:$0xf]  ;;  %v4904_v36 = vor.u32 %v5395_v17, %v4901_v19 }
 0x173   : > { %3167 = vmatpush.bf16.msra.mxu3 %v4776_v48  ;;  %v5337_v48 = vld [vmem:[#allocation9 + $0x514] sm:$0xf]  ;;  %v4544_v53 = vor.u32 %v5305_v40, %v4541_v42  ;;  %v5029_v25 = vld [vmem:[#allocation9 + $0x7e8] sm:$0xf0]  ;;  %v5407_v57 = vld [vmem:[#allocation9 + $0x744] sm:$0xf] }
 0x174   : > { %v5393_v40 = vld [vmem:[#allocation9 + $0x6d4] sm:$0xf]  ;;  %v5032_v42 = vor.u32 %v5427_v23, %v5029_v25  ;;  %v5423_v2 = vld [vmem:[#allocation9 + $0x7c4] sm:$0xf]  ;;  %v4813_v0 = vld [vmem:[#allocation9 + $0x638] sm:$0xf0] }
 0x175   : > { %3129 = vmatpush.bf16.msra.mxu0 %v4576_v54  ;;  %3142 = vmatpush.bf16.msra.mxu1 %v4640_v55  ;;  %v5303_v54 = vld [vmem:[#allocation9 + $0x404] sm:$0xf]  ;;  %v4608_v55 = vor.u32 %v5321_v43, %v4605_v45  ;;  %v5409_v45 = vld [vmem:[#allocation9 + $0x754] sm:$0xf]  ;;  %v4805_v11 = vld [vmem:[#allocation9 + $0x628] sm:$0xf0] }
 0x176   : > { %3155 = vmatpush.bf16.msra.mxu2 %v4704_v56  ;;  %v4672_v56 = vor.u32 %v5337_v48, %v4669_v49  ;;  %v4536_v35 = vor.u32 %v5303_v54, %v4533_v47  ;;  %v4957_v48 = vld [vmem:[#allocation9 + $0x758] sm:$0xf0]  ;;  %v5425_v49 = vld [vmem:[#allocation9 + $0x7d4] sm:$0xf]  ;;  %v4821_v54 = vld [vmem:[#allocation9 + $0x648] sm:$0xf0] }
 0x177   : > { %3168 = vmatpush.bf16.msra.mxu3 %v4768_v61  ;;  %v4661_v61 = vld [vmem:[#allocation9 + $0x508] sm:$0xf0]  ;;  %v5391_v47 = vld [vmem:[#allocation9 + $0x6c4] sm:$0xf]  ;;  %v5373_v7 = vld [vmem:[#allocation9 + $0x634] sm:$0xf] }
 0x178   : > { %v5389_v29 = vld [vmem:[#allocation9 + $0x6b4] sm:$0xf]  ;;  %v4816_v6 = vor.u32 %v5373_v7, %v4813_v0  ;;  %v5371_v10 = vld [vmem:[#allocation9 + $0x624] sm:$0xf]  ;;  %v4997_v17 = vld [vmem:[#allocation9 + $0x7a8] sm:$0xf0] }
 0x179   : > { %3130 = vmatpush.bf16.msra.mxu0 %v4568_v1  ;;  %3143 = vmatpush.bf16.msra.mxu1 %v4632_v3  ;;  %v2878_v1 = vpop.f32.mrf.mxu0  ;;  %v4909_v3 = vld [vmem:[#allocation9 + $0x6f8] sm:$0xf0]  ;;  %v4808_v19 = vor.u32 %v5371_v10, %v4805_v11 }
 0x17a   : > { %3156 = vmatpush.bf16.msra.mxu2 %v4696_v41  ;;  %v5413_v41 = vld [vmem:[#allocation9 + $0x774] sm:$0xf]  ;;  %v4912_v14 = vor.u32 %v5397_v30, %v4909_v3  ;;  %v2902_v26 = vpop.f32.mrf.mxu2  ;;  %v4877_v1 = vld [vmem:[#allocation9 + $0x6b8] sm:$0xf0] }
 0x17b   : > { %3169 = vmatpush.bf16.msra.mxu3 %v4760_v9  ;;  %v4664_v9 = vor.u32 %v5335_v60, %v4661_v61  ;;  %v2903_v33 = vadd.f32 %v2902_v26, %v2890_v50  ;;  %v5021_v50 = vld [vmem:[#allocation9 + $0x7d8] sm:$0xf0]  ;;  %v5369_v26 = vld [vmem:[#allocation9 + $0x614] sm:$0xf] }
 0x17c   : > { %v4941_v3 = vld [vmem:[#allocation9 + $0x738] sm:$0xf0] }
 0x17d   : > { %3131 = vmatpush.bf16.msra.mxu0 %v4560_v15  ;;  %3144 = vmatpush.bf16.msra.mxu1 %v4624_v46  ;;  %v4976_v15 = vor.u32 %v5413_v41, %v4973_v4  ;;  %v5379_v46 = vld [vmem:[#allocation9 + $0x664] sm:$0xf]  ;;  %v5421_v41 = vld [vmem:[#allocation9 + $0x7b4] sm:$0xf]  ;;  %v5005_v4 = vld [vmem:[#allocation9 + $0x7b8] sm:$0xf0] }
 0x17e   : > { %3157 = vmatpush.bf16.msra.mxu2 %v4688_v16  ;;  %v4837_v16 = vld [vmem:[#allocation9 + $0x668] sm:$0xf0] }
 0x17f   : > { %3170 = vmatpush.bf16.msra.mxu3 %v4752_v20  ;;  %v5411_v20 = vld [vmem:[#allocation9 + $0x764] sm:$0xf]  ;;  %v4840_v32 = vor.u32 %v5379_v46, %v4837_v16  ;;  %v4933_v46 = vld [vmem:[#allocation9 + $0x728] sm:$0xf0] }
 0x180   : > { %v4968_v37 = vor.u32 %v5411_v20, %v4965_v21  ;;  %v5419_v16 = vld [vmem:[#allocation9 + $0x7a4] sm:$0xf] }
 0x181   : > { %3132 = vmatpush.bf16.msra.mxu0 %v4552_v34  ;;  %3145 = vmatpush.bf16.msra.mxu1 %v4616_v38  ;;  %v2915_v34 = vpop.f32.mrf.mxu3  ;;  %v5377_v38 = vld [vmem:[#allocation9 + $0x654] sm:$0xf] }
 0x182   : > { %3158 = vmatpush.bf16.msra.mxu2 %v4680_v39  ;;  %v4829_v39 = vld [vmem:[#allocation9 + $0x658] sm:$0xf0]  ;;  %v2916_v43 = vadd.f32 %v2915_v34, %v2903_v33  ;;  %v2904_v60 = vpop.f32.mrf.mxu2  ;;  %v5385_v33 = vld [vmem:[#allocation9 + $0x694] sm:$0xf]  ;;  %v5000_v34 = vor.u32 %v5419_v16, %v4997_v17 }
 0x183   : > { %3171 = vmatpush.bf16.msra.mxu3 %v4744_v44  ;;  %v4893_v44 = vld [vmem:[#allocation9 + $0x6d8] sm:$0xf0]  ;;  %v4832_v51 = vor.u32 %v5377_v38, %v4829_v39 }
 0x184   : > { %v4896_v52 = vor.u32 %v5393_v40, %v4893_v44  ;;  %v4925_v38 = vld [vmem:[#allocation9 + $0x718] sm:$0xf0]  ;;  %v5417_v40 = vld [vmem:[#allocation9 + $0x794] sm:$0xf] }
 0x185   : > { %3133 = vmatpush.bf16.msra.mxu0 %v4544_v53  ;;  %3146 = vmatpush.bf16.msra.mxu1 %v4608_v55  ;;  %v4960_v53 = vor.u32 %v5409_v45, %v4957_v48  ;;  %v5024_v55 = vor.u32 %v5425_v49, %v5021_v50  ;;  %v5367_v48 = vld [vmem:[#allocation9 + $0x604] sm:$0xf]  ;;  %v4789_v49 = vld [vmem:[#allocation9 + $0x608] sm:$0xf0] }
 0x186   : > { %3159 = vmatpush.bf16.msra.mxu2 %v4672_v56  ;;  %v4885_v56 = vld [vmem:[#allocation9 + $0x6c8] sm:$0xf0]  ;;  %v5383_v50 = vld [vmem:[#allocation9 + $0x684] sm:$0xf] }
 0x187   : > { %3172 = vmatpush.bf16.msra.mxu3 %v4736_v24  ;;  %v4888_v61 = vor.u32 %v5391_v47, %v4885_v56  ;;  %v4981_v47 = vld [vmem:[#allocation9 + $0x788] sm:$0xf0]  ;;  %v4792_v56 = vor.u32 %v5367_v48, %v4789_v49 }
 0x189   : > { %3134 = vmatpush.bf16.msra.mxu0 %v4536_v35  ;;  %3147 = vmatpush.bf16.msra.mxu1 %v4600_v8  ;;  %v5405_v35 = vld [vmem:[#allocation9 + $0x734] sm:$0xf]  ;;  %v4880_v8 = vor.u32 %v5389_v29, %v4877_v1  ;;  %v2941_v21 = vpop.f32.mrf.mxu1 }
 0x18a   : > { %3160 = vmatpush.bf16.msra.mxu2 %v4664_v9  ;;  %v4944_v9 = vor.u32 %v5405_v35, %v4941_v3 }
 0x18b   : > { %3173 = vmatpush.bf16.msra.mxu3 %v4728_v12  ;;  %v5387_v12 = vld [vmem:[#allocation9 + $0x6a4] sm:$0xf] }
 0x18c   : > { %3135 = vmatmul.bf16.vlgmr.msra.gmra.mxu0 %v5859_v58  ;;  %3148 = vmatmul.bf16.vlgmr.msra.gmra.mxu1 %v5861_v63  ;;  %v5375_v58 = vld [vmem:[#allocation9 + $0x644] sm:$0xf]  ;;  %v4949_v63 = vld [vmem:[#allocation9 + $0x748] sm:$0xf0] }
 0x18d   : > { %3179 = vmatpush.bf16.msrb.mxu0 %v4848_v13  ;;  %3192 = vmatpush.bf16.msrb.mxu1 %v4912_v14  ;;  %v4824_v24 = vor.u32 %v5375_v58, %v4821_v54  ;;  %v4952_v62 = vor.u32 %v5407_v57, %v4949_v63  ;;  %v5008_v13 = vor.u32 %v5421_v41, %v5005_v4  ;;  %v4869_v14 = vld [vmem:[#allocation9 + $0x6a8] sm:$0xf0]  ;;  %v5415_v54 = vld [vmem:[#allocation9 + $0x784] sm:$0xf] }
 0x18e   : > { %3205 = vmatpush.bf16.msrb.mxu2 %v4976_v15  ;;  %3174 = vmatmul.bf16.vlgmr.msra.gmra.mxu3 %v5867_v28  ;;  %v2917_v28 = vpop.f32.mrf.mxu3  ;;  %v5403_v15 = vld [vmem:[#allocation9 + $0x724] sm:$0xf]  ;;  %v4872_v23 = vor.u32 %v5387_v12, %v4869_v14  ;;  %v4917_v58 = vld [vmem:[#allocation9 + $0x708] sm:$0xf0] }
 0x18f   : > { %3218 = vmatpush.bf16.msrb.mxu3 %v5040_v18  ;;  %3161 = vmatmul.bf16.vlgmr.msra.gmra.mxu2 %v5865_v22  ;;  %v5013_v22 = vld [vmem:[#allocation9 + $0x7c8] sm:$0xf0]  ;;  %v2928_v18 = vpop.f32.mrf.mxu0  ;;  %v4936_v25 = vor.u32 %v5403_v15, %v4933_v46 }
 0x190   : > { %v5016_v30 = vor.u32 %v5423_v2, %v5013_v22  ;;  %v2929_v20 = vadd.f32 %v2928_v18, %v2916_v43  ;;  %v4984_v22 = vor.u32 %v5415_v54, %v4981_v47 }
 0x191   : > { %3180 = vmatpush.bf16.msrb.mxu0 %v4840_v32  ;;  %3193 = vmatpush.bf16.msrb.mxu1 %v4904_v36  ;;  %v4797_v32 = vld [vmem:[#allocation9 + $0x618] sm:$0xf0]  ;;  %v2943_v57 = vpop.f32.mrf.mxu1 }
 0x192   : > { %3206 = vmatpush.bf16.msrb.mxu2 %v4968_v37  ;;  %v4861_v36 = vld [vmem:[#allocation9 + $0x698] sm:$0xf0]  ;;  %v5401_v37 = vld [vmem:[#allocation9 + $0x714] sm:$0xf]  ;;  %v2942_v39 = vadd.f32 %v2941_v21, %v2929_v20  ;;  %v4800_v44 = vor.u32 %v5369_v26, %v4797_v32 }
 0x193   : > { %3219 = vmatpush.bf16.msrb.mxu3 %v5032_v42  ;;  %v4989_v42 = vld [vmem:[#allocation9 + $0x798] sm:$0xf0]  ;;  %v4864_v43 = vor.u32 %v5385_v33, %v4861_v36  ;;  %v4928_v45 = vor.u32 %v5401_v37, %v4925_v38 }
 0x195   : > { %3181 = vmatpush.bf16.msrb.mxu0 %v4832_v51  ;;  %3194 = vmatpush.bf16.msrb.mxu1 %v4896_v52  ;;  %v4992_v51 = vor.u32 %v5417_v40, %v4989_v42  ;;  %v4853_v52 = vld [vmem:[#allocation9 + $0x688] sm:$0xf0] }
 0x196   : > { %3207 = vmatpush.bf16.msrb.mxu2 %v4960_v53  ;;  %v5399_v53 = vld [vmem:[#allocation9 + $0x704] sm:$0xf]  ;;  %v4856_v63 = vor.u32 %v5383_v50, %v4853_v52 }
 0x197   : > { %3220 = vmatpush.bf16.msrb.mxu3 %v5024_v55  ;;  %v2930_v55 = vpop.f32.mrf.mxu0  ;;  %v4920_v2 = vor.u32 %v5399_v53, %v4917_v58  ;;  %v2967_v28 = vpop.f32.mrf.mxu3 }
 0x199   : > { %3182 = vmatpush.bf16.msrb.mxu0 %v4824_v24  ;;  %3195 = vmatpush.bf16.msrb.mxu1 %v4888_v61 }
 0x19a   : > { %3208 = vmatpush.bf16.msrb.mxu2 %v4952_v62  ;;  %v2954_v60 = vpop.f32.mrf.mxu2 }
 0x19b   : > { %3221 = vmatpush.bf16.msrb.mxu3 %v5016_v30  ;;  %v2955_v24 = vadd.f32 %v2954_v60, %v2942_v39 }
 0x19d   : > { %3183 = vmatpush.bf16.msrb.mxu0 %v4816_v6  ;;  %3196 = vmatpush.bf16.msrb.mxu1 %v4880_v8  ;;  %v2968_v61 = vadd.f32 %v2967_v28, %v2955_v24 }
 0x19e   : > { %3209 = vmatpush.bf16.msrb.mxu2 %v4944_v9 }
 0x19f   : > { %3222 = vmatpush.bf16.msrb.mxu3 %v5008_v13  ;;  %v2969_v7 = vpop.f32.mrf.mxu3 }
 0x1a1   : > { %3184 = vmatpush.bf16.msrb.mxu0 %v4808_v19  ;;  %3197 = vmatpush.bf16.msrb.mxu1 %v4872_v23 }
 0x1a2   : > { %3210 = vmatpush.bf16.msrb.mxu2 %v4936_v25  ;;  %v2956_v62 = vpop.f32.mrf.mxu2 }
 0x1a3   : > { %3223 = vmatpush.bf16.msrb.mxu3 %v5000_v34 }
 0x1a5   : > { %3185 = vmatpush.bf16.msrb.mxu0 %v4800_v44  ;;  %3198 = vmatpush.bf16.msrb.mxu1 %v4864_v43  ;;  %v5714_v44 = vmov 0.0  }
 0x1a6   : > { %3211 = vmatpush.bf16.msrb.mxu2 %v4928_v45  ;;  %3248 = vst [vmem:[#allocation2] sm:$0xf] %v5714_v44 }
 0x1a7   : > { %3224 = vmatpush.bf16.msrb.mxu3 %v4992_v51 }
 0x1a9   : > { %3186 = vmatpush.bf16.msrb.mxu0 %v4792_v56  ;;  %3199 = vmatpush.bf16.msrb.mxu1 %v4856_v63  ;;  %v2980_v0 = vpop.f32.mrf.mxu0  ;;  %v2993_v30 = vpop.f32.mrf.mxu1 }
 0x1aa   : > { %3212 = vmatpush.bf16.msrb.mxu2 %v4920_v2  ;;  %v2981_v29 = vadd.f32 %v2980_v0, %v2968_v61 }
 0x1ab   : > { %3225 = vmatpush.bf16.msrb.mxu3 %v4984_v22 }
 0x1ac   : > { %3187 = vmatmul.bf16.vlgmr.msrb.gmra.mxu0 %v5871_v59  ;;  %3200 = vmatmul.bf16.vlgmr.msrb.gmra.mxu1 %v5873_v5  ;;  %v2994_v1 = vadd.f32 %v2993_v30, %v2981_v29 }
 0x1ad   : > { %3213 = vmatmul.bf16.vlgmr.msrb.gmra.mxu2 %v5877_v27 }
 0x1ae   : > { %3226 = vmatmul.bf16.vlgmr.msrb.gmra.mxu3 %v5879_v31 }
 0x1b1   : > { %v2982_v35 = vpop.f32.mrf.mxu0  ;;  %v2995_v3 = vpop.f32.mrf.mxu1 }
 0x1b7   : > { %v3019_v6 = vpop.f32.mrf.mxu3 }
 0x1ba   : > { %v3006_v41 = vpop.f32.mrf.mxu2 }
 0x1bb   : > { %v3007_v4 = vadd.f32 %v3006_v41, %v2994_v1 }
 0x1bd   : > { %v5902_v8 = vadd.f32 %v3019_v6, %v3007_v4 }
 0x1bf   : > { %v3021_v27 = vpop.f32.mrf.mxu3  ;;  %v3278_v52 = vmul.f32 %v5902_v8, %v5902_v8  ;;  %v3250_v47 = vsel %vm3235_vm0, %v5902_v8, 0.0 }
 0x1c0   : > { %v3251_v57 = vrot.slane %v3250_v47, 4 }
 0x1c1   : > { %v3280_v56 = vsel %vm3235_vm0, %v3278_v52, 0.0 }
 0x1c2   : > { %v3008_v5 = vpop.f32.mrf.mxu2  ;;  %v3281_v2 = vrot.slane %v3280_v56, 4  ;;  %v3252_v61 = vadd.f32 %v3251_v57, %v3250_v47 }
 0x1c4   : > { %v3282_v0 = vadd.f32 %v3281_v2, %v3280_v56  ;;  %v3253_v35 = vrot.slane %v3252_v61, 2 }
 0x1c6   : > { %v3283_v6 = vrot.slane %v3282_v0, 2 }
 0x1c9   : > { %v3032_v59 = vpop.f32.mrf.mxu0  ;;  %v3045_v9 = vpop.f32.mrf.mxu1 }
 0x1ca   : > { %v3046_v10 = vadd.f32 %v3045_v9, %v3032_v59 }
 0x1d1   : > { %v3034_v11 = vpop.f32.mrf.mxu0  ;;  %v3047_v12 = vpop.f32.mrf.mxu1 }
 0x1d2   : > { %v3058_v31 = vpop.f32.mrf.mxu2  ;;  %v3071_v14 = vpop.f32.mrf.mxu3  ;;  %v3284_v12 = vadd.f32 %v3283_v6, %v3282_v0 }
 0x1d3   : > { %v3059_v13 = vadd.f32 %v3058_v31, %v3046_v10  ;;  %v3254_v10 = vadd.f32 %v3253_v35, %v3252_v61 }
 0x1d5   : > { %v3072_v33 = vadd.f32 %v3071_v14, %v3059_v13 }
 0x1da   : > { %v3060_v15 = vpop.f32.mrf.mxu2  ;;  %v3073_v46 = vpop.f32.mrf.mxu3 }
 0x1db   : > { %v3255_v15 = vrot.slane %v3254_v10, 1 }
 0x1e9   : > { %v3084_v16 = vpop.f32.mrf.mxu0  ;;  %v3097_v17 = vpop.f32.mrf.mxu1 }
 0x1ea   : > { %v3085_v34 = vadd.f32 %v3084_v16, %v3072_v33  ;;  %v3277_v33 = vld [vmem:[#allocation2 + $0x1] ss:$2 sm:$0x3] }
 0x1ec   : > { %v3098_v40 = vadd.f32 %v3097_v17, %v3085_v34  ;;  %v3285_v17 = vrot.slane %v3284_v12, 1 }
 0x1f1   : > { %v3123_v19 = vpop.f32.mrf.mxu3  ;;  %v3086_v20 = vpop.f32.mrf.mxu0 }
 0x1f2   : > { %v3110_v18 = vpop.f32.mrf.mxu2  ;;  %v3099_v21 = vpop.f32.mrf.mxu1  ;;  %v3256_v20 = vadd.f32 %v3255_v15, %v3254_v10 }
 0x1f3   : > { %v3111_v42 = vadd.f32 %v3110_v18, %v3098_v40  ;;  %v3249_v21 = vld [vmem:[#allocation2] ss:$2 sm:$0x3] }
 0x1f5   : > { %v3124_v48 = vadd.f32 %v3123_v19, %v3111_v42 }
 0x1f9   : > { %v3125_v25 = vpop.f32.mrf.mxu3 }
 0x1fa   : > { %v3112_v23 = vpop.f32.mrf.mxu2 }
 0x209   : > { %v3136_v26 = vpop.f32.mrf.mxu0  ;;  %v3149_v32 = vpop.f32.mrf.mxu1 }
 0x20a   : > { %v3137_v49 = vadd.f32 %v3136_v26, %v3124_v48  ;;  %v3286_v26 = vadd.f32 %v3285_v17, %v3284_v12 }
 0x20c   : > { %v3150_v50 = vadd.f32 %v3149_v32, %v3137_v49 }
 0x211   : > { %v3175_v37 = vpop.f32.mrf.mxu3  ;;  %v3138_v38 = vpop.f32.mrf.mxu0 }
 0x212   : > { %v3162_v36 = vpop.f32.mrf.mxu2  ;;  %v3151_v39 = vpop.f32.mrf.mxu1 }
 0x213   : > { %v3163_v51 = vadd.f32 %v3162_v36, %v3150_v50 }
 0x215   : > { %v3176_v53 = vadd.f32 %v3175_v37, %v3163_v51 }
 0x219   : > { %v3177_v45 = vpop.f32.mrf.mxu3 }
 0x21a   : > { %v3164_v43 = vpop.f32.mrf.mxu2 }
 0x229   : > { %v3188_v58 = vpop.f32.mrf.mxu0  ;;  %v3201_v54 = vpop.f32.mrf.mxu1 }
 0x22a   : > { %v3189_v55 = vadd.f32 %v3188_v58, %v3176_v53 }
 0x22c   : > { %v3202_v63 = vadd.f32 %v3201_v54, %v3189_v55 }
 0x230   : > { %v3214_v22 = vpop.f32.mrf.mxu2 }
 0x231   : > { %v3215_v60 = vadd.f32 %v3214_v22, %v3202_v63  ;;  %v3227_v24 = vpop.f32.mrf.mxu3  ;;  %v3190_v28 = vpop.f32.mrf.mxu0 }
 0x232   : > { %v3203_v62 = vpop.f32.mrf.mxu1 }
 0x233   : > { %v3228_v7 = vadd.f32 %v3227_v24, %v3215_v60 }
 0x235   : > { %v3234_v29 = vrot.slane %v3228_v7, 6  ;;  %v3257_v30 = vsel %vm3235_vm0, %v3228_v7, 0.0  ;;  %v3279_v1 = vmul.f32 %v3228_v7, %v3228_v7 }
 0x236   : > { %v3258_v3 = vrot.slane %v3257_v30, 4 }
 0x237   : > { %v3236_v41 = vsel %vm3235_vm0, %v5902_v8, %v3234_v29  ;;  %v3287_v4 = vsel %vm3235_vm0, %v3279_v1, 0.0  ;;  %v3271_v8 = vlaneseq }
 0x238   : > { %3243 = vst [vmem:[#allocation3] sm:$0xf] %v3236_v41  ;;  %v3259_v59 = vadd.f32 %v3258_v3, %v3257_v30  ;;  %v3288_v5 = vrot.slane %v3287_v4, 4  ;;  %v3216_v9 = vpop.f32.mrf.mxu2 }
 0x239   : > { %v3229_v27 = vpop.f32.mrf.mxu3  ;;  %vm3273_vm2 = vcmp.lt.s32.totalorder %v3271_v8, 256 }
 0x23a   : > { %v3260_v11 = vrot.slane %v3259_v59, 2  ;;  %v3289_v31 = vadd.f32 %v3288_v5, %v3287_v4 }
 0x23c   : > { %v3261_v13 = vadd.f32 %v3260_v11, %v3259_v59  ;;  %v3290_v14 = vrot.slane %v3289_v31, 2 }
 0x23e   : > { %v3262_v46 = vrot.slane %v3261_v13, 1  ;;  %v3291_v16 = vadd.f32 %v3290_v14, %v3289_v31 }
 0x240   : > { %v3263_v18 = vadd.f32 %v3262_v46, %v3261_v13  ;;  %v3292_v19 = vrot.slane %v3291_v16, 1 }
 0x242   : > { %v3266_v23 = vrot.slane %v3263_v18, 7  ;;  %v3293_v25 = vadd.f32 %v3292_v19, %v3291_v16 }
 0x244   : > { %v3268_v32 = vsel %vm3267_vm1, %v3256_v20, %v3266_v23  ;;  %v3296_v34 = vrot.slane %v3293_v25, 7 }
 0x245   : > { %v3270_v36 = vadd.f32 %v3268_v32, %v3249_v21 }
 0x246   : > { %v3297_v37 = vsel %vm3267_vm1, %v3286_v26, %v3296_v34 }
 0x247   : > { %3275 = vst.msk [vmem:[#allocation2] ss:$2 sm:$0x3] %vm3273_vm2, %v3270_v36  ;;  %v3299_v38 = vadd.f32 %v3297_v37, %v3277_v33 }
 0x249   : > { %3300 = vst.msk [vmem:[#allocation2 + $0x1] ss:$2 sm:$0x3] %vm3273_vm2, %v3299_v38 }
 0x24a PF: > { %p3301_p12 = scmp.eq.s32.totalorder %s5696_s15, 1 }
 0x24b   : > { %v3331_v58 = vlaneseq (%p3301_p12)  ;;  %v3325_v47 = vld [vmem:[#allocation10] ss:$2 sm:$0x3] (%p3301_p12)  ;;  %v3328_v57 = vld [vmem:[#allocation10 + $0x1] ss:$2 sm:$0x3] (%p3301_p12) }
 0x24c   : > { %3306 = sbr.rel (!%p3301_p12) target bundleno = 624 (0x270), region = 64 }
 0x24d   : > { %vm3333_vm6 = vcmp.lt.s32.totalorder (%p3301_p12), %v3331_v58, 256 }
 0x24e   : > { %v3307_v39 = vld [vmem:[#allocation2] ss:$2 sm:$0x3] (%p3301_p12) }
 0x24f   : > { %v3308_v42 = vmul.f32 (%p3301_p12), 0.5, %v3307_v39 }
 0x250   : > { %v3310_v40 = vld [vmem:[#allocation2 + $0x1] ss:$2 sm:$0x3] (%p3301_p12) }
 0x251   : > { %v3311_v44 = vmul.f32 0.5, %v3310_v40  ;;  %v3312_v43 = vmul.f32 %v3308_v42, %v3308_v42 }
 0x253   : > { %v3313_v45 = vsub.f32 %v3311_v44, %v3312_v43 }
 0x255   : > { %v3314_v48 = vadd.f32 1e-05, %v3313_v45 }
 0x257   : > { %5516 = vrsqrt.f32 %v3314_v48  ;;  %vm3321_vm3 = vweird.f32 %v3314_v48 }
 0x25d   : > { %v5517_v49 = vpop.eup %5516 }
 0x25e   : > { %v3316_v50 = vmul.f32 %v5517_v49, %v3314_v48  ;;  %vm3322_vm4 = vweird.f32 %v5517_v49 }
 0x25f   : > { %vm3323_vm5 = vmor %vm3321_vm3, %vm3322_vm4 }
 0x260   : > { %v3317_v51 = vmul.f32 %v5517_v49, %v3316_v50 }
 0x262   : > { %v3318_v52 = vmul.f32 0.5, %v3317_v51 }
 0x264   : > { %v3319_v53 = vsub.f32 1.5, %v3318_v52 }
 0x266   : > { %v3320_v54 = vmul.f32 %v5517_v49, %v3319_v53 }
 0x268   : > { %v3324_v55 = vsel %vm3323_vm5, %v5517_v49, %v3320_v54 }
 0x269   : > { %v3326_v56 = vmul.f32 %v3325_v47, %v3324_v55 }
 0x26b   : > { %v3329_v63 = vmul.f32 %v3326_v56, %v3308_v42  ;;  %3335 = vst.msk [vmem:[#allocation2] ss:$2 sm:$0x3] %vm3333_vm6, %v3326_v56 }
 0x26d   : > { %v3330_v2 = vsub.f32 %v3328_v57, %v3329_v63 }
 0x26f   : > { %3336 = vst.msk [vmem:[#allocation2 + $0x1] ss:$2 sm:$0x3] %vm3333_vm6, %v3330_v2 }
 0x270 PF: > { %p5042_p13 = scmp.ne.s32.totalorder %s5696_s15, 1 }
 0x272   : > { %3339 = sbr.rel (%p5042_p13) target bundleno = 642 (0x282), region = 68 }
 0x277   : > { %v3347_v22 = vld [vmem:[#allocation2] ss:$2 sm:$0x3]  ;;  %v3357_v28 = vld [vmem:[#allocation2 + $0x1] ss:$2 sm:$0x3] }
 0x278   : > { %v3349_v60 = vperm.slane %v3347_v22, 0  ;;  %v3350_v24 = vperm.slane %v3347_v22, 1  ;;  %vm3352_vm7 = vcmask 1041408   ;;  %v3359_v61 = vperm.slane %v3357_v28, 0  ;;  %v3346_v7 = vld [vmem:[#allocation3] sm:$0xf] }
 0x279   : > { %v3360_v62 = vperm.slane %v3357_v28, 1 }
 0x27a   : > { %v3351_v0 = vrot.slane %v3350_v24, 6 }
 0x27b   : > { %v3361_v29 = vrot.slane %v3360_v62, 6 }
 0x27c   : > { %v3353_v30 = vsel %vm3352_vm7, %v3349_v60, %v3351_v0 }
 0x27d   : > { %v3355_v1 = vmul.f32 %v3353_v30, %v3346_v7  ;;  %v3362_v35 = vsel %vm3352_vm7, %v3359_v61, %v3361_v29 }
 0x27f   : > { %v3364_v3 = vadd.f32 %v3362_v35, %v3355_v1 }
 0x281   : > { %3365 = vst [vmem:[#allocation12] sm:$0xf] %v3364_v3 }
 0x282 PF: > { %p5479_p0 = scmp.eq.s32.totalorder %s3491_s18, 1  ;;  %s3383_s22 = sshll.u32 %s5937_s4, 4  ;;  %s3384_s22 = int_to_ptr.hbm [resolvable:$true] %s3383_s22 }
 0x283   : > { %s5715_s28 = smov [#allocation12]  }
 0x284   : > { %s3381_s5 = sshll.u32 %s5715_s28, 4  ;;  %s3382_s5 = int_to_ptr.vmem [resolvable:$true] %s3381_s5 }
 0x285   : > { %5449 = dma.vmem_to_hbm [thread:$0]  (%p5479_p0), %s3382_s5, 64, %s3384_s22, [#allocation6]  }
 0x286 PF: > { %p5481_p1 = scmp.eq.s32.totalorder %s3492_s19, 1 }
 0x288   : > { %p5467_p2 = pnand %p5481_p1, %p3497_p7 }
 0x28a   : > { %p5468_p3 = pneg %p5467_p2 }
 0x28c   : > { %5691 = dma.done.wait (%p5468_p3), [#allocation6], 64  }
 0x28d   : > { %5693 = vsyncadd (%p5468_p3), [#allocation6], 4294967232  ;;  %s22_s17 = sadd.s32 1, %s5704_s17   ;;  %s5941_s15 = smov %s5700_s16 }
 0x28e   : > { %p19_p4 = scmp.ge.s32.totalorder %s22_s17, 4   ;;  %s5942_s16 = smov %s5944_s20 }
 0x290   :  { %21 = sbr.rel (!%p19_p4) target bundleno = 7 (0x7), region = 115 }
 0x295   :  { %3402 = vsyncpa [#allocation5], 1 }
 0x296   :  { %3404 = vsyncpa [#allocation5 + $0x1], 1 }
 0x297   :  { %3405 = vsyncpa [#allocation8], 1 }
 0x298   :  { %3406 = vsyncpa [#allocation11], 1 }
 0x299   :  { %3407 = vsyncpa [#allocation6], 1 }
 0x29a   :  { %3409 = vsyncpa [#allocation6 + $0x1], 1 }

</bundles_post_ra>
